<compile_context>
chip_gen: v7x
topology: tpu7x:2x2x1
jax: 0.10.0
libtpu: 0.0.40
codegen_flags: <defaults>
</compile_context>

<pallas_src>
import jax
import jax.numpy as jnp
from jax.experimental import pallas as pl
from jax.experimental.pallas import tpu as pltpu

EPS = 1e-5
LANE = 128


def _round_up(x, m):
    return (x + m - 1) // m * m


# ---------- pass 1: conv1 (9 accumulated bf16 MXU matmuls) + BN1 partial stats ----------
def _conv1_kernel(xp_ref, w1_ref, y1_ref, st1_ref):
    # xp_ref : (H+2, W+2, Cpi) bf16  zero-padded input tile (batch dim squeezed)
    # w1_ref : (9*Cpi, Cpo)    bf16  HWIO-flattened weights
    # y1_ref : (H, W, Cpo)     bf16  raw conv1 output (bias dropped: cancelled by BN)
    # st1_ref: (2, Cpo)        f32   per-batch-item [sum, sum_of_squares]
    Cpi = xp_ref.shape[-1]
    H, W, Cpo = y1_ref.shape

    acc = None
    for kh in range(3):
        for kw in range(3):
            patch = xp_ref[kh:kh + H, kw:kw + W, :].reshape(H * W, Cpi)
            wk = w1_ref[(kh * 3 + kw) * Cpi:(kh * 3 + kw + 1) * Cpi, :]
            d = jnp.dot(patch, wk, preferred_element_type=jnp.float32)
            acc = d if acc is None else acc + d

    st1_ref[0:1, :] = jnp.sum(acc, axis=0, keepdims=True)
    st1_ref[1:2, :] = jnp.sum(acc * acc, axis=0, keepdims=True)
    y1_ref[...] = acc.reshape(H, W, Cpo).astype(y1_ref.dtype)


# ---------- pass 2: BN1 affine + ReLU, conv2 (9 matmuls) + BN2 partial stats ----------
def _conv2_kernel(y1_ref, sc1_ref, sh1_ref, w2_ref, y2_ref, st2_ref, pad_ref):
    # y1_ref : (H, W, Cpo)     bf16  raw conv1 output
    # sc1/sh1: (1, Cpo)        f32   folded BN1 affine (global stats from glue)
    # w2_ref : (9*Cpo, Cpo)    bf16
    # y2_ref : (H, W, Cpo)     bf16  raw conv2 output
    # st2_ref: (2, Cpo)        f32
    # pad_ref: (H+2, W+2, Cpo) bf16  VMEM scratch: zero-padded activation
    H, W, Cpo = y1_ref.shape
    Hp, Wp = H + 2, W + 2

    a = jnp.maximum(
        y1_ref[...].astype(jnp.float32) * sc1_ref[...] + sh1_ref[...], 0.0)
    a_bf = a.astype(jnp.bfloat16)

    # zero only the 1-pixel halo ring; interior is overwritten every step.
    zrow = jnp.zeros((1, Wp, Cpo), jnp.bfloat16)
    zcol = jnp.zeros((H, 1, Cpo), jnp.bfloat16)
    pad_ref[0:1, :, :] = zrow
    pad_ref[H + 1:H + 2, :, :] = zrow
    pad_ref[1:1 + H, 0:1, :] = zcol
    pad_ref[1:1 + H, W + 1:W + 2, :] = zcol
    pad_ref[1:1 + H, 1:1 + W, :] = a_bf

    acc = None
    for kh in range(3):
        for kw in range(3):
            patch = pad_ref[kh:kh + H, kw:kw + W, :].reshape(H * W, Cpo)
            wk = w2_ref[(kh * 3 + kw) * Cpo:(kh * 3 + kw + 1) * Cpo, :]
            d = jnp.dot(patch, wk, preferred_element_type=jnp.float32)
            acc = d if acc is None else acc + d

    st2_ref[0:1, :] = jnp.sum(acc, axis=0, keepdims=True)
    st2_ref[1:2, :] = jnp.sum(acc * acc, axis=0, keepdims=True)
    y2_ref[...] = acc.reshape(H, W, Cpo).astype(y2_ref.dtype)


def double_conv(x_nchw, params):
    """x_nchw: (N, Cin, H, W) float32.  Returns (N, Cout, H, W) float32."""
    w1, b1, g1, bt1, w2, b2, g2, bt2 = params
    del b1, b2  # conv biases are mathematically cancelled by training-mode BN
    N, Cin, H, W = x_nchw.shape
    Cout = w1.shape[-1]
    Cpi = _round_up(Cin, LANE)
    Cpo = _round_up(Cout, LANE)
    Hp, Wp = H + 2, W + 2
    f32, bf16 = jnp.float32, jnp.bfloat16

    # layout glue: NCHW -> NHWC, spatial zero-pad for conv1, lane-pad channels,
    # cast to bf16 (MXU operand dtype).
    x = jnp.transpose(x_nchw, (0, 2, 3, 1)).astype(f32)
    x_pad = jnp.pad(x, ((0, 0), (1, 1), (1, 1), (0, Cpi - Cin))).astype(bf16)

    # HWIO weights -> (9*Cpad_in, Cpad_out) bf16; BN params lane-padded (f32)
    w1p = jnp.pad(w1.astype(f32),
                  ((0, 0), (0, 0), (0, Cpi - Cin), (0, Cpo - Cout))
                  ).reshape(9 * Cpi, Cpo).astype(bf16)
    w2p = jnp.pad(w2.astype(f32),
                  ((0, 0), (0, 0), (0, Cpo - Cout), (0, Cpo - Cout))
                  ).reshape(9 * Cpo, Cpo).astype(bf16)
    g1p = jnp.pad(g1.astype(f32), (0, Cpo - Cout))
    bt1p = jnp.pad(bt1.astype(f32), (0, Cpo - Cout))
    g2p = jnp.pad(g2.astype(f32), (0, Cpo - Cout))
    bt2p = jnp.pad(bt2.astype(f32), (0, Cpo - Cout))

    cparams = pltpu.CompilerParams(
        dimension_semantics=("parallel",),
        vmem_limit_bytes=64 * 1024 * 1024)

    # -------- pass 1: conv1 + per-item stats --------
    y1, st1 = pl.pallas_call(
        _conv1_kernel,
        grid=(N,),
        in_specs=[
            pl.BlockSpec((None, Hp, Wp, Cpi), lambda n: (n, 0, 0, 0)),
            pl.BlockSpec((9 * Cpi, Cpo), lambda n: (0, 0)),
        ],
        out_specs=[
            pl.BlockSpec((None, H, W, Cpo), lambda n: (n, 0, 0, 0)),
            pl.BlockSpec((None, 2, Cpo), lambda n: (n, 0, 0)),
        ],
        out_shape=[
            jax.ShapeDtypeStruct((N, H, W, Cpo), bf16),
            jax.ShapeDtypeStruct((N, 2, Cpo), f32),
        ],
        compiler_params=cparams,
    )(x_pad, w1p)

    # fold global BN1 stats into a per-channel affine (tiny XLA glue)
    cnt = jnp.float32(N * H * W)
    tot1 = jnp.sum(st1, axis=0)
    mean1 = tot1[0] / cnt
    var1 = tot1[1] / cnt - mean1 * mean1
    inv1 = g1p * jax.lax.rsqrt(var1 + EPS)
    sc1 = inv1.reshape(1, Cpo)
    sh1 = (bt1p - mean1 * inv1).reshape(1, Cpo)

    # -------- pass 2: BN1+ReLU -> conv2 + per-item stats --------
    y2, st2 = pl.pallas_call(
        _conv2_kernel,
        grid=(N,),
        in_specs=[
            pl.BlockSpec((None, H, W, Cpo), lambda n: (n, 0, 0, 0)),
            pl.BlockSpec((1, Cpo), lambda n: (0, 0)),
            pl.BlockSpec((1, Cpo), lambda n: (0, 0)),
            pl.BlockSpec((9 * Cpo, Cpo), lambda n: (0, 0)),
        ],
        out_specs=[
            pl.BlockSpec((None, H, W, Cpo), lambda n: (n, 0, 0, 0)),
            pl.BlockSpec((None, 2, Cpo), lambda n: (n, 0, 0)),
        ],
        out_shape=[
            jax.ShapeDtypeStruct((N, H, W, Cpo), bf16),
            jax.ShapeDtypeStruct((N, 2, Cpo), f32),
        ],
        scratch_shapes=[pltpu.VMEM((Hp, Wp, Cpo), bf16)],
        compiler_params=cparams,
    )(y1, sc1, sh1, w2p)

    tot2 = jnp.sum(st2, axis=0)
    mean2 = tot2[0] / cnt
    var2 = tot2[1] / cnt - mean2 * mean2
    inv2 = g2p * jax.lax.rsqrt(var2 + EPS)
    sc2 = inv2.reshape(1, 1, 1, Cpo)
    sh2 = (bt2p - mean2 * inv2).reshape(1, 1, 1, Cpo)

    # -------- BN2 affine + final ReLU + un-pad + NHWC->NCHW: one XLA fusion --------
    out_nhwc = jnp.maximum(y2.astype(f32) * sc2 + sh2, 0.0)
    return jnp.transpose(out_nhwc[..., :Cout], (0, 3, 1, 2))


def reference(x_nchw, params):
    """Pure-JAX f32 reference of the PyTorch forward (training-mode BN)."""
    w1, b1, g1, bt1, w2, b2, g2, bt2 = params
    x = jnp.transpose(x_nchw, (0, 2, 3, 1))

    def conv(x, w, b):
        y = jax.lax.conv_general_dilated(
            x, w, (1, 1), 'SAME',
            dimension_numbers=('NHWC', 'HWIO', 'NHWC'))
        return y + b

    def bn(x, g, bt):
        m = jnp.mean(x, axis=(0, 1, 2), keepdims=True)
        v = jnp.mean((x - m) ** 2, axis=(0, 1, 2), keepdims=True)
        return (x - m) * jax.lax.rsqrt(v + EPS) * g + bt

    y = jnp.maximum(bn(conv(x, w1, b1), g1, bt1), 0.0)
    z = jnp.maximum(bn(conv(y, w2, b2), g2, bt2), 0.0)
    return jnp.transpose(z, (0, 3, 1, 2))


def init_params(key, cin, cout):
    """Deterministic, PyTorch-shaped params (conv weights stored in HWIO)."""
    ks = jax.random.split(key, 6)
    k1 = 1.0 / jnp.sqrt(cin * 9.0)
    k2 = 1.0 / jnp.sqrt(cout * 9.0)
    w1 = jax.random.uniform(ks[0], (3, 3, cin, cout), jnp.float32, -k1, k1)
    b1 = jax.random.uniform(ks[1], (cout,), jnp.float32, -k1, k1)
    w2 = jax.random.uniform(ks[2], (3, 3, cout, cout), jnp.float32, -k2, k2)
    b2 = jax.random.uniform(ks[3], (cout,), jnp.float32, -k2, k2)
    g1 = 1.0 + 0.1 * jax.random.normal(ks[4], (cout,), jnp.float32)
    bt1 = 0.1 * jax.random.normal(ks[5], (cout,), jnp.float32)
    g2 = jnp.ones((cout,), jnp.float32)
    bt2 = jnp.zeros((cout,), jnp.float32)
    return (w1, b1, g1, bt1, w2, b2, g2, bt2)


if __name__ == "__main__":
    key = jax.random.PRNGKey(0)
    kx, kp = jax.random.split(key)

    N, Cin, Cout, H, W = 2, 4, 8, 16, 16
    x = jax.random.normal(kx, (N, Cin, H, W), jnp.float32)
    params = init_params(kp, Cin, Cout)

    out = jax.block_until_ready(double_conv(x, params))
    ref = jax.block_until_ready(reference(x, params))

    assert out.shape == (N, Cout, H, W)
    # bf16 MXU operands / bf16 intermediates -> looser tolerance than pure f32
    assert jnp.allclose(out, ref, atol=5e-2, rtol=5e-2), (
        float(jnp.max(jnp.abs(out - ref))))
    print("KERNEL_OK")
</pallas_src>

<mosaic_0001>
module attributes {stable_mosaic.version = 11 : i64} {
  func.func @_conv1_kernel(%arg0: i32, %arg1: memref<1x18x18x128xbf16, #tpu.memory_space<vmem>>, %arg2: memref<1152x128xbf16, #tpu.memory_space<vmem>>, %arg3: memref<1x16x16x128xbf16, #tpu.memory_space<vmem>>, %arg4: memref<1x2x128xf32, #tpu.memory_space<vmem>>) attributes {dimension_semantics = [#tpu.dimension_semantics<parallel>], iteration_bounds = array<i64: 2>, scalar_prefetch = 0 : i64, scratch_operands = 0 : i64, tpu.core_type = #tpu.core_type<tc>, window_params = [{transform_indices = @transform_0, window_bounds = array<i64: 1, 18, 18, 128>}, {pipeline_mode = #tpu.pipeline_mode<synchronous>, transform_indices = @transform_1, window_bounds = array<i64: 1152, 128>}, {transform_indices = @transform_2, window_bounds = array<i64: 1, 16, 16, 128>}, {transform_indices = @transform_3, window_bounds = array<i64: 1, 2, 128>}]} {
    %c0 = arith.constant 0 : index
    %c0_0 = arith.constant 0 : index
    %c0_1 = arith.constant 0 : index
    %c0_2 = arith.constant 0 : index
    %0 = vector.load %arg1[%c0, %c0_0, %c0_1, %c0_2] : memref<1x18x18x128xbf16, #tpu.memory_space<vmem>>, vector<1x16x16x128xbf16>
    %1 = vector.shape_cast %0 : vector<1x16x16x128xbf16> to vector<16x16x128xbf16>
    %2 = vector.shape_cast %1 : vector<16x16x128xbf16> to vector<256x128xbf16>
    %c0_3 = arith.constant 0 : index
    %c0_4 = arith.constant 0 : index
    %3 = vector.load %arg2[%c0_3, %c0_4] : memref<1152x128xbf16, #tpu.memory_space<vmem>>, vector<128x128xbf16>
    %cst = arith.constant dense<0.000000e+00> : vector<256x128xf32>
    %4 = tpu.matmul %2, %3, %cst {dimension_numbers = #tpu.dot_dimension_numbers<[1], [0], [0], [1], [0, 0, 1, 1], [], []>} : vector<256x128xbf16>, vector<128x128xbf16>, vector<256x128xf32> -> vector<256x128xf32>
    %c0_5 = arith.constant 0 : index
    %c0_6 = arith.constant 0 : index
    %c1 = arith.constant 1 : index
    %c0_7 = arith.constant 0 : index
    %5 = vector.load %arg1[%c0_5, %c0_6, %c1, %c0_7] : memref<1x18x18x128xbf16, #tpu.memory_space<vmem>>, vector<1x16x16x128xbf16>
    %6 = vector.shape_cast %5 : vector<1x16x16x128xbf16> to vector<16x16x128xbf16>
    %7 = vector.shape_cast %6 : vector<16x16x128xbf16> to vector<256x128xbf16>
    %c128 = arith.constant 128 : index
    %c0_8 = arith.constant 0 : index
    %8 = vector.load %arg2[%c128, %c0_8] : memref<1152x128xbf16, #tpu.memory_space<vmem>>, vector<128x128xbf16>
    %cst_9 = arith.constant dense<0.000000e+00> : vector<256x128xf32>
    %9 = tpu.matmul %7, %8, %cst_9 {dimension_numbers = #tpu.dot_dimension_numbers<[1], [0], [0], [1], [0, 0, 1, 1], [], []>} : vector<256x128xbf16>, vector<128x128xbf16>, vector<256x128xf32> -> vector<256x128xf32>
    %10 = arith.addf %4, %9 : vector<256x128xf32>
    %c0_10 = arith.constant 0 : index
    %c0_11 = arith.constant 0 : index
    %c2 = arith.constant 2 : index
    %c0_12 = arith.constant 0 : index
    %11 = vector.load %arg1[%c0_10, %c0_11, %c2, %c0_12] : memref<1x18x18x128xbf16, #tpu.memory_space<vmem>>, vector<1x16x16x128xbf16>
    %12 = vector.shape_cast %11 : vector<1x16x16x128xbf16> to vector<16x16x128xbf16>
    %13 = vector.shape_cast %12 : vector<16x16x128xbf16> to vector<256x128xbf16>
    %c256 = arith.constant 256 : index
    %c0_13 = arith.constant 0 : index
    %14 = vector.load %arg2[%c256, %c0_13] : memref<1152x128xbf16, #tpu.memory_space<vmem>>, vector<128x128xbf16>
    %cst_14 = arith.constant dense<0.000000e+00> : vector<256x128xf32>
    %15 = tpu.matmul %13, %14, %cst_14 {dimension_numbers = #tpu.dot_dimension_numbers<[1], [0], [0], [1], [0, 0, 1, 1], [], []>} : vector<256x128xbf16>, vector<128x128xbf16>, vector<256x128xf32> -> vector<256x128xf32>
    %16 = arith.addf %10, %15 : vector<256x128xf32>
    %c0_15 = arith.constant 0 : index
    %c1_16 = arith.constant 1 : index
    %c0_17 = arith.constant 0 : index
    %c0_18 = arith.constant 0 : index
    %17 = vector.load %arg1[%c0_15, %c1_16, %c0_17, %c0_18] : memref<1x18x18x128xbf16, #tpu.memory_space<vmem>>, vector<1x16x16x128xbf16>
    %18 = vector.shape_cast %17 : vector<1x16x16x128xbf16> to vector<16x16x128xbf16>
    %19 = vector.shape_cast %18 : vector<16x16x128xbf16> to vector<256x128xbf16>
    %c384 = arith.constant 384 : index
    %c0_19 = arith.constant 0 : index
    %20 = vector.load %arg2[%c384, %c0_19] : memref<1152x128xbf16, #tpu.memory_space<vmem>>, vector<128x128xbf16>
    %cst_20 = arith.constant dense<0.000000e+00> : vector<256x128xf32>
    %21 = tpu.matmul %19, %20, %cst_20 {dimension_numbers = #tpu.dot_dimension_numbers<[1], [0], [0], [1], [0, 0, 1, 1], [], []>} : vector<256x128xbf16>, vector<128x128xbf16>, vector<256x128xf32> -> vector<256x128xf32>
    %22 = arith.addf %16, %21 : vector<256x128xf32>
    %c0_21 = arith.constant 0 : index
    %c1_22 = arith.constant 1 : index
    %c1_23 = arith.constant 1 : index
    %c0_24 = arith.constant 0 : index
    %23 = vector.load %arg1[%c0_21, %c1_22, %c1_23, %c0_24] : memref<1x18x18x128xbf16, #tpu.memory_space<vmem>>, vector<1x16x16x128xbf16>
    %24 = vector.shape_cast %23 : vector<1x16x16x128xbf16> to vector<16x16x128xbf16>
    %25 = vector.shape_cast %24 : vector<16x16x128xbf16> to vector<256x128xbf16>
    %c512 = arith.constant 512 : index
    %c0_25 = arith.constant 0 : index
    %26 = vector.load %arg2[%c512, %c0_25] : memref<1152x128xbf16, #tpu.memory_space<vmem>>, vector<128x128xbf16>
    %cst_26 = arith.constant dense<0.000000e+00> : vector<256x128xf32>
    %27 = tpu.matmul %25, %26, %cst_26 {dimension_numbers = #tpu.dot_dimension_numbers<[1], [0], [0], [1], [0, 0, 1, 1], [], []>} : vector<256x128xbf16>, vector<128x128xbf16>, vector<256x128xf32> -> vector<256x128xf32>
    %28 = arith.addf %22, %27 : vector<256x128xf32>
    %c0_27 = arith.constant 0 : index
    %c1_28 = arith.constant 1 : index
    %c2_29 = arith.constant 2 : index
    %c0_30 = arith.constant 0 : index
    %29 = vector.load %arg1[%c0_27, %c1_28, %c2_29, %c0_30] : memref<1x18x18x128xbf16, #tpu.memory_space<vmem>>, vector<1x16x16x128xbf16>
    %30 = vector.shape_cast %29 : vector<1x16x16x128xbf16> to vector<16x16x128xbf16>
    %31 = vector.shape_cast %30 : vector<16x16x128xbf16> to vector<256x128xbf16>
    %c640 = arith.constant 640 : index
    %c0_31 = arith.constant 0 : index
    %32 = vector.load %arg2[%c640, %c0_31] : memref<1152x128xbf16, #tpu.memory_space<vmem>>, vector<128x128xbf16>
    %cst_32 = arith.constant dense<0.000000e+00> : vector<256x128xf32>
    %33 = tpu.matmul %31, %32, %cst_32 {dimension_numbers = #tpu.dot_dimension_numbers<[1], [0], [0], [1], [0, 0, 1, 1], [], []>} : vector<256x128xbf16>, vector<128x128xbf16>, vector<256x128xf32> -> vector<256x128xf32>
    %34 = arith.addf %28, %33 : vector<256x128xf32>
    %c0_33 = arith.constant 0 : index
    %c2_34 = arith.constant 2 : index
    %c0_35 = arith.constant 0 : index
    %c0_36 = arith.constant 0 : index
    %35 = vector.load %arg1[%c0_33, %c2_34, %c0_35, %c0_36] : memref<1x18x18x128xbf16, #tpu.memory_space<vmem>>, vector<1x16x16x128xbf16>
    %36 = vector.shape_cast %35 : vector<1x16x16x128xbf16> to vector<16x16x128xbf16>
    %37 = vector.shape_cast %36 : vector<16x16x128xbf16> to vector<256x128xbf16>
    %c768 = arith.constant 768 : index
    %c0_37 = arith.constant 0 : index
    %38 = vector.load %arg2[%c768, %c0_37] : memref<1152x128xbf16, #tpu.memory_space<vmem>>, vector<128x128xbf16>
    %cst_38 = arith.constant dense<0.000000e+00> : vector<256x128xf32>
    %39 = tpu.matmul %37, %38, %cst_38 {dimension_numbers = #tpu.dot_dimension_numbers<[1], [0], [0], [1], [0, 0, 1, 1], [], []>} : vector<256x128xbf16>, vector<128x128xbf16>, vector<256x128xf32> -> vector<256x128xf32>
    %40 = arith.addf %34, %39 : vector<256x128xf32>
    %c0_39 = arith.constant 0 : index
    %c2_40 = arith.constant 2 : index
    %c1_41 = arith.constant 1 : index
    %c0_42 = arith.constant 0 : index
    %41 = vector.load %arg1[%c0_39, %c2_40, %c1_41, %c0_42] : memref<1x18x18x128xbf16, #tpu.memory_space<vmem>>, vector<1x16x16x128xbf16>
    %42 = vector.shape_cast %41 : vector<1x16x16x128xbf16> to vector<16x16x128xbf16>
    %43 = vector.shape_cast %42 : vector<16x16x128xbf16> to vector<256x128xbf16>
    %c896 = arith.constant 896 : index
    %c0_43 = arith.constant 0 : index
    %44 = vector.load %arg2[%c896, %c0_43] : memref<1152x128xbf16, #tpu.memory_space<vmem>>, vector<128x128xbf16>
    %cst_44 = arith.constant dense<0.000000e+00> : vector<256x128xf32>
    %45 = tpu.matmul %43, %44, %cst_44 {dimension_numbers = #tpu.dot_dimension_numbers<[1], [0], [0], [1], [0, 0, 1, 1], [], []>} : vector<256x128xbf16>, vector<128x128xbf16>, vector<256x128xf32> -> vector<256x128xf32>
    %46 = arith.addf %40, %45 : vector<256x128xf32>
    %c0_45 = arith.constant 0 : index
    %c2_46 = arith.constant 2 : index
    %c2_47 = arith.constant 2 : index
    %c0_48 = arith.constant 0 : index
    %47 = vector.load %arg1[%c0_45, %c2_46, %c2_47, %c0_48] : memref<1x18x18x128xbf16, #tpu.memory_space<vmem>>, vector<1x16x16x128xbf16>
    %48 = vector.shape_cast %47 : vector<1x16x16x128xbf16> to vector<16x16x128xbf16>
    %49 = vector.shape_cast %48 : vector<16x16x128xbf16> to vector<256x128xbf16>
    %c1024 = arith.constant 1024 : index
    %c0_49 = arith.constant 0 : index
    %50 = vector.load %arg2[%c1024, %c0_49] : memref<1152x128xbf16, #tpu.memory_space<vmem>>, vector<128x128xbf16>
    %cst_50 = arith.constant dense<0.000000e+00> : vector<256x128xf32>
    %51 = tpu.matmul %49, %50, %cst_50 {dimension_numbers = #tpu.dot_dimension_numbers<[1], [0], [0], [1], [0, 0, 1, 1], [], []>} : vector<256x128xbf16>, vector<128x128xbf16>, vector<256x128xf32> -> vector<256x128xf32>
    %52 = arith.addf %46, %51 : vector<256x128xf32>
    %cst_51 = arith.constant dense<0.000000e+00> : vector<128xf32>
    %53 = vector.multi_reduction <add>, %52, %cst_51 [0] : vector<256x128xf32> to vector<128xf32>
    %54 = vector.shape_cast %53 : vector<128xf32> to vector<1x128xf32>
    %c0_52 = arith.constant 0 : index
    %c0_53 = arith.constant 0 : index
    %c0_54 = arith.constant 0 : index
    %55 = vector.load %arg4[%c0_52, %c0_53, %c0_54] : memref<1x2x128xf32, #tpu.memory_space<vmem>>, vector<1x1x128xf32>
    %56 = vector.shape_cast %55 : vector<1x1x128xf32> to vector<1x128xf32>
    %57 = vector.shape_cast %54 : vector<1x128xf32> to vector<1x1x128xf32>
    tpu.vector_store %arg4[%c0_52, %c0_53, %c0_54], %57 {strides = array<i32>} : memref<1x2x128xf32, #tpu.memory_space<vmem>>, vector<1x1x128xf32>,
    %58 = arith.mulf %52, %52 : vector<256x128xf32>
    %cst_55 = arith.constant dense<0.000000e+00> : vector<128xf32>
    %59 = vector.multi_reduction <add>, %58, %cst_55 [0] : vector<256x128xf32> to vector<128xf32>
    %60 = vector.shape_cast %59 : vector<128xf32> to vector<1x128xf32>
    %c0_56 = arith.constant 0 : index
    %c1_57 = arith.constant 1 : index
    %c0_58 = arith.constant 0 : index
    %61 = vector.load %arg4[%c0_56, %c1_57, %c0_58] : memref<1x2x128xf32, #tpu.memory_space<vmem>>, vector<1x1x128xf32>
    %62 = vector.shape_cast %61 : vector<1x1x128xf32> to vector<1x128xf32>
    %63 = vector.shape_cast %60 : vector<1x128xf32> to vector<1x1x128xf32>
    tpu.vector_store %arg4[%c0_56, %c1_57, %c0_58], %63 {strides = array<i32>} : memref<1x2x128xf32, #tpu.memory_space<vmem>>, vector<1x1x128xf32>,
    %64 = vector.shape_cast %52 : vector<256x128xf32> to vector<16x16x128xf32>
    %65 = arith.truncf %64 : vector<16x16x128xf32> to vector<16x16x128xbf16>
    %c0_59 = arith.constant 0 : index
    %c0_60 = arith.constant 0 : index
    %c0_61 = arith.constant 0 : index
    %c0_62 = arith.constant 0 : index
    %66 = vector.load %arg3[%c0_59, %c0_60, %c0_61, %c0_62] : memref<1x16x16x128xbf16, #tpu.memory_space<vmem>>, vector<1x16x16x128xbf16>
    %67 = vector.shape_cast %66 : vector<1x16x16x128xbf16> to vector<16x16x128xbf16>
    %68 = vector.shape_cast %65 : vector<16x16x128xbf16> to vector<1x16x16x128xbf16>
    tpu.vector_store %arg3[%c0_59, %c0_60, %c0_61, %c0_62], %68 {strides = array<i32>} : memref<1x16x16x128xbf16, #tpu.memory_space<vmem>>, vector<1x16x16x128xbf16>,
    return
  }
  func.func @transform_0(%arg0: i32) -> (i32, i32, i32, i32) {
    %c0_i32 = arith.constant 0 : i32
    %c0_i32_0 = arith.constant 0 : i32
    %c0_i32_1 = arith.constant 0 : i32
    %c0_i32_2 = arith.constant 0 : i32
    return %arg0, %c0_i32, %c0_i32_0, %c0_i32_1 : i32, i32, i32, i32
  }
  func.func @transform_1(%arg0: i32) -> (i32, i32) {
    %c0_i32 = arith.constant 0 : i32
    %c0_i32_0 = arith.constant 0 : i32
    %c0_i32_1 = arith.constant 0 : i32
    return %c0_i32, %c0_i32_0 : i32, i32
  }
  func.func @transform_2(%arg0: i32) -> (i32, i32, i32, i32) {
    %c0_i32 = arith.constant 0 : i32
    %c0_i32_0 = arith.constant 0 : i32
    %c0_i32_1 = arith.constant 0 : i32
    %c0_i32_2 = arith.constant 0 : i32
    return %arg0, %c0_i32, %c0_i32_0, %c0_i32_1 : i32, i32, i32, i32
  }
  func.func @transform_3(%arg0: i32) -> (i32, i32, i32) {
    %c0_i32 = arith.constant 0 : i32
    %c0_i32_0 = arith.constant 0 : i32
    %c0_i32_1 = arith.constant 0 : i32
    return %arg0, %c0_i32, %c0_i32_0 : i32, i32, i32
  }
}

</mosaic_0001>

<bundles_post_ra>
// kernel: tpu_custom_call.1
= control target key start
LH: loop header
LB: loop body
LE: loop exit
PB: predicated region body
PF: predicated region fallthrough
CT: control target
= control target key end

     0   :  { %9 = vsyncpa [#allocation3], 0  ;;  %s9255_s0 = inlined_call_operand.hbm [shape: bf16[2,18,18,128], index: 0, kind: input, shape index: {}]   ;;  %s9256_s1 = inlined_call_operand.hbm [shape: bf16[1152,128], index: 1, kind: input, shape index: {}]   ;;  %s9257_s2 = inlined_call_operand.hbm [shape: bf16[2,16,16,128], index: 2, kind: output, shape index: {0}]   ;;  %s9258_s3 = inlined_call_operand.hbm [shape: f32[2,2,128], index: 3, kind: output, shape index: {1}]  }
   0x1   :  { %11 = vsyncpa [#allocation3 + $0x1], 0 }
   0x2   :  { %12 = vsyncpa [#allocation6], 0 }
   0x3   :  { %13 = vsyncpa [#allocation4], 0 }
   0x4   :  { %15 = vsyncpa [#allocation4 + $0x1], 0 }
   0x5   :  { %16 = vsyncpa [#allocation9], 0 }
   0x6   :  { %18 = vsyncpa [#allocation9 + $0x1], 0  ;;  %s7433_s12 = smov 0   ;;  %s7435_s13 = smov 0  }
   0x7   :  { %s7437_s14 = smov 0   ;;  %s7439_s15 = smov 0  }
   0x8 LB: > { %s7454_s16 = sadd.s32 4294967295, %s7403_s15   ;;  %s5432_s17 = sadd.s32 4294967294, %s7403_s15   ;;  %s7403_s15 = sphi %s7439_s15, %s9337_s15   ;;  %s7399_s14 = sphi %s7437_s14, %s9336_s14   ;;  %s7395_s13 = sphi %s7435_s13, %s9335_s13   ;;  %s7391_s12 = sphi %s7433_s12, %s9334_s12  }
   0x9   : > { %p44_p0 = scmp.ne.s32.totalorder %s7395_s13, %s7391_s12  ;;  %p9259_p1 = scmp.eq.s32.totalorder %s7454_s16, 0 }
   0xa   : > { %p95_p3 = scmp.eq.s32.totalorder %s5432_s17, 1  ;;  %p5433_p5 = scmp.ge.s32.totalorder %s7403_s15, 1 }
   0xb   : > { %p7463_p4 = por %p9259_p1, %p44_p0  ;;  %p128_p7 = scmp.lt.s32.totalorder %s7403_s15, 3 }
   0xc   : > { %p7468_p6 = por %p95_p3, %p44_p0  ;;  %s7405_s21 = smov [#allocation5]  }
   0xd   : > { %s9272_s18 = scalar_select %p7463_p4, 1, 0 }
   0xe   : > { %s9273_s19 = scalar_select %p7468_p6, 1, 0 }
   0xf   : > { %p7473_p8 = pnand %p5433_p5, %p128_p7  ;;  %s140_s22 = sshll.u32 %s7405_s21, 4  ;;  %s7477_s22 = int_to_ptr.vmem [resolvable:$true] %s140_s22 }
  0x10   : > { %s7489_s24 = sadd.s32 1, %s7403_s15   ;;  %s31_s25 = sadd.s32 1, %s7399_s14 }
  0x11   : > { %s9274_s20 = scalar_select %p7473_p8, 1, 0 }
  0x12   : > { %p6997_p9 = pneg %p7473_p8  ;;  %s28_s26 = ssub.s32 %s7403_s15, %s7489_s24 }
  0x13   : > { %s7243_s29 = scalar_lea.hbm %s9256_s1, 9216 }
  0x14   : > { %p7484_p11 = pnand %p6997_p9, %p9259_p1  ;;  %p7244_p12 = scmp.ne.s32.totalorder %s9256_s1, %s7243_s29 }
  0x15   : > { %p7250_p5 = scmp.lt.u32.totalorder %s7243_s29, %s9256_s1 }
  0x16   : > { %p7245_p13 = pneg %p7484_p11 }
  0x18   : > { %p7246_p0 = pnand %p7245_p13, %p7244_p12 }
  0x1a   : > { %p7247_p3 = pneg %p7246_p0 }
  0x1c   : > { %p7252_p7 = pnand %p7250_p5, %p7247_p3 }
  0x1e   : > { %7255 = shalt.err (!%p7252_p7)
}
  0x1f   : > { %s7256_s7 = scalar_lea.vmem %s7477_s22, 9216  ;;  %p7264_p2 = scmp.lt.s32.totalorder %s7477_s22, %s7477_s22 }
  0x20   : > { %p7257_p9 = scmp.ne.s32.totalorder %s7477_s22, %s7256_s7  ;;  %p7265_p6 = scmp.lt.s32.totalorder %s7256_s7, %s7256_s7 }
  0x22   : > { %p7259_p10 = pnand %p7257_p9, %p7245_p13  ;;  %p7266_p4 = por %p7265_p6, %p7264_p2 }
  0x24   : > { %p7260_p1 = pneg %p7259_p10 }
  0x26   : > { %p7267_p8 = pnand %p7266_p4, %p7260_p1 }
  0x28   : > { %7270 = shalt.err (!%p7267_p8)
}
  0x29   : > { %s7406_s8 = smov 64   ;;  %s7407_s9 = smov 4  }
  0x2a   : > { %7000 = dma.hbm_to_vmem [thread:$0]  (!%p7484_p11), %s9256_s1, 9216, %s7477_s22, [#allocation6], %s7406_s8, %s7406_s8, %s7407_s9  }
  0x2b   : > { %p29_p1 = scmp.eq.s32.totalorder %s28_s26, 0  ;;  %p38_p2 = scmp.ne.s32.totalorder %s7399_s14, %s7395_s13 }
  0x2c   : > { %p39_p4 = scmp.eq.s32.totalorder %s7403_s15, 0  ;;  %p7013_p6 = scmp.lt.s32.totalorder %s7403_s15, 2 }
  0x2d   : > { %s7523_s17 = scalar_select %p29_p1, %s7399_s14, %s31_s25  }
  0x2e   : > { %p40_p8 = por %p39_p4, %p38_p2  ;;  %p9276_p10 = scmp.eq.s32.totalorder %s7454_s16, 1 }
  0x2f   : > { %s154_s23 = sand.u32 1, %s7399_s14   ;;  %s6985_s27 = smul.u32 3456, %s7403_s15 }
  0x30   : > { %p7527_p12 = por %p9276_p10, %p38_p2  ;;  %s6984_s28 = smul.u32 216, %s154_s23 }
  0x31   : > { %p7533_p13 = pnand %p7013_p6, %p40_p8  ;;  %s7540_s25 = scalar_lea.hbm %s9255_s0, %s6985_s27 }
  0x32   : > { %s158_s30 = scalar_lea.vmem [#allocation2], %s6984_s28  ;;  %s7544_s5 = scalar_lea.sflag [#allocation3], %s154_s23 }
  0x33   : > { %s165_s4 = sshll.u32 %s158_s30, 4  ;;  %s7271_s6 = scalar_lea.hbm %s7540_s25, 3456  ;;  %s7542_s4 = int_to_ptr.vmem [resolvable:$true] %s165_s4 }
  0x34   : > { %p7272_p11 = scmp.ne.s32.totalorder %s7540_s25, %s7271_s6  ;;  %p7273_p0 = pneg %p7533_p13 }
  0x35   : > { %s7276_s11 = scalar_lea.hbm %s9255_s0, 6912  ;;  %p7277_p7 = scmp.lt.u32.totalorder %s7540_s25, %s9255_s0 }
  0x36   : > { %p7274_p3 = pnand %p7273_p0, %p7272_p11  ;;  %p7278_p9 = scmp.lt.u32.totalorder %s7276_s11, %s7271_s6 }
  0x37   : > { %p7280_p2 = scmp.lt.u32.totalorder %s7271_s6, %s7540_s25 }
  0x38   : > { %p7275_p5 = pneg %p7274_p3  ;;  %p7279_p1 = por %p7278_p9, %p7277_p7 }
  0x3a   : > { %p7281_p4 = por %p7280_p2, %p7279_p1 }
  0x3c   : > { %p7282_p6 = pnand %p7281_p4, %p7275_p5 }
  0x3e   : > { %7285 = shalt.err (!%p7282_p6)
}
  0x3f   : > { %s7286_s23 = scalar_lea.vmem %s7542_s4, 3456  ;;  %s7408_s28 = smov [#allocation2]  }
  0x40   : > { %p7287_p8 = scmp.ne.s32.totalorder %s7542_s4, %s7286_s23  ;;  %s7291_s26 = sshll.u32 %s7408_s28, 4  ;;  %s7292_s26 = int_to_ptr.vmem [resolvable:$false] %s7291_s26 }
  0x41   : > { %s7293_s30 = scalar_lea.vmem %s7292_s26, 6912  ;;  %p7294_p3 = scmp.lt.s32.totalorder %s7542_s4, %s7292_s26 }
  0x42   : > { %p7289_p10 = pnand %p7287_p8, %p7273_p0  ;;  %p7295_p7 = scmp.lt.s32.totalorder %s7293_s30, %s7286_s23 }
  0x44   : > { %p7290_p11 = pneg %p7289_p10  ;;  %p7296_p9 = por %p7295_p7, %p7294_p3 }
  0x46   : > { %p7297_p1 = pnand %p7296_p9, %p7290_p11 }
  0x48   : > { %7300 = shalt.err (!%p7297_p1)
}
  0x49   : > { %7004 = dma.hbm_to_vmem [thread:$0]  (!%p7533_p13), %s7540_s25, 3456, %s7542_s4, %s7544_s5, %s7406_s8, %s7406_s8, %s7407_s9  }
  0x4a   : > { %p9279_p0 = scmp.ne.s32.totalorder %s9274_s20, 0 }
  0x4c   : > { %177 = sbr.rel (%p9279_p0) target bundleno = 703 (0x2bf), region = 28 }
  0x53   : > { %s7578_s6 = sand.u32 1, %s7395_s13   ;;  %p9280_p5 = scmp.ne.s32.totalorder %s9272_s18, 0 }
  0x54   : > { %s6986_s7 = smul.u32 216, %s7578_s6  ;;  %s180_s10 = scalar_lea.sflag [#allocation3], %s7578_s6 }
  0x56   : > { %s7582_s11 = scalar_lea.vmem [#allocation2], %s6986_s7 }
  0x57   : > { %7374 = dma.done.wait (%p9280_p5), %s180_s10, 3456  }
  0x58   : > { %7376 = vsyncadd (%p9280_p5), %s180_s10, 4294963840  ;;  %p9281_p13 = scmp.eq.s32.totalorder %s7454_s16, 0 }
  0x5a   : > { %7378 = dma.done.wait (%p9281_p13), [#allocation6], 9216   ;;  %p9282_p2 = pmov %p9281_p13 }
  0x5b   : > { %v7053_v0 = vld [vmem:[#allocation5 + $0x40] sm:$0xff]   ;;  %v7055_v2 = vld [vmem:[#allocation5 + $0x48] sm:$0xff]   ;;  %v7057_v4 = vld [vmem:[#allocation5 + $0x50] sm:$0xff]   ;;  %vm280_vm0 = vsmask.f32 3328  ;;  %vm1309_vm3 = vcmask 1042432  }
  0x5c   : > { %7380 = vsyncadd (%p9282_p2), [#allocation6], 4294958080  ;;  %v7054_v1 = vld [vmem:[#allocation5 + $0x100] sm:$0xff]   ;;  %6280 = vmatprep.subr.bf16.mxu1 %v7053_v0  ;;  %v7056_v3 = vld [vmem:[#allocation5 + $0x108] sm:$0xff]   ;;  %vm281_vm1 = vsmask.f32 7440 }
  0x5d   : > { %6472 = vmatprep.subr.bf16.mxu0 %v7054_v1  ;;  %6281 = vmatpush3.bf16.msra.mxu1 %v7053_v0  ;;  %v7058_v5 = vld [vmem:[#allocation5 + $0x110] sm:$0xff]   ;;  %v7059_v6 = vld [vmem:[#allocation5 + $0x58] sm:$0xff]   ;;  %v7061_v8 = vld [vmem:[#allocation5 + $0x60] sm:$0xff]   ;;  %vm1310_vm4 = vcmask 1046532   ;;  %s5439_s18 = sshll.u32 %s7578_s6, 7  ;;  %s5968_s8 = sshll.u32 %s7454_s16, 11 }
  0x5e   : > { %6473 = vmatpush3.bf16.msra.mxu0 %v7054_v1  ;;  %6282 = vmatprep.subr.bf16.mxu1 %v7055_v2  ;;  %v7060_v7 = vld [vmem:[#allocation5 + $0x118] sm:$0xff]   ;;  %v7062_v9 = vld [vmem:[#allocation5 + $0x120] sm:$0xff]   ;;  %v7063_v10 = vld [vmem:[#allocation5 + $0x68] sm:$0xff]   ;;  %s9151_s20 = scalar_lea.vmem [#allocation7], %s5439_s18  ;;  %s9176_s4 = scalar_lea.hbm %s9257_s2, %s5968_s8 }
  0x5f   : > { %6474 = vmatprep.subr.bf16.mxu0 %v7056_v3  ;;  %v7064_v11 = vld [vmem:[#allocation5 + $0x128] sm:$0xff]   ;;  %v264_v14 = vld [vmem:[%s7582_s11 + $0x8] sm:$0x1]  ;;  %v5585_v19 = vld [vmem:[%s7582_s11 + $0xc] sm:$0xf]  ;;  %s5304_s9 = sshll.u32 %s9151_s20, 4  ;;  %s9178_s9 = int_to_ptr.vmem [resolvable:$true] %s5304_s9 }
  0x60   : > { %v216_v12 = vld [vmem:[%s7582_s11] sm:$0xf]  ;;  %v217_v13 = vld [vmem:[%s7582_s11 + $0x4] sm:$0xf]  ;;  %v303_v20 = vshll.u32 %v264_v14, 16  ;;  %v2180_v30 = vshrl.u32 %v5585_v19, 16  ;;  %vm7609_vm2 = vmor %vm280_vm0, %vm281_vm1 }
  0x61   : > { %6283 = vmatpush3.bf16.msra.mxu1 %v7055_v2  ;;  %v284_v15 = vshrl.u32 %v216_v12, 16  ;;  %v287_v16 = vshll.u32 %v216_v12, 16  ;;  %v293_v17 = vshll.u32 %v217_v13, 16  ;;  %v297_v18 = vshrl.u32 %v217_v13, 16  ;;  %v7597_v21 = vld [vmem:[%s7582_s11 + $0x10] sm:$0xf]  ;;  %vm7796_vm5 = vmor %vm1309_vm3, %vm1310_vm4 }
  0x62   : > { %6475 = vmatpush3.bf16.msra.mxu0 %v7056_v3  ;;  %6284 = vmatprep.subr.bf16.mxu1 %v7057_v4  ;;  %v7600_v22 = vld [vmem:[%s7582_s11 + $0x14] sm:$0x1]  ;;  %v7065_v23 = vld [vmem:[#allocation5 + $0x70] sm:$0xff]   ;;  %v305_v29 = vrot.slane %v303_v20, 5  ;;  %v2183_v31 = vshll.u32 %v5585_v19, 16  ;;  %v2189_v32 = vshll.u32 %v7597_v21, 16 }
  0x63   : > { %6476 = vmatprep.subr.bf16.mxu0 %v7058_v5  ;;  %v7066_v24 = vld [vmem:[#allocation5 + $0x130] sm:$0xff]   ;;  %v286_v25 = vrot.slane %v284_v15, 4  ;;  %v289_v26 = vrot.slane %v287_v16, 5  ;;  %v295_v27 = vrot.slane %v293_v17, 5  ;;  %v299_v28 = vrot.slane %v297_v18, 4  ;;  %v7067_v47 = vld [vmem:[#allocation5 + $0x78] sm:$0xff]  }
  0x64   : > { %v218_v33 = vld [vmem:[%s7582_s11 + $0xc] sm:$0xf]  ;;  %v2193_v36 = vshrl.u32 %v7597_v21, 16  ;;  %v2199_v37 = vshll.u32 %v7600_v22, 16  ;;  %v219_v38 = vld [vmem:[%s7582_s11 + $0x10] sm:$0xf] }
  0x65   : > { %6285 = vmatpush3.bf16.msra.mxu1 %v7057_v4  ;;  %v290_v34 = vor.u32 %v289_v26, %v286_v25  ;;  %v300_v35 = vor.u32 %v299_v28, %v295_v27  ;;  %v2182_v40 = vrot.slane %v2180_v30, 4  ;;  %v2185_v41 = vrot.slane %v2183_v31, 5  ;;  %v265_v49 = vld [vmem:[%s7582_s11 + $0x14] sm:$0x1]  ;;  %v5588_v58 = vld [vmem:[%s7582_s11 + $0x18] sm:$0xf] }
  0x66   : > { %6477 = vmatpush3.bf16.msra.mxu0 %v7058_v5  ;;  %6286 = vmatprep.subr.bf16.mxu1 %v7059_v6  ;;  %v2191_v42 = vrot.slane %v2189_v32, 5  ;;  %v2195_v45 = vrot.slane %v2193_v36, 4  ;;  %v2201_v46 = vrot.slane %v2199_v37, 5  ;;  %v308_v50 = vshrl.u32 %v218_v33, 16  ;;  %v7068_v53 = vld [vmem:[#allocation5 + $0x138] sm:$0xff]   ;;  %v7069_v12 = vld [vmem:[#allocation5] sm:$0xff]  }
  0x67   : > { %6478 = vmatprep.subr.bf16.mxu0 %v7060_v7  ;;  %v291_v43 = vrot.slane %v290_v34, 4  ;;  %v301_v44 = vrot.slane %v300_v35, 4  ;;  %v2186_v48 = vor.u32 %v2185_v41, %v2182_v40  ;;  %v311_v51 = vshll.u32 %v218_v33, 16  ;;  %v7620_v59 = vld [vmem:[%s7582_s11 + $0x1c] sm:$0xf]  ;;  %s5286_s5 = scalar_lea.sflag [#allocation4], %s7578_s6 }
  0x68   : > { %v317_v52 = vshll.u32 %v219_v38, 16  ;;  %v2196_v56 = vor.u32 %v2195_v45, %v2191_v42  ;;  %v321_v57 = vshrl.u32 %v219_v38, 16  ;;  %v310_v62 = vrot.slane %v308_v50, 4  ;;  %v7623_v0 = vld [vmem:[%s7582_s11 + $0x20] sm:$0x1]  ;;  %v7630_v14 = vld [vmem:[#allocation5 + $0x140] sm:$0xff]  }
  0x69   : > { %6287 = vmatpush3.bf16.msra.mxu1 %v7059_v6  ;;  %v296_v54 = vsel %vm7609_vm2, %v291_v43, %v295_v27  ;;  %v306_v55 = vsel %vm7609_vm2, %v301_v44, %v305_v29  ;;  %v2187_v61 = vrot.slane %v2186_v48, 4  ;;  %v313_v63 = vrot.slane %v311_v51, 5  ;;  %v220_v25 = vld [vmem:[%s7582_s11 + $0x18] sm:$0xf]  ;;  %v221_v30 = vld [vmem:[%s7582_s11 + $0x1c] sm:$0xf] }
  0x6a   : > { %6479 = vmatpush3.bf16.msra.mxu0 %v7060_v7  ;;  %6288 = vmatprep.subr.bf16.mxu1 %v7061_v8  ;;  %v5441_v60 = vcombine.low %v296_v54, %v306_v55  ;;  %v2197_v1 = vrot.slane %v2196_v56, 4  ;;  %v319_v2 = vrot.slane %v317_v52, 5  ;;  %v323_v3 = vrot.slane %v321_v57, 4  ;;  %v266_v35 = vld [vmem:[%s7582_s11 + $0x20] sm:$0x1]  ;;  %s7301_s27 = scalar_lea.vmem %s9178_s9, 2048 }
  0x6b   : > { %6480 = vmatprep.subr.bf16.mxu0 %v7062_v9  ;;  %v327_v4 = vshll.u32 %v265_v49, 16  ;;  %v2192_v5 = vsel %vm7609_vm2, %v2187_v61, %v2191_v42  ;;  %v2953_v6 = vrot.slane %v7600_v22, 5  ;;  %v314_v7 = vor.u32 %v313_v63, %v310_v62  ;;  %v5591_v36 = vld [vmem:[%s7582_s11 + $0x24] sm:$0xf]  ;;  %v7651_v42 = vld [vmem:[%s7582_s11 + $0x28] sm:$0xf]  ;;  %p7302_p4 = scmp.ne.s32.totalorder %s9178_s9, %s7301_s27 }
  0x6c   : > { %6296 = vmatprep.mubr.bf16.mxu1 %v5441_v60  ;;  %v2207_v13 = vshll.u32 %v5588_v58, 16  ;;  %v2213_v18 = vshll.u32 %v7620_v59, 16  ;;  %v2957_v28 = vrot.slane %v7620_v59, 5  ;;  %v2960_v29 = vrot.slane %v7623_v0, 5  ;;  %v7072_v43 = vld [vmem:[#allocation5 + $0x8] sm:$0xff]   ;;  %v7075_v63 = vld [vmem:[#allocation5 + $0x10] sm:$0xff]  }
  0x6d   : > { %6289 = vmatpush3.bf16.msra.mxu1 %v7061_v8  ;;  %v2204_v8 = vshrl.u32 %v5588_v58, 16  ;;  %v315_v16 = vrot.slane %v314_v7, 4  ;;  %v332_v40 = vshrl.u32 %v220_v25, 16  ;;  %v335_v41 = vshll.u32 %v220_v25, 16  ;;  %v7654_v48 = vld [vmem:[%s7582_s11 + $0x2c] sm:$0x1]  ;;  %p7303_p6 = pnand %p7302_p4, %p7527_p12 }
  0x6e   : > { %6481 = vmatpush3.bf16.msra.mxu0 %v7062_v9  ;;  %6290 = vmatprep.subr.bf16.mxu1 %v7063_v10  ;;  %v2202_v9 = vsel %vm7609_vm2, %v2197_v1, %v2201_v46  ;;  %v2209_v20 = vrot.slane %v2207_v13, 5  ;;  %v2215_v27 = vrot.slane %v2213_v18, 5  ;;  %v7648_v38 = vrot.slane %v2957_v28, 4  ;;  %v222_v62 = vld [vmem:[%s7582_s11 + $0x24] sm:$0xf]  ;;  %s7409_s22 = smov [#allocation7]  }
  0x6f   : > { %6482 = vmatprep.subr.bf16.mxu0 %v7064_v11  ;;  %v5633_v15 = vcombine.low %v2192_v5, %v2202_v9  ;;  %v2206_v17 = vrot.slane %v2204_v8, 4  ;;  %v320_v26 = vsel %vm7609_vm2, %v315_v16, %v319_v2  ;;  %v341_v46 = vshll.u32 %v221_v30, 16  ;;  %v223_v7 = vld [vmem:[%s7582_s11 + $0x28] sm:$0xf]  ;;  %v5594_v13 = vld [vmem:[%s7582_s11 + $0x30] sm:$0xf]  ;;  %p7304_p8 = pneg %p7303_p6 }
  0x70   : > { %v334_v49 = vrot.slane %v332_v40, 4  ;;  %v337_v50 = vrot.slane %v335_v41, 5  ;;  %v351_v51 = vshll.u32 %v266_v35, 16  ;;  %v2228_v52 = vshrl.u32 %v5591_v36, 16  ;;  %s7305_s23 = sshll.u32 %s7409_s22, 4  ;;  %s7306_s23 = int_to_ptr.vmem [resolvable:$false] %s7305_s23 }
  0x71   : > { %6291 = vmatpush3.bf16.msra.mxu1 %v7063_v10  ;;  %v324_v10 = vor.u32 %v323_v3, %v319_v2  ;;  %6488 = vmatprep.mubr.bf16.mxu0 %v5633_v15  ;;  %v2210_v32 = vor.u32 %v2209_v20, %v2206_v17  ;;  %v343_v55 = vrot.slane %v341_v46, 5  ;;  %v2231_v61 = vshll.u32 %v5591_v36, 16  ;;  %v7071_v2 = vld [vmem:[#allocation5 + $0x148] sm:$0xff]   ;;  %v7078_v15 = vld [vmem:[#allocation5 + $0x18] sm:$0xff]   ;;  %s7307_s28 = scalar_lea.vmem %s7306_s23, 4096  ;;  %p7308_p10 = scmp.lt.s32.totalorder %s9178_s9, %s7306_s23 }
  0x72   : > { %6483 = vmatpush3.bf16.msra.mxu0 %v7064_v11  ;;  %6292 = vmatprep.subr.bf16.mxu1 %v7065_v23  ;;  %v329_v11 = vrot.slane %v327_v4, 5  ;;  %v338_v57 = vor.u32 %v337_v50, %v334_v49  ;;  %v353_v58 = vrot.slane %v351_v51, 5  ;;  %v2230_v60 = vrot.slane %v2228_v52, 4  ;;  %v7673_v36 = vld [vmem:[%s7582_s11 + $0x34] sm:$0xf]  ;;  %p7309_p11 = scmp.lt.s32.totalorder %s7307_s28, %s7301_s27 }
  0x73   : > { %6484 = vmatprep.subr.bf16.mxu0 %v7066_v24  ;;  %v325_v19 = vrot.slane %v324_v10, 4  ;;  %v2211_v44 = vrot.slane %v2210_v32, 4  ;;  %v2237_v4 = vshll.u32 %v7651_v42, 16  ;;  %v2241_v5 = vshrl.u32 %v7651_v42, 16  ;;  %v224_v50 = vld [vmem:[%s7582_s11 + $0x30] sm:$0xf] }
  0x74   : > { %v339_v9 = vrot.slane %v338_v57, 4  ;;  %v2233_v10 = vrot.slane %v2231_v61, 5  ;;  %v359_v25 = vshll.u32 %v222_v62, 16  ;;  %v369_v35 = vshrl.u32 %v223_v7, 16  ;;  %v7081_v51 = vld [vmem:[#allocation5 + $0x20] sm:$0xff]   ;;  %p7310_p3 = por %p7309_p11, %p7308_p10 }
  0x75   : > { %6293 = vmatpush3.bf16.msra.mxu1 %v7065_v23  ;;  %v2217_v23 = vshrl.u32 %v7620_v59, 16  ;;  %v330_v31 = vsel %vm7609_vm2, %v325_v19, %v329_v11  ;;  %v2247_v11 = vshll.u32 %v7654_v48, 16  ;;  %v2239_v17 = vrot.slane %v2237_v4, 5 }
  0x76   : > { %6485 = vmatpush3.bf16.msra.mxu0 %v7066_v24  ;;  %6294 = vmatprep.subr.bf16.mxu1 %v7067_v47  ;;  %v2223_v24 = vshll.u32 %v7623_v0, 16  ;;  %v5442_v37 = vcombine.low %v320_v26, %v330_v31  ;;  %v2243_v18 = vrot.slane %v2241_v5, 4  ;;  %v356_v19 = vshrl.u32 %v222_v62, 16  ;;  %v225_v62 = vld [vmem:[%s7582_s11 + $0x34] sm:$0xf]  ;;  %p7311_p7 = pnand %p7310_p3, %p7304_p8 }
  0x77   : > { %6486 = vmatprep.subr.bf16.mxu0 %v7068_v53  ;;  %v2219_v33 = vrot.slane %v2217_v23, 4  ;;  %v344_v20 = vsel %vm7609_vm2, %v339_v9, %v343_v55  ;;  %v2234_v23 = vor.u32 %v2233_v10, %v2230_v60  ;;  %v365_v31 = vshll.u32 %v223_v7, 16  ;;  %v5597_v10 = vld [vmem:[%s7582_s11 + $0x3c] sm:$0xf] }
  0x78   : > { %v2225_v34 = vrot.slane %v2223_v24, 5  ;;  %v2249_v24 = vrot.slane %v2247_v11, 5  ;;  %v2255_v49 = vshll.u32 %v5594_v13, 16  ;;  %v380_v4 = vshrl.u32 %v224_v50, 16  ;;  %v7076_v11 = vld [vmem:[#allocation5 + $0x160] sm:$0xff]  }
  0x79   : > { %6295 = vmatpush3.bf16.msra.mxu1 %v7067_v47  ;;  %v2220_v45 = vor.u32 %v2219_v33, %v2215_v27  ;;  %v345_v47 = vshrl.u32 %v221_v30, 16  ;;  %v358_v30 = vrot.slane %v356_v19, 4  ;;  %v2235_v33 = vrot.slane %v2234_v23, 4 }
  0x7a   : > { %6487 = vmatpush3.bf16.msra.mxu0 %v7068_v53  ;;  %6328 = vmatprep.subr.bf16.mxu1 %v7069_v12  ;;  %v2216_v53 = vsel %vm7609_vm2, %v2211_v44, %v2215_v27  ;;  %v2244_v27 = vor.u32 %v2243_v18, %v2239_v17  ;;  %v367_v41 = vrot.slane %v365_v31, 5  ;;  %v7676_v44 = vld [vmem:[%s7582_s11 + $0x38] sm:$0x1]  ;;  %v2257_v61 = vrot.slane %v2255_v49, 5  ;;  %v7692_v18 = vld [vmem:[%s7582_s11 + $0x40] sm:$0xf] }
  0x7b   : > { %6520 = vmatprep.subr.bf16.mxu0 %v7630_v14  ;;  %v2221_v54 = vrot.slane %v2220_v45, 4  ;;  %v347_v56 = vrot.slane %v345_v47, 4  ;;  %v2240_v45 = vsel %vm7609_vm2, %v2235_v33, %v2239_v17  ;;  %v371_v47 = vrot.slane %v369_v35, 4  ;;  %v226_v49 = vld [vmem:[%s7582_s11 + $0x3c] sm:$0xf] }
  0x7c   : > { %6297 = vmatmul.mubr.bf16.vlgmr.msra.gmra.mrb[0].mxu1 %v5442_v37  ;;  %v7073_v37 = vld [vmem:[#allocation5 + $0x150] sm:$0xff]   ;;  %v2245_v40 = vrot.slane %v2244_v27, 4  ;;  %v383_v9 = vshll.u32 %v224_v50, 16  ;;  %v389_v17 = vshll.u32 %v225_v62, 16  ;;  %v393_v23 = vshrl.u32 %v225_v62, 16  ;;  %v7077_v50 = vld [vmem:[#allocation5 + $0x168] sm:$0xff]  }
  0x7d   : > { %6329 = vmatpush3.bf16.msra.mxu1 %v7069_v12  ;;  %v2226_v1 = vsel %vm7609_vm2, %v2221_v54, %v2225_v34  ;;  %v348_v3 = vor.u32 %v347_v56, %v343_v55  ;;  %v267_v12 = vld [vmem:[%s7582_s11 + $0x2c] sm:$0x1]  ;;  %v361_v34 = vrot.slane %v359_v25, 5  ;;  %v2261_v55 = vshll.u32 %v7673_v36, 16  ;;  %v7083_v25 = vld [vmem:[#allocation5 + $0x28] sm:$0xff]  }
  0x7e   : > { %6330 = vmatprep.subr.bf16.mxu1 %v7072_v43  ;;  %v5634_v8 = vcombine.low %v2216_v53, %v2226_v1  ;;  %v2250_v52 = vsel %vm7609_vm2, %v2245_v40, %v2249_v24  ;;  %v7074_v56 = vld [vmem:[#allocation5 + $0x158] sm:$0xff]   ;;  %v372_v60 = vor.u32 %v371_v47, %v367_v41  ;;  %v7697_v24 = vld [vmem:[%s7582_s11 + $0x44] sm:$0x1]  ;;  %v2276_v35 = vshrl.u32 %v5597_v10, 16 }
  0x7f   : > { %v349_v16 = vrot.slane %v348_v3, 4  ;;  %v362_v46 = vor.u32 %v361_v34, %v358_v30  ;;  %v5635_v57 = vcombine.low %v2240_v45, %v2250_v52  ;;  %v2263_v1 = vrot.slane %v2261_v55, 5  ;;  %v227_v55 = vld [vmem:[%s7582_s11 + $0x40] sm:$0xf] }
  0x80   : > { %6489 = vmatmul.mubr.bf16.vlgmr.msra.gmra.mrb[0].mxu0 %v5634_v8  ;;  %v2265_v3 = vshrl.u32 %v7673_v36, 16  ;;  %v373_v7 = vrot.slane %v372_v60, 4  ;;  %v391_v30 = vrot.slane %v389_v17, 5  ;;  %v395_v34 = vrot.slane %v393_v23, 4 }
  0x81   : > { %6331 = vmatpush3.bf16.msra.mxu1 %v7072_v43  ;;  %6521 = vmatpush3.bf16.msra.mxu0 %v7630_v14  ;;  %v354_v26 = vsel %vm7609_vm2, %v349_v16, %v353_v58  ;;  %v375_v43 = vshll.u32 %v267_v12, 16  ;;  %v2252_v14 = vshrl.u32 %v5594_v13, 16  ;;  %v363_v58 = vrot.slane %v362_v46, 4 }
  0x82   : > { %6332 = vmatprep.subr.bf16.mxu1 %v7075_v63  ;;  %6522 = vmatprep.subr.bf16.mxu0 %v7071_v2  ;;  %v5443_v32 = vcombine.low %v344_v20, %v354_v26  ;;  %v2267_v12 = vrot.slane %v2265_v3, 4  ;;  %v382_v16 = vrot.slane %v380_v4, 4  ;;  %v385_v20 = vrot.slane %v383_v9, 5  ;;  %v5600_v9 = vld [vmem:[%s7582_s11 + $0x48] sm:$0xf] }
  0x83   : > { %v377_v53 = vrot.slane %v375_v43, 5  ;;  %v2254_v54 = vrot.slane %v2252_v14, 4  ;;  %6492 = vmatprep.mubr.bf16.mxu0 %v5635_v57  ;;  %v368_v5 = vsel %vm7609_vm2, %v363_v58, %v367_v41  ;;  %v2279_v41 = vshll.u32 %v5597_v10, 16  ;;  %v7079_v10 = vld [vmem:[#allocation5 + $0x170] sm:$0xff]  }
  0x84   : > { %6300 = vmatprep.mubr.bf16.mxu1 %v5443_v32  ;;  %v2268_v27 = vor.u32 %v2267_v12, %v2263_v1  ;;  %v386_v33 = vor.u32 %v385_v20, %v382_v16  ;;  %v2285_v43 = vshll.u32 %v7692_v18, 16  ;;  %v396_v45 = vor.u32 %v395_v34, %v391_v30 }
  0x85   : > { %6333 = vmatpush3.bf16.msra.mxu1 %v7075_v63  ;;  %6523 = vmatpush3.bf16.msra.mxu0 %v7071_v2  ;;  %v268_v63 = vld [vmem:[%s7582_s11 + $0x38] sm:$0x1]  ;;  %v2271_v2 = vshll.u32 %v7676_v44, 16  ;;  %v2258_v8 = vor.u32 %v2257_v61, %v2254_v54  ;;  %v2278_v46 = vrot.slane %v2276_v35, 4  ;;  %v2289_v47 = vshrl.u32 %v7692_v18, 16 }
  0x86   : > { %6334 = vmatprep.subr.bf16.mxu1 %v7078_v15  ;;  %6524 = vmatprep.subr.bf16.mxu0 %v7073_v37  ;;  %v399_v31 = vshll.u32 %v268_v63, 16  ;;  %v387_v14 = vrot.slane %v386_v33, 4  ;;  %v2281_v52 = vrot.slane %v2279_v41, 5  ;;  %v2295_v54 = vshll.u32 %v7697_v24, 16  ;;  %v228_v41 = vld [vmem:[%s7582_s11 + $0x48] sm:$0xf] }
  0x87   : > { %v2273_v13 = vrot.slane %v2271_v2, 5  ;;  %v2259_v19 = vrot.slane %v2258_v8, 4  ;;  %v397_v60 = vrot.slane %v396_v45, 4  ;;  %v2291_v61 = vrot.slane %v2289_v47, 4 }
  0x88   : > { %v401_v40 = vrot.slane %v399_v31, 5  ;;  %v392_v58 = vsel %vm7609_vm2, %v387_v14, %v391_v30  ;;  %v2282_v62 = vor.u32 %v2281_v52, %v2278_v46  ;;  %v2297_v63 = vrot.slane %v2295_v54, 5  ;;  %v7720_v31 = vld [vmem:[%s7582_s11 + $0x50] sm:$0x1] }
  0x89   : > { %6335 = vmatpush3.bf16.msra.mxu1 %v7078_v15  ;;  %6525 = vmatpush3.bf16.msra.mxu0 %v7073_v37  ;;  %v378_v15 = vsel %vm7609_vm2, %v373_v7, %v377_v53  ;;  %v2264_v32 = vsel %vm7609_vm2, %v2259_v19, %v2263_v1  ;;  %v2269_v37 = vrot.slane %v2268_v27, 4  ;;  %v2287_v53 = vrot.slane %v2285_v43, 5  ;;  %v269_v1 = vld [vmem:[%s7582_s11 + $0x44] sm:$0x1]  ;;  %v229_v43 = vld [vmem:[%s7582_s11 + $0x4c] sm:$0xf] }
  0x8a   : > { %6336 = vmatprep.subr.bf16.mxu1 %v7081_v51  ;;  %6526 = vmatprep.subr.bf16.mxu0 %v7074_v56  ;;  %v5444_v26 = vcombine.low %v368_v5, %v378_v15  ;;  %v404_v3 = vshrl.u32 %v226_v49, 16  ;;  %v407_v2 = vshll.u32 %v226_v49, 16  ;;  %v402_v4 = vsel %vm7609_vm2, %v397_v60, %v401_v40  ;;  %v7715_v15 = vld [vmem:[%s7582_s11 + $0x4c] sm:$0xf]  ;;  %v270_v49 = vld [vmem:[%s7582_s11 + $0x50] sm:$0x1] }
  0x8b   : > { %v2292_v5 = vor.u32 %v2291_v61, %v2287_v53  ;;  %v413_v7 = vshll.u32 %v227_v55, 16  ;;  %v417_v8 = vshrl.u32 %v227_v55, 16  ;;  %v5445_v12 = vcombine.low %v392_v58, %v402_v4  ;;  %v7730_v54 = vld [vmem:[#allocation5 + $0x180] sm:$0xff]  }
  0x8c   : > { %6301 = vmatmul.mubr.bf16.gmra.mrb[4].mxu1 %v5444_v26  ;;  %v406_v16 = vrot.slane %v404_v3, 4  ;;  %v409_v17 = vrot.slane %v407_v2, 5  ;;  %v7080_v26 = vld [vmem:[#allocation5 + $0x178] sm:$0xff]   ;;  %v2303_v33 = vshll.u32 %v5600_v9, 16  ;;  %v2309_v40 = vshll.u32 %v7715_v15, 16  ;;  %v7737_v3 = vld [vmem:[#allocation5 + $0x80] sm:$0xff]  }
  0x8d   : > { %6337 = vmatpush3.bf16.msra.mxu1 %v7081_v51  ;;  %6527 = vmatpush3.bf16.msra.mxu0 %v7074_v56  ;;  %v2274_v51 = vsel %vm7609_vm2, %v2269_v37, %v2273_v13  ;;  %v7085_v56 = vld [vmem:[#allocation5 + $0x30] sm:$0xff]   ;;  %v2283_v13 = vrot.slane %v2282_v62, 4  ;;  %v2293_v19 = vrot.slane %v2292_v5, 4  ;;  %v415_v20 = vrot.slane %v413_v7, 5 }
  0x8e   : > { %6338 = vmatprep.subr.bf16.mxu1 %v7083_v25  ;;  %6528 = vmatprep.subr.bf16.mxu0 %v7076_v11  ;;  %v5636_v57 = vcombine.low %v2264_v32, %v2274_v51  ;;  %v419_v23 = vrot.slane %v417_v8, 4  ;;  %v410_v30 = vor.u32 %v409_v17, %v406_v16  ;;  %v2300_v32 = vshrl.u32 %v5600_v9, 16  ;;  %v7740_v8 = vld [vmem:[%s7582_s11 + $0x58] sm:$0xf] }
  0x8f   : > { %6304 = vmatprep.mubr.bf16.mxu1 %v5445_v12  ;;  %v2288_v27 = vsel %vm7609_vm2, %v2283_v13, %v2287_v53  ;;  %v2298_v34 = vsel %vm7609_vm2, %v2293_v19, %v2297_v63  ;;  %v2305_v47 = vrot.slane %v2303_v33, 5  ;;  %v2313_v52 = vshrl.u32 %v7715_v15, 16 }
  0x90   : > { %6493 = vmatmul.mubr.bf16.gmra.mrb[4].mxu0 %v5636_v57  ;;  %v420_v35 = vor.u32 %v419_v23, %v415_v20  ;;  %v5637_v14 = vcombine.low %v2288_v27, %v2298_v34  ;;  %v411_v45 = vrot.slane %v410_v30, 4  ;;  %v2302_v46 = vrot.slane %v2300_v32, 4  ;;  %v230_v32 = vld [vmem:[%s7582_s11 + $0x54] sm:$0xf] }
  0x91   : > { %6339 = vmatpush3.bf16.msra.mxu1 %v7083_v25  ;;  %6529 = vmatpush3.bf16.msra.mxu0 %v7076_v11  ;;  %v7087_v11 = vld [vmem:[#allocation5 + $0x38] sm:$0xff]   ;;  %v423_v25 = vshll.u32 %v269_v1, 16  ;;  %v2319_v53 = vshll.u32 %v7720_v31, 16  ;;  %v428_v57 = vshrl.u32 %v228_v41, 16  ;;  %v431_v58 = vshll.u32 %v228_v41, 16 }
  0x92   : > { %6340 = vmatprep.subr.bf16.mxu1 %v7085_v56  ;;  %6530 = vmatprep.subr.bf16.mxu0 %v7077_v50  ;;  %v421_v51 = vrot.slane %v420_v35, 4  ;;  %v416_v55 = vsel %vm7609_vm2, %v411_v45, %v415_v20  ;;  %v2315_v61 = vrot.slane %v2313_v52, 4  ;;  %v437_v63 = vshll.u32 %v229_v43, 16  ;;  %v5603_v1 = vld [vmem:[%s7582_s11 + $0x54] sm:$0xf] }
  0x93   : > { %v425_v37 = vrot.slane %v423_v25, 5  ;;  %6496 = vmatprep.mubr.bf16.mxu0 %v5637_v14  ;;  %v2321_v62 = vrot.slane %v2319_v53, 5  ;;  %v430_v5 = vrot.slane %v428_v57, 4  ;;  %v433_v7 = vrot.slane %v431_v58, 5 }
  0x94   : > { %v441_v12 = vshrl.u32 %v229_v43, 16  ;;  %v447_v13 = vshll.u32 %v270_v49, 16  ;;  %v2324_v19 = vshrl.u32 %v5603_v1, 16  ;;  %v2327_v20 = vshll.u32 %v5603_v1, 16 }
  0x95   : > { %6341 = vmatpush3.bf16.msra.mxu1 %v7085_v56  ;;  %6531 = vmatpush3.bf16.msra.mxu0 %v7077_v50  ;;  %v2311_v50 = vrot.slane %v2309_v40, 5  ;;  %v2306_v56 = vor.u32 %v2305_v47, %v2302_v46  ;;  %v426_v60 = vsel %vm7609_vm2, %v421_v51, %v425_v37  ;;  %v434_v17 = vor.u32 %v433_v7, %v430_v5  ;;  %v231_v40 = vld [vmem:[%s7582_s11 + $0x58] sm:$0xf]  ;;  %v271_v51 = vld [vmem:[%s7582_s11 + $0x5c] sm:$0x1] }
  0x96   : > { %6532 = vmatprep.subr.bf16.mxu0 %v7079_v10  ;;  %6342 = vmatprep.subr.bf16.mxu1 %v7087_v11  ;;  %v5446_v2 = vcombine.low %v416_v55, %v426_v60  ;;  %v443_v25 = vrot.slane %v441_v12, 4  ;;  %v449_v27 = vrot.slane %v447_v13, 5  ;;  %v2333_v30 = vshll.u32 %v7740_v8, 16 }
  0x97   : > { %v2307_v4 = vrot.slane %v2306_v56, 4  ;;  %v2316_v9 = vor.u32 %v2315_v61, %v2311_v50  ;;  %v435_v33 = vrot.slane %v434_v17, 4  ;;  %v2326_v34 = vrot.slane %v2324_v19, 4  ;;  %v5606_v61 = vld [vmem:[%s7582_s11 + $0x60] sm:$0xf] }
  0x98   : > { %6305 = vmatmul.mubr.bf16.gmra.mrb[8].mxu1 %v5446_v2  ;;  %v2329_v35 = vrot.slane %v2327_v20, 5  ;;  %v2337_v37 = vshrl.u32 %v7740_v8, 16  ;;  %v452_v53 = vshrl.u32 %v230_v32, 16  ;;  %v455_v55 = vshll.u32 %v230_v32, 16  ;;  %v7768_v17 = vld [vmem:[%s7582_s11 + $0x68] sm:$0x1] }
  0x99   : > { %6343 = vmatpush3.bf16.msra.mxu1 %v7087_v11  ;;  %6533 = vmatpush3.bf16.msra.mxu0 %v7079_v10  ;;  %v439_v10 = vrot.slane %v437_v63, 5  ;;  %v2312_v16 = vsel %vm7609_vm2, %v2307_v4, %v2311_v50  ;;  %v7746_v11 = vld [vmem:[%s7582_s11 + $0x5c] sm:$0x1]  ;;  %v2317_v23 = vrot.slane %v2316_v9, 4  ;;  %v461_v58 = vshll.u32 %v231_v40, 16 }
  0x9a   : > { %6534 = vmatprep.subr.bf16.mxu0 %v7080_v26  ;;  %6376 = vmatprep.subr.bf16.mxu1 %v7737_v3  ;;  %v2343_v14 = vshll.u32 %v7746_v11, 16  ;;  %v2330_v47 = vor.u32 %v2329_v35, %v2326_v34  ;;  %v2339_v49 = vrot.slane %v2337_v37, 4  ;;  %v465_v60 = vshrl.u32 %v231_v40, 16  ;;  %v7763_v4 = vld [vmem:[%s7582_s11 + $0x64] sm:$0xf] }
  0x9b   : > { %v2322_v41 = vsel %vm7609_vm2, %v2317_v23, %v2321_v62  ;;  %v444_v43 = vor.u32 %v443_v25, %v439_v10  ;;  %v440_v46 = vsel %vm7609_vm2, %v435_v33, %v439_v10  ;;  %v454_v63 = vrot.slane %v452_v53, 4  ;;  %v7778_v37 = vld [vmem:[%s7582_s11 + $0x64] sm:$0xf] }
  0x9c   : > { %v5638_v45 = vcombine.low %v2312_v16, %v2322_v41  ;;  %v2345_v52 = vrot.slane %v2343_v14, 5  ;;  %v2331_v56 = vrot.slane %v2330_v47, 4  ;;  %v457_v1 = vrot.slane %v455_v55, 5  ;;  %v272_v14 = vld [vmem:[%s7582_s11 + $0x68] sm:$0x1] }
  0x9d   : > { %6535 = vmatpush3.bf16.msra.mxu0 %v7080_v26  ;;  %v2335_v26 = vrot.slane %v2333_v30, 5  ;;  %v445_v50 = vrot.slane %v444_v43, 4  ;;  %v471_v2 = vshll.u32 %v271_v51, 16  ;;  %v463_v10 = vrot.slane %v461_v58, 5  ;;  %v7775_v30 = vld [vmem:[%s7582_s11 + $0x60] sm:$0xf] }
  0x9e   : > { %6568 = vmatprep.subr.bf16.mxu0 %v7730_v54  ;;  %6497 = vmatmul.mubr.bf16.gmra.mrb[8].mxu0 %v5638_v45  ;;  %v458_v12 = vor.u32 %v457_v1, %v454_v63  ;;  %v467_v13 = vrot.slane %v465_v60, 4  ;;  %v2348_v19 = vshrl.u32 %v5606_v61, 16  ;;  %v2351_v23 = vshll.u32 %v5606_v61, 16  ;;  %v5657_v51 = vld [vmem:[%s7582_s11 + $0xc] sm:$0xe] }
  0x9f   : > { %v2340_v57 = vor.u32 %v2339_v49, %v2335_v26  ;;  %v450_v62 = vsel %vm7609_vm2, %v445_v50, %v449_v27  ;;  %v2336_v7 = vsel %vm7609_vm2, %v2331_v56, %v2335_v26  ;;  %v473_v16 = vrot.slane %v471_v2, 5  ;;  %v7792_v61 = vld [vmem:[%s7582_s11 + $0x6c] sm:$0xf] }
  0xa0   : > { %v5447_v5 = vcombine.low %v440_v46, %v450_v62  ;;  %v2357_v25 = vshll.u32 %v7763_v4, 16  ;;  %v2361_v27 = vshrl.u32 %v7763_v4, 16  ;;  %v459_v33 = vrot.slane %v458_v12, 4 }
  0xa1   : > { %v2341_v9 = vrot.slane %v2340_v57, 4  ;;  %v468_v34 = vor.u32 %v467_v13, %v463_v10  ;;  %v2350_v35 = vrot.slane %v2348_v19, 4  ;;  %v2353_v40 = vrot.slane %v2351_v23, 5 }
  0xa2   : > { %6308 = vmatprep.mubr.bf16.mxu1 %v5447_v5  ;;  %v2359_v41 = vrot.slane %v2357_v25, 5  ;;  %v2363_v43 = vrot.slane %v2361_v27, 4  ;;  %v2367_v26 = vshll.u32 %v7768_v17, 16  ;;  %v464_v45 = vsel %vm7609_vm2, %v459_v33, %v463_v10  ;;  %v5618_v10 = vld [vmem:[%s7582_s11 + $0x90] sm:$0xf] }
  0xa3   : > { %v2346_v20 = vsel %vm7609_vm2, %v2341_v9, %v2345_v52  ;;  %v469_v46 = vrot.slane %v468_v34, 4  ;;  %v476_v47 = vshrl.u32 %v7775_v30, 16  ;;  %v479_v49 = vshll.u32 %v7775_v30, 16  ;;  %v273_v34 = vld [vmem:[%s7582_s11 + $0x74] sm:$0x1] }
  0xa4   : > { %v5639_v32 = vcombine.low %v2336_v7, %v2346_v20  ;;  %v2354_v50 = vor.u32 %v2353_v40, %v2350_v35  ;;  %v2364_v52 = vor.u32 %v2363_v43, %v2359_v41  ;;  %v2369_v53 = vrot.slane %v2367_v26, 5  ;;  %v7806_v20 = vld [vmem:[%s7582_s11 + $0x70] sm:$0xf]  ;;  %v5658_v35 = vld [vmem:[%s7582_s11 + $0x18] sm:$0xe] }
  0xa5   : > { %v485_v55 = vshll.u32 %v7778_v37, 16  ;;  %v474_v56 = vsel %vm7609_vm2, %v469_v46, %v473_v16  ;;  %v478_v57 = vrot.slane %v476_v47, 4  ;;  %v481_v58 = vrot.slane %v479_v49, 5 }
  0xa6   : > { %6500 = vmatprep.mubr.bf16.mxu0 %v5639_v32  ;;  %v489_v60 = vshrl.u32 %v7778_v37, 16  ;;  %v5448_v62 = vcombine.low %v464_v45, %v474_v56  ;;  %v2355_v63 = vrot.slane %v2354_v50, 4  ;;  %v2365_v1 = vrot.slane %v2364_v52, 4 }
  0xa7   : > { %v487_v2 = vrot.slane %v485_v55, 5  ;;  %v482_v5 = vor.u32 %v481_v58, %v478_v57  ;;  %v495_v9 = vshll.u32 %v272_v14, 16  ;;  %v5673_v12 = vrot.slane %v5657_v51, 9  ;;  %v7815_v14 = vld [vmem:[%s7582_s11 + $0x78] sm:$0xf] }
  0xa8   : > { %v491_v7 = vrot.slane %v489_v60, 4  ;;  %6309 = vmatmul.mubr.bf16.gmra.mrb[12].mxu1 %v5448_v62  ;;  %v2360_v13 = vsel %vm7609_vm2, %v2355_v63, %v2359_v41  ;;  %v2370_v16 = vsel %vm7609_vm2, %v2365_v1, %v2369_v53  ;;  %v2950_v19 = vrot.slane %v7597_v21, 5  ;;  %v7826_v53 = vld [vmem:[%s7582_s11 + $0x7c] sm:$0xf] }
  0xa9   : > { %v500_v23 = vshrl.u32 %v7792_v61, 16  ;;  %v5640_v25 = vcombine.low %v2360_v13, %v2370_v16  ;;  %v483_v27 = vrot.slane %v482_v5, 4  ;;  %v497_v33 = vrot.slane %v495_v9, 5  ;;  %v5659_v9 = vld [vmem:[%s7582_s11 + $0x24] sm:$0xe] }
  0xaa   : > { %v492_v32 = vor.u32 %v491_v7, %v487_v2  ;;  %v2951_v40 = vsel %vm7796_vm5, %v5673_v12, %v2950_v19  ;;  %v2952_v41 = vrot.slane %v2950_v19, 4  ;;  %v503_v26 = vshll.u32 %v7792_v61, 16  ;;  %v7084_v16 = vld [vmem:[#allocation5 + $0x188] sm:$0xff]  }
  0xab   : > { %v502_v43 = vrot.slane %v500_v23, 4  ;;  %6501 = vmatmul.mubr.bf16.gmra.mrb[12].mxu0 %v5640_v25  ;;  %v488_v21 = vsel %vm7609_vm2, %v483_v27, %v487_v2  ;;  %v509_v46 = vshll.u32 %v7806_v20, 16  ;;  %v513_v47 = vshrl.u32 %v7806_v20, 16 }
  0xac   : > { %v493_v45 = vrot.slane %v492_v32, 4  ;;  %v2954_v49 = vsel %vm7796_vm5, %v2952_v41, %v2953_v6  ;;  %v505_v51 = vrot.slane %v503_v26, 5  ;;  %v519_v50 = vshll.u32 %v273_v34, 16  ;;  %v274_v6 = vld [vmem:[%s7582_s11 + $0x80] sm:$0x1] }
  0xad   : > { %v5674_v52 = vrot.slane %v5658_v35, 9  ;;  %v5689_v56 = vcombine.low %v2951_v40, %v2954_v49  ;;  %v511_v57 = vrot.slane %v509_v46, 5  ;;  %v515_v58 = vrot.slane %v513_v47, 4  ;;  %v7851_v34 = vld [vmem:[%s7582_s11 + $0x88] sm:$0xf] }
  0xae   : > { %v498_v55 = vsel %vm7609_vm2, %v493_v45, %v497_v33  ;;  %v506_v62 = vor.u32 %v505_v51, %v502_v43  ;;  %v521_v63 = vrot.slane %v519_v50, 5  ;;  %v2961_v2 = vsel %vm7796_vm5, %v7648_v38, %v2960_v29  ;;  %v7846_v29 = vld [vmem:[%s7582_s11 + $0x84] sm:$0xf]  ;;  %v275_v46 = vld [vmem:[%s7582_s11 + $0x8c] sm:$0x1] }
  0xaf   : > { %v5449_v60 = vcombine.low %v488_v21, %v498_v55  ;;  %v2958_v22 = vsel %vm7796_vm5, %v5674_v52, %v2957_v28  ;;  %6536 = vmatprep.mubr.bf16.mxu0 %v5689_v56  ;;  %v516_v1 = vor.u32 %v515_v58, %v511_v57  ;;  %v524_v5 = vshrl.u32 %v7815_v14, 16 }
  0xb0   : > { %v527_v7 = vshll.u32 %v7815_v14, 16  ;;  %v507_v59 = vrot.slane %v506_v62, 4  ;;  %v5690_v12 = vcombine.low %v2958_v22, %v2961_v2  ;;  %v533_v28 = vshll.u32 %v7826_v53, 16  ;;  %v7871_v22 = vld [vmem:[%s7582_s11 + $0x90] sm:$0xf] }
  0xb1   : > { %6312 = vmatprep.mubr.bf16.mxu1 %v5449_v60  ;;  %v537_v13 = vshrl.u32 %v7826_v53, 16  ;;  %v517_v19 = vrot.slane %v516_v1, 4  ;;  %v526_v0 = vrot.slane %v524_v5, 4  ;;  %v543_v25 = vshll.u32 %v274_v6, 16  ;;  %v7874_v6 = vld [vmem:[%s7582_s11 + $0x94] sm:$0xf] }
  0xb2   : > { %v529_v23 = vrot.slane %v527_v7, 5  ;;  %v512_v38 = vsel %vm7609_vm2, %v507_v59, %v511_v57  ;;  %v535_v27 = vrot.slane %v533_v28, 5  ;;  %v5675_v33 = vrot.slane %v5659_v9, 9  ;;  %v5660_v57 = vld [vmem:[%s7582_s11 + $0x30] sm:$0xe] }
  0xb3   : > { %v539_v32 = vrot.slane %v537_v13, 4  ;;  %v522_v35 = vsel %vm7609_vm2, %v517_v19, %v521_v63  ;;  %6537 = vmatmul.mubr.bf16.vlgmr.msra.gmra.mrb[0].mxu0 %v5690_v12  ;;  %v545_v41 = vrot.slane %v543_v25, 5  ;;  %v2964_v43 = vrot.slane %v7651_v42, 5  ;;  %v7086_v42 = vld [vmem:[#allocation5 + $0x190] sm:$0xff]   ;;  %v276_v13 = vld [vmem:[%s7582_s11 + $0x98] sm:$0x1] }
  0xb4   : > { %v530_v40 = vor.u32 %v529_v23, %v526_v0  ;;  %v5450_v26 = vcombine.low %v512_v38, %v522_v35  ;;  %6569 = vmatpush3.bf16.msra.mxu0 %v7730_v54  ;;  %v2967_v45 = vrot.slane %v7654_v48, 5  ;;  %v548_v47 = vshrl.u32 %v7846_v29, 16  ;;  %v7088_v19 = vld [vmem:[#allocation5 + $0x198] sm:$0xff]  }
  0xb5   : > { %v540_v21 = vor.u32 %v539_v32, %v535_v27  ;;  %v2965_v51 = vsel %vm7796_vm5, %v5675_v33, %v2964_v43  ;;  %v2966_v50 = vrot.slane %v2964_v43, 4  ;;  %v551_v52 = vshll.u32 %v7846_v29, 16  ;;  %6570 = vmatprep.subr.bf16.mxu0 %v7084_v16 }
  0xb6   : > { %v531_v49 = vrot.slane %v530_v40, 4  ;;  %6313 = vmatmul.mubr.bf16.gmra.mrb[16].mxu1 %v5450_v26  ;;  %v550_v55 = vrot.slane %v548_v47, 4  ;;  %v557_v56 = vshll.u32 %v7851_v34, 16  ;;  %v561_v48 = vshrl.u32 %v7851_v34, 16 }
  0xb7   : > { %v541_v54 = vrot.slane %v540_v21, 4  ;;  %v2968_v60 = vsel %vm7796_vm5, %v2966_v50, %v2967_v45  ;;  %v553_v62 = vrot.slane %v551_v52, 5  ;;  %v567_v63 = vshll.u32 %v275_v46, 16  ;;  %v7891_v46 = vld [vmem:[%s7582_s11 + $0x9c] sm:$0xf] }
  0xb8   : > { %v536_v58 = vsel %vm7609_vm2, %v531_v49, %v535_v27  ;;  %v5691_v2 = vcombine.low %v2965_v51, %v2968_v60  ;;  %v559_v5 = vrot.slane %v557_v56, 5  ;;  %v563_v7 = vrot.slane %v561_v48, 4  ;;  %6571 = vmatpush3.bf16.msra.mxu0 %v7084_v16  ;;  %v5661_v27 = vld [vmem:[%s7582_s11 + $0x3c] sm:$0xe]  ;;  %v7898_v52 = vld [vmem:[%s7582_s11 + $0xa0] sm:$0xf] }
  0xb9   : > { %v546_v1 = vsel %vm7609_vm2, %v541_v54, %v545_v41  ;;  %v554_v59 = vor.u32 %v553_v62, %v550_v55  ;;  %v569_v12 = vrot.slane %v567_v63, 5  ;;  %v5676_v28 = vrot.slane %v5660_v57, 9  ;;  %6572 = vmatprep.subr.bf16.mxu0 %v7086_v42  ;;  %v7096_v57 = vld [vmem:[#allocation5 + $0x1a8] sm:$0xff]  }
  0xba   : > { %v5451_v9 = vcombine.low %v536_v58, %v546_v1  ;;  %6540 = vmatprep.mubr.bf16.mxu0 %v5691_v2  ;;  %v564_v0 = vor.u32 %v563_v7, %v559_v5  ;;  %v2971_v23 = vrot.slane %v7673_v36, 5  ;;  %v2974_v25 = vrot.slane %v7676_v44, 5  ;;  %v277_v63 = vld [vmem:[%s7582_s11 + $0xa4] sm:$0x1] }
  0xbb   : > { %v572_v38 = vshrl.u32 %v7871_v22, 16  ;;  %v555_v32 = vrot.slane %v554_v59, 4  ;;  %v575_v16 = vshll.u32 %v7871_v22, 16  ;;  %v581_v33 = vshll.u32 %v7874_v6, 16  ;;  %v5662_v59 = vld [vmem:[%s7582_s11 + $0x48] sm:$0xe] }
  0xbc   : > { %6316 = vmatprep.mubr.bf16.mxu1 %v5451_v9  ;;  %v585_v35 = vshrl.u32 %v7874_v6, 16  ;;  %v565_v40 = vrot.slane %v564_v0, 4  ;;  %v2972_v41 = vsel %vm7796_vm5, %v5676_v28, %v2971_v23  ;;  %v2973_v36 = vrot.slane %v2971_v23, 4  ;;  %6573 = vmatpush3.bf16.msra.mxu0 %v7086_v42  ;;  %v7092_v42 = vld [vmem:[#allocation5 + $0x1a0] sm:$0xff]  }
  0xbd   : > { %v574_v43 = vrot.slane %v572_v38, 4  ;;  %v560_v44 = vsel %vm7609_vm2, %v555_v32, %v559_v5  ;;  %v577_v26 = vrot.slane %v575_v16, 5  ;;  %v583_v21 = vrot.slane %v581_v33, 5  ;;  %6574 = vmatprep.subr.bf16.mxu0 %v7088_v19  ;;  %v7920_v33 = vld [vmem:[%s7582_s11 + $0xac] sm:$0xf] }
  0xbe   : > { %v587_v45 = vrot.slane %v585_v35, 4  ;;  %v570_v47 = vsel %vm7609_vm2, %v565_v40, %v569_v12  ;;  %v2975_v49 = vsel %vm7796_vm5, %v2973_v36, %v2974_v25  ;;  %v591_v51 = vshll.u32 %v276_v13, 16  ;;  %v7915_v25 = vld [vmem:[%s7582_s11 + $0xa8] sm:$0xf] }
  0xbf   : > { %v5677_v50 = vrot.slane %v5661_v27, 9  ;;  %v5452_v54 = vcombine.low %v560_v44, %v570_v47  ;;  %v5692_v55 = vcombine.low %v2972_v41, %v2975_v49  ;;  %v578_v56 = vor.u32 %v577_v26, %v574_v43  ;;  %v7100_v35 = vld [vmem:[#allocation5 + $0x1b0] sm:$0xff]  }
  0xc0   : > { %v588_v48 = vor.u32 %v587_v45, %v583_v21  ;;  %v593_v58 = vrot.slane %v591_v51, 5  ;;  %v2978_v60 = vrot.slane %v7692_v18, 5  ;;  %v2981_v62 = vrot.slane %v7697_v24, 5  ;;  %6575 = vmatpush3.bf16.msra.mxu0 %v7088_v19  ;;  %v278_v45 = vld [vmem:[%s7582_s11 + $0xb0] sm:$0x1] }
  0xc1   : > { %v596_v1 = vshrl.u32 %v7891_v46, 16  ;;  %6317 = vmatmul.mubr.bf16.gmra.mrb[20].mxu1 %v5452_v54  ;;  %6541 = vmatmul.mubr.bf16.gmra.mrb[4].mxu0 %v5692_v55  ;;  %v579_v2 = vrot.slane %v578_v56, 4  ;;  %v599_v7 = vshll.u32 %v7891_v46, 16  ;;  %v605_v9 = vshll.u32 %v7898_v52, 16  ;;  %v5663_v54 = vld [vmem:[%s7582_s11 + $0x54] sm:$0xe] }
  0xc2   : > { %v589_v5 = vrot.slane %v588_v48, 4  ;;  %v2979_v18 = vsel %vm7796_vm5, %v5677_v50, %v2978_v60  ;;  %v2980_v12 = vrot.slane %v2978_v60, 4  ;;  %v609_v28 = vshrl.u32 %v7898_v52, 16  ;;  %6576 = vmatprep.subr.bf16.mxu0 %v7092_v42 }
  0xc3   : > { %v598_v24 = vrot.slane %v596_v1, 4  ;;  %v584_v13 = vsel %vm7609_vm2, %v579_v2, %v583_v21  ;;  %v601_v0 = vrot.slane %v599_v7, 5  ;;  %v607_v23 = vrot.slane %v605_v9, 5  ;;  %v7942_v9 = vld [vmem:[%s7582_s11 + $0xb8] sm:$0xf] }
  0xc4   : > { %v594_v19 = vsel %vm7609_vm2, %v589_v5, %v593_v58  ;;  %v2982_v27 = vsel %vm7796_vm5, %v2980_v12, %v2981_v62  ;;  %v611_v32 = vrot.slane %v609_v28, 4  ;;  %v615_v16 = vshll.u32 %v277_v63, 16  ;;  %6577 = vmatpush3.bf16.msra.mxu0 %v7092_v42  ;;  %v279_v28 = vld [vmem:[%s7582_s11 + $0xbc] sm:$0x1] }
  0xc5   : > { %v5453_v38 = vcombine.low %v584_v13, %v594_v19  ;;  %v5693_v40 = vcombine.low %v2979_v18, %v2982_v27  ;;  %v602_v41 = vor.u32 %v601_v0, %v598_v24  ;;  %v5678_v36 = vrot.slane %v5662_v59, 9  ;;  %6578 = vmatprep.subr.bf16.mxu0 %v7096_v57  ;;  %v7104_v59 = vld [vmem:[#allocation5 + $0x1b8] sm:$0xff]  }
  0xc6   : > { %v2985_v43 = vrot.slane %v7715_v15, 5  ;;  %v612_v44 = vor.u32 %v611_v32, %v607_v23  ;;  %v617_v26 = vrot.slane %v615_v16, 5  ;;  %v2988_v21 = vrot.slane %v7720_v31, 5  ;;  %v7933_v31 = vld [vmem:[%s7582_s11 + $0xb4] sm:$0xf] }
  0xc7   : > { %6320 = vmatprep.mubr.bf16.mxu1 %v5453_v38  ;;  %v620_v47 = vshrl.u32 %v7915_v25, 16  ;;  %6544 = vmatprep.mubr.bf16.mxu0 %v5693_v40  ;;  %v603_v49 = vrot.slane %v602_v41, 4  ;;  %v623_v42 = vshll.u32 %v7915_v25, 16  ;;  %v629_v56 = vshll.u32 %v7920_v33, 16  ;;  %v5664_v40 = vld [vmem:[%s7582_s11 + $0x60] sm:$0xe] }
  0xc8   : > { %v2986_v51 = vsel %vm7796_vm5, %v5678_v36, %v2985_v43  ;;  %v2987_v50 = vrot.slane %v2985_v43, 4  ;;  %v613_v15 = vrot.slane %v612_v44, 4  ;;  %v633_v48 = vshrl.u32 %v7920_v33, 16  ;;  %6579 = vmatpush3.bf16.msra.mxu0 %v7096_v57  ;;  %v5611_v44 = vld [vmem:[%s7582_s11 + $0x74] sm:$0x1] }
  0xc9   : > { %v622_v55 = vrot.slane %v620_v47, 4  ;;  %v608_v58 = vsel %vm7609_vm2, %v603_v49, %v607_v23  ;;  %v625_v62 = vrot.slane %v623_v42, 5  ;;  %v639_v63 = vshll.u32 %v278_v45, 16  ;;  %6580 = vmatprep.subr.bf16.mxu0 %v7100_v35 }
  0xca   : > { %v2989_v60 = vsel %vm7796_vm5, %v2987_v50, %v2988_v21  ;;  %v618_v1 = vsel %vm7609_vm2, %v613_v15, %v617_v26  ;;  %v631_v5 = vrot.slane %v629_v56, 5  ;;  %v635_v7 = vrot.slane %v633_v48, 4  ;;  %v7956_v26 = vld [vmem:[#allocation5 + $0x1c0] sm:$0xff]  }
  0xcb   : > { %v5694_v2 = vcombine.low %v2986_v51, %v2989_v60  ;;  %v5454_v57 = vcombine.low %v608_v58, %v618_v1  ;;  %v626_v18 = vor.u32 %v625_v62, %v622_v55  ;;  %v641_v12 = vrot.slane %v639_v63, 5  ;;  %v5665_v51 = vld [vmem:[%s7582_s11 + $0x6c] sm:$0xe]  ;;  %v5666_v1 = vld [vmem:[%s7582_s11 + $0x78] sm:$0xe] }
  0xcc   : > { %v5679_v24 = vrot.slane %v5663_v54, 9  ;;  %v636_v13 = vor.u32 %v635_v7, %v631_v5  ;;  %v2992_v19 = vrot.slane %v7740_v8, 5  ;;  %v2995_v0 = vrot.slane %v7746_v11, 5  ;;  %6581 = vmatpush3.bf16.msra.mxu0 %v7100_v35  ;;  %v5610_v11 = vld [vmem:[%s7582_s11 + $0x70] sm:$0xf] }
  0xcd   : > { %6545 = vmatmul.mubr.bf16.gmra.mrb[8].mxu0 %v5694_v2  ;;  %v644_v23 = vshrl.u32 %v7933_v31, 16  ;;  %6321 = vmatmul.mubr.bf16.gmra.mrb[24].mxu1 %v5454_v57  ;;  %v627_v38 = vrot.slane %v626_v18, 4  ;;  %v647_v27 = vshll.u32 %v7933_v31, 16  ;;  %v653_v32 = vshll.u32 %v7942_v9, 16  ;;  %v7973_v18 = vld [vmem:[%s7582_s11 + $0x80] sm:$0x1] }
  0xce   : > { %v657_v16 = vshrl.u32 %v7942_v9, 16  ;;  %v637_v41 = vrot.slane %v636_v13, 4  ;;  %v2993_v36 = vsel %vm7796_vm5, %v5679_v24, %v2992_v19  ;;  %v2994_v8 = vrot.slane %v2992_v19, 4  ;;  %6582 = vmatprep.subr.bf16.mxu0 %v7104_v59  ;;  %v7979_v24 = vld [vmem:[%s7582_s11 + $0x4] sm:$0xf] }
  0xcf   : > { %v646_v43 = vrot.slane %v644_v23, 4  ;;  %v632_v21 = vsel %vm7609_vm2, %v627_v38, %v631_v5  ;;  %v649_v45 = vrot.slane %v647_v27, 5  ;;  %v655_v47 = vrot.slane %v653_v32, 5  ;;  %v5616_v13 = vld [vmem:[%s7582_s11 + $0x88] sm:$0xf] }
  0xd0   : > { %v659_v49 = vrot.slane %v657_v16, 4  ;;  %v642_v35 = vsel %vm7609_vm2, %v637_v41, %v641_v12  ;;  %v2996_v50 = vsel %vm7796_vm5, %v2994_v8, %v2995_v0  ;;  %v663_v42 = vshll.u32 %v279_v28, 16  ;;  %6583 = vmatpush3.bf16.msra.mxu0 %v7104_v59  ;;  %v7970_v59 = vld [vmem:[%s7582_s11 + $0x7c] sm:$0xf]  ;;  %v7173_v12 = vld [vmem:[%s7582_s11] sm:$0xf] }
  0xd1   : > { %v5680_v54 = vrot.slane %v5664_v40, 9  ;;  %v5455_v15 = vcombine.low %v632_v21, %v642_v35  ;;  %v5695_v55 = vcombine.low %v2993_v36, %v2996_v50  ;;  %v650_v56 = vor.u32 %v649_v45, %v646_v43  ;;  %6616 = vmatprep.subr.bf16.mxu0 %v7956_v26  ;;  %v5617_v27 = vld [vmem:[%s7582_s11 + $0x8c] sm:$0x1]  ;;  %v5667_v40 = vld [vmem:[%s7582_s11 + $0x84] sm:$0xe] }
  0xd2   : > { %v660_v48 = vor.u32 %v659_v49, %v655_v47  ;;  %v665_v58 = vrot.slane %v663_v42, 5  ;;  %v2999_v60 = vrot.slane %v7763_v4, 5  ;;  %v3002_v62 = vrot.slane %v7768_v17, 5  ;;  %v5619_v43 = vld [vmem:[%s7582_s11 + $0x94] sm:$0xf] }
  0xd3   : > { %v5681_v63 = vrot.slane %v5665_v51, 9  ;;  %6324 = vmatprep.mubr.bf16.mxu1 %v5455_v15  ;;  %6548 = vmatprep.mubr.bf16.mxu0 %v5695_v55  ;;  %v651_v2 = vrot.slane %v650_v56, 4  ;;  %v3006_v7 = vrot.slane %v5610_v11, 5  ;;  %v3009_v57 = vrot.slane %v5611_v44, 5  ;;  %v5620_v45 = vld [vmem:[%s7582_s11 + $0x98] sm:$0x1] }
  0xd4   : > { %v661_v5 = vrot.slane %v660_v48, 4  ;;  %v3000_v4 = vsel %vm7796_vm5, %v5680_v54, %v2999_v60  ;;  %v3001_v17 = vrot.slane %v2999_v60, 4  ;;  %v5465_v28 = vcombine.low %v7173_v12, %v7979_v24  ;;  %v5622_v35 = vld [vmem:[%s7582_s11 + $0xa0] sm:$0xf]  ;;  %v5623_v15 = vld [vmem:[%s7582_s11 + $0xa4] sm:$0x1] }
  0xd5   : > { %v656_v19 = vsel %vm7609_vm2, %v651_v2, %v655_v47  ;;  %v3007_v23 = vsel %vm7796_vm5, %v5681_v63, %v3006_v7  ;;  %v3008_v38 = vrot.slane %v3006_v7, 4  ;;  %v5682_v8 = vrot.slane %v5666_v1, 9  ;;  %v5668_v47 = vld [vmem:[%s7582_s11 + $0x90] sm:$0xe]  ;;  %v5669_v55 = vld [vmem:[%s7582_s11 + $0x9c] sm:$0xe] }
  0xd6   : > { %v666_v0 = vsel %vm7609_vm2, %v661_v5, %v665_v58  ;;  %v3003_v16 = vsel %vm7796_vm5, %v3001_v17, %v3002_v62  ;;  %v3013_v44 = vrot.slane %v7970_v59, 5  ;;  %v3016_v21 = vrot.slane %v7973_v18, 5  ;;  %v7175_v58 = vld [vmem:[%s7582_s11 + $0xc] sm:$0xf]  ;;  %v8009_v60 = vld [vmem:[%s7582_s11 + $0x10] sm:$0xf] }
  0xd7   : > { %v5456_v32 = vcombine.low %v656_v19, %v666_v0  ;;  %v5696_v41 = vcombine.low %v3000_v4, %v3003_v16  ;;  %v3010_v36 = vsel %vm7796_vm5, %v3008_v38, %v3009_v57  ;;  %v5683_v49 = vrot.slane %v5667_v40, 9  ;;  %v5625_v2 = vld [vmem:[%s7582_s11 + $0xac] sm:$0xf]  ;;  %v7095_v57 = vld [vmem:[#allocation5 + $0x88] sm:$0xff]  }
  0xd8   : > { %v5697_v11 = vcombine.low %v3007_v23, %v3010_v36  ;;  %v3020_v51 = vrot.slane %v5616_v13, 5  ;;  %v3014_v50 = vsel %vm7796_vm5, %v5682_v8, %v3013_v44  ;;  %v3015_v42 = vrot.slane %v3013_v44, 4  ;;  %v7177_v12 = vld [vmem:[%s7582_s11 + $0x18] sm:$0xf]  ;;  %v5671_v44 = vld [vmem:[%s7582_s11 + $0xb4] sm:$0xe] }
  0xd9   : > { %6325 = vmatmul.mubr.bf16.gmra.mrb[28].mxu1 %v5456_v32  ;;  %6549 = vmatmul.mubr.bf16.gmra.mrb[12].mxu0 %v5696_v41  ;;  %v3023_v54 = vrot.slane %v5617_v27, 5  ;;  %v5466_v62 = vcombine.low %v7175_v58, %v8009_v60  ;;  %v3027_v1 = vrot.slane %v5619_v43, 5  ;;  %v5684_v4 = vrot.slane %v5668_v47, 9  ;;  %v5670_v32 = vld [vmem:[%s7582_s11 + $0xa8] sm:$0xe] }
  0xda   : > { %6344 = vmatprep.mubr.bf16.mxu1 %v5465_v28  ;;  %6552 = vmatprep.mubr.bf16.mxu0 %v5697_v11  ;;  %v3021_v56 = vsel %vm7796_vm5, %v5683_v49, %v3020_v51  ;;  %v3022_v48 = vrot.slane %v3020_v51, 4  ;;  %v3017_v63 = vsel %vm7796_vm5, %v3015_v42, %v3016_v21  ;;  %v3030_v17 = vrot.slane %v5620_v45, 5  ;;  %v8019_v28 = vld [vmem:[%s7582_s11 + $0x1c] sm:$0xf]  ;;  %v5628_v16 = vld [vmem:[%s7582_s11 + $0xb8] sm:$0xf] }
  0xdb   : > { %v5698_v5 = vcombine.low %v3014_v50, %v3017_v63  ;;  %v5467_v13 = vcombine.low %v7177_v12, %v8019_v28  ;;  %v3029_v0 = vrot.slane %v3027_v1, 4  ;;  %v3034_v23 = vrot.slane %v5622_v35, 5  ;;  %v5626_v41 = vld [vmem:[%s7582_s11 + $0xb0] sm:$0x1]  ;;  %v7099_v11 = vld [vmem:[#allocation5 + $0x90] sm:$0xff]  }
  0xdc   : > { %v3024_v7 = vsel %vm7796_vm5, %v3022_v48, %v3023_v54  ;;  %v5685_v38 = vrot.slane %v5669_v55, 9  ;;  %v3037_v27 = vrot.slane %v5623_v15, 5  ;;  %v3041_v36 = vrot.slane %v5625_v2, 5  ;;  %v5629_v47 = vld [vmem:[%s7582_s11 + $0xbc] sm:$0x1] }
  0xdd   : > { %v5699_v19 = vcombine.low %v3021_v56, %v3024_v7  ;;  %v3036_v40 = vrot.slane %v3034_v23, 4  ;;  %v3028_v8 = vsel %vm7796_vm5, %v5684_v4, %v3027_v1  ;;  %v3031_v43 = vsel %vm7796_vm5, %v3029_v0, %v3030_v17  ;;  %v7179_v49 = vld [vmem:[%s7582_s11 + $0x24] sm:$0xf]  ;;  %v8038_v51 = vld [vmem:[%s7582_s11 + $0x28] sm:$0xf]  ;;  %v7108_v0 = vld [vmem:[#allocation5 + $0xa0] sm:$0xff]  }
  0xde   : > { %v3048_v21 = vrot.slane %v5628_v16, 5  ;;  %v3035_v45 = vsel %vm7796_vm5, %v5685_v38, %v3034_v23  ;;  %v5468_v35 = vcombine.low %v7179_v49, %v8038_v51  ;;  %v7181_v50 = vld [vmem:[%s7582_s11 + $0x30] sm:$0xf]  ;;  %v8043_v42 = vld [vmem:[%s7582_s11 + $0x34] sm:$0xf]  ;;  %v5686_v15 = vrot.slane %v5670_v32, 9 }
  0xdf   : > { %v5469_v54 = vcombine.low %v7181_v50, %v8043_v42  ;;  %v5700_v55 = vcombine.low %v3028_v8, %v3031_v43  ;;  %v3043_v56 = vrot.slane %v3041_v36, 4  ;;  %v3044_v48 = vrot.slane %v5626_v41, 5  ;;  %v5631_v63 = vld [vmem:[%s7582_s11 + $0xc4] sm:$0xf]  ;;  %v5672_v4 = vld [vmem:[%s7582_s11 + $0xc0] sm:$0xe] }
  0xe0   : > { %v5687_v58 = vrot.slane %v5671_v44, 9  ;;  %v3050_v2 = vrot.slane %v3048_v21, 4  ;;  %v3042_v7 = vsel %vm7796_vm5, %v5686_v15, %v3041_v36  ;;  %v3055_v17 = vrot.slane %v5631_v63, 5  ;;  %v7183_v23 = vld [vmem:[%s7582_s11 + $0x3c] sm:$0xf] }
  0xe1   : > { %6345 = vmatmul.mubr.bf16.vlgmr.msra.gmra.mrb[0].mxu1 %v5466_v62  ;;  %6553 = vmatmul.mubr.bf16.gmra.mrb[16].mxu0 %v5698_v5  ;;  %v7103_v62 = vld [vmem:[#allocation5 + $0x98] sm:$0xff]   ;;  %v3051_v5 = vrot.slane %v5629_v47, 5  ;;  %v8059_v38 = vld [vmem:[%s7582_s11 + $0x40] sm:$0xf]  ;;  %v5688_v36 = vrot.slane %v5672_v4, 9  ;;  %v7106_v15 = vld [vmem:[%s7582_s11 + $0x18] sm:$0xff]  }
  0xe2   : > { %6377 = vmatpush3.bf16.msra.mxu1 %v7737_v3  ;;  %6348 = vmatprep.mubr.bf16.mxu1 %v5467_v13  ;;  %v3038_v3 = vsel %vm7796_vm5, %v3036_v40, %v3037_v27  ;;  %v3049_v12 = vsel %vm7796_vm5, %v5687_v58, %v3048_v21  ;;  %v5470_v27 = vcombine.low %v7183_v23, %v8059_v38  ;;  %v7185_v16 = vld [vmem:[%s7582_s11 + $0x48] sm:$0xf]  ;;  %v8064_v40 = vld [vmem:[%s7582_s11 + $0x4c] sm:$0xf]  ;;  %v3057_v43 = vrot.slane %v3055_v17, 4  ;;  %v7114_v44 = vld [vmem:[#allocation5 + $0xa8] sm:$0xff]  }
  0xe3   : > { %6556 = vmatprep.mubr.bf16.mxu0 %v5699_v19  ;;  %6378 = vmatprep.subr.bf16.mxu1 %v7095_v57  ;;  %v5701_v1 = vcombine.low %v3035_v45, %v3038_v3  ;;  %v3052_v13 = vsel %vm7796_vm5, %v3050_v2, %v3051_v5  ;;  %v5632_v19 = vld [vmem:[%s7582_s11 + $0xc8] sm:$0x1]  ;;  %v5471_v41 = vcombine.low %v7185_v16, %v8064_v40  ;;  %v7187_v47 = vld [vmem:[%s7582_s11 + $0x54] sm:$0xf]  ;;  %v8073_v49 = vld [vmem:[%s7582_s11 + $0x58] sm:$0xf] }
  0xe4   : > { %v5703_v8 = vcombine.low %v3049_v12, %v3052_v13  ;;  %v3056_v21 = vsel %vm7796_vm5, %v5688_v36, %v3055_v17  ;;  %v7120_v3 = vld [vmem:[#allocation5 + $0xb0] sm:$0xff]   ;;  %v1314_v58 = vrot.slane %v7979_v24, 5  ;;  %v7190_v2 = vld [vmem:[%s7582_s11 + $0x14] sm:$0x1]  ;;  %v1263_v24 = vld [vmem:[%s7582_s11 + $0x18] sm:$0xe]  ;;  %v5475_v23 = vcombine.low %v7815_v14, %v7826_v53 }
  0xe5   : > { %v7189_v63 = vld [vmem:[%s7582_s11 + $0x8] sm:$0x1]  ;;  %v1324_v5 = vrot.slane %v7190_v2, 5  ;;  %v1328_v4 = vrot.slane %v8019_v28, 5  ;;  %v1335_v17 = vrot.slane %v8038_v51, 5  ;;  %v5476_v14 = vcombine.low %v7846_v29, %v7851_v34 }
  0xe6   : > { %6379 = vmatpush3.bf16.msra.mxu1 %v7095_v57  ;;  %v3045_v57 = vsel %vm7796_vm5, %v3043_v56, %v3044_v48  ;;  %v2409_v56 = vshrl.u32 %v7970_v59, 16  ;;  %v7126_v48 = vld [vmem:[#allocation5 + $0xb8] sm:$0xff]   ;;  %v1264_v13 = vld [vmem:[%s7582_s11 + $0x24] sm:$0xe]  ;;  %v7191_v28 = vld [vmem:[%s7582_s11 + $0x20] sm:$0x1] }
  0xe7   : > { %6380 = vmatprep.subr.bf16.mxu1 %v7099_v11  ;;  %v5702_v32 = vcombine.low %v3042_v7, %v3045_v57  ;;  %v8087_v7 = vld [vmem:[#allocation5 + $0xc0] sm:$0xff]   ;;  %v1331_v51 = vrot.slane %v7191_v28, 5  ;;  %v7192_v36 = vld [vmem:[%s7582_s11 + $0x2c] sm:$0x1]  ;;  %v1349_v34 = vrot.slane %v8059_v38, 5 }
  0xe8   : > { %v8091_v57 = vrot.slane %v2409_v56, 4  ;;  %v7122_v38 = vld [vmem:[#allocation5 + $0x1d0] sm:$0xff]  }
  0xe9   : > { %6349 = vmatmul.mubr.bf16.gmra.mrb[4].mxu1 %v5468_v35  ;;  %6557 = vmatmul.mubr.bf16.gmra.mrb[20].mxu0 %v5700_v55  ;;  %v5472_v35 = vcombine.low %v7187_v47, %v8073_v49  ;;  %v2405_v55 = vshll.u32 %v7970_v59, 16 }
  0xea   : > { %6352 = vmatprep.mubr.bf16.mxu1 %v5469_v54  ;;  %6560 = vmatprep.mubr.bf16.mxu0 %v5701_v1  ;;  %v5473_v54 = vcombine.low %v7775_v30, %v7778_v37  ;;  %v1317_v1 = vrot.slane %v7189_v63, 5  ;;  %v1262_v30 = vld [vmem:[%s7582_s11 + $0xc] sm:$0xe]  ;;  %v1321_v37 = vrot.slane %v8009_v60, 5  ;;  %v1316_v60 = vrot.slane %v1314_v58, 4 }
  0xeb   : > { %6381 = vmatpush3.bf16.msra.mxu1 %v7099_v11  ;;  %v3058_v11 = vrot.slane %v5632_v19, 5  ;;  %v8089_v59 = vrot.slane %v2405_v55, 5  ;;  %v2415_v19 = vshll.u32 %v7973_v18, 16  ;;  %v5492_v18 = vrot.slane %v1264_v13, 9 }
  0xec   : > { %6382 = vmatprep.subr.bf16.mxu1 %v7103_v62  ;;  %v1323_v16 = vrot.slane %v1321_v37, 4 }
  0xed   : > { %v3059_v45 = vsel %vm7796_vm5, %v3057_v43, %v3058_v11  ;;  %9287 = vst [vmem:[#allocation14_spill] sm:$0xff] %v8089_v59  ;;  %v7112_v43 = vld [vmem:[%s7582_s11 + $0x30] sm:$0xff]   ;;  %v7116_v11 = vld [vmem:[#allocation5 + $0x1c8] sm:$0xff]   ;;  %v8159_v63 = vsel %vm7796_vm5, %v5492_v18, %v1335_v17  ;;  %v1363_v18 = vrot.slane %v8073_v49, 5 }
  0xee   : > { %v5704_v50 = vcombine.low %v3056_v21, %v3059_v45  ;;  %v1337_v21 = vrot.slane %v1335_v17, 4  ;;  %v8117_v45 = vsel %vm7796_vm5, %v1316_v60, %v1317_v1  ;;  %v8146_v55 = vsel %vm7796_vm5, %v1323_v16, %v1324_v5  ;;  %v7194_v60 = vld [vmem:[%s7582_s11 + $0x44] sm:$0x1] }
  0xef   : > { %6383 = vmatpush3.bf16.msra.mxu1 %v7103_v62  ;;  %v1261_v62 = vld [vmem:[%s7582_s11] sm:$0xe]  ;;  %v1356_v5 = vrot.slane %v8064_v40, 5  ;;  %v1352_v13 = vrot.slane %v7194_v60, 5 }
  0xf0   : > { %6384 = vmatprep.subr.bf16.mxu1 %v7108_v0  ;;  %v5489_v12 = vrot.slane %v1261_v62, 9  ;;  %v7115_v62 = vld [vmem:[%s7582_s11 + $0x3c] sm:$0xff]  }
  0xf1   : > { %6353 = vmatmul.mubr.bf16.gmra.mrb[8].mxu1 %v5470_v27  ;;  %6561 = vmatmul.mubr.bf16.gmra.mrb[24].mxu0 %v5702_v32  ;;  %v5490_v27 = vrot.slane %v1262_v30, 9  ;;  %v7109_v32 = vld [vmem:[%s7582_s11 + $0x24] sm:$0xff]   ;;  %v5770_v30 = vld [vmem:[%s7582_s11 + $0x1c] sm:$0xf] }
  0xf2   : > { %6356 = vmatprep.mubr.bf16.mxu1 %v5471_v41  ;;  %6564 = vmatprep.mubr.bf16.mxu0 %v5703_v8  ;;  %v5491_v41 = vrot.slane %v1263_v24, 9  ;;  %v1338_v8 = vrot.slane %v7192_v36, 5  ;;  %v8113_v53 = vsel %vm7796_vm5, %v5489_v12, %v1314_v58  ;;  %v8153_v58 = vld [vmem:[%s7582_s11 + $0x48] sm:$0xe]  ;;  %v1351_v12 = vrot.slane %v1349_v34, 4 }
  0xf3   : > { %6385 = vmatpush3.bf16.msra.mxu1 %v7108_v0  ;;  %v5474_v0 = vcombine.low %v7792_v61, %v7806_v20  ;;  %v1342_v61 = vrot.slane %v8043_v42, 5  ;;  %v5477_v42 = vcombine.low %v7871_v22, %v7874_v6  ;;  %v8134_v22 = vsel %vm7796_vm5, %v5490_v27, %v1321_v37  ;;  %v7193_v37 = vld [vmem:[%s7582_s11 + $0x38] sm:$0x1] }
  0xf4   : > { %6386 = vmatprep.subr.bf16.mxu1 %v7114_v44  ;;  %v8138_v6 = vsel %vm7796_vm5, %v5491_v41, %v1328_v4  ;;  %v8163_v1 = vsel %vm7796_vm5, %v1337_v21, %v1338_v8  ;;  %v1345_v24 = vrot.slane %v7193_v37, 5  ;;  %v5495_v17 = vrot.slane %v8153_v58, 9  ;;  %v5772_v21 = vld [vmem:[%s7582_s11 + $0x24] sm:$0xf]  ;;  %v7196_v58 = vld [vmem:[%s7582_s11 + $0x5c] sm:$0x1] }
  0xf5   : > { %v1344_v2 = vrot.slane %v1342_v61, 4  ;;  %v3825_v36 = vshll.u32 %v5770_v30, 16  ;;  %v3829_v8 = vshrl.u32 %v5770_v30, 16  ;;  %v5773_v37 = vld [vmem:[%s7582_s11 + $0x28] sm:$0xf]  ;;  %v3840_v28 = vshrl.u32 %v5772_v21, 16 }
  0xf6   : > { %v7121_v20 = vld [vmem:[%s7582_s11 + $0x54] sm:$0xff]   ;;  %v3853_v41 = vshrl.u32 %v5773_v37, 16 }
  0xf7   : > { %6387 = vmatpush3.bf16.msra.mxu1 %v7114_v44  ;;  %v1330_v44 = vrot.slane %v1328_v4, 4  ;;  %v3842_v47 = vrot.slane %v3840_v28, 4 }
  0xf8   : > { %6388 = vmatprep.subr.bf16.mxu1 %v7120_v3 }
  0xf9   : > { %6357 = vmatmul.mubr.bf16.gmra.mrb[12].mxu1 %v5472_v35  ;;  %6565 = vmatmul.mubr.bf16.gmra.mrb[28].mxu0 %v5704_v50  ;;  %v8128_v35 = vrot.slane %v2415_v19, 5  ;;  %v8150_v56 = vsel %vm7796_vm5, %v1330_v44, %v1331_v51  ;;  %v7118_v19 = vld [vmem:[%s7582_s11 + $0x48] sm:$0xff]   ;;  %v1268_v51 = vld [vmem:[%s7582_s11 + $0x54] sm:$0xe] }
  0xfa   : > { %6360 = vmatprep.mubr.bf16.mxu1 %v5473_v54  ;;  %6584 = vmatprep.mubr.bf16.mxu0 %v7106_v15  ;;  %v1266_v54 = vld [vmem:[%s7582_s11 + $0x3c] sm:$0xe]  ;;  %v5496_v49 = vrot.slane %v1268_v51, 9  ;;  %v7199_v51 = vld [vmem:[%s7582_s11 + $0x68] sm:$0x1] }
  0xfb   : > { %6389 = vmatpush3.bf16.msra.mxu1 %v7120_v3  ;;  %v1265_v3 = vld [vmem:[%s7582_s11 + $0x30] sm:$0xe]  ;;  %9288 = vst [vmem:[#allocation15_spill] sm:$0xff] %v8128_v35  ;;  %v5494_v4 = vrot.slane %v1266_v54, 9  ;;  %v8423_v35 = vld [vmem:[%s7582_s11 + $0x64] sm:$0xf] }
  0xfc   : > { %6390 = vmatprep.subr.bf16.mxu1 %v7126_v48  ;;  %9298 = vst [vmem:[#allocation17_spill] sm:$0xff] %v8423_v35 }
  0xfd   : > { %v8196_v54 = vsel %vm7796_vm5, %v5494_v4, %v1349_v34  ;;  %v8204_v34 = vrot.slane %v3825_v36, 5  ;;  %v3831_v4 = vrot.slane %v3829_v8, 4  ;;  %v7200_v36 = vld [vmem:[%s7582_s11 + $0x74] sm:$0x1]  ;;  %v8212_v8 = vsel %vm7796_vm5, %v1351_v12, %v1352_v13 }
  0xfe   : > { %v1380_v15 = vrot.slane %v7200_v36, 5 }
  0xff   : > { %6391 = vmatpush3.bf16.msra.mxu1 %v7126_v48  ;;  %v5493_v48 = vrot.slane %v1265_v3, 9  ;;  %v8192_v3 = vsel %vm7796_vm5, %v1344_v2, %v1345_v24  ;;  %v7198_v24 = vld [vmem:[%s7582_s11 + $0x70] sm:$0xf]  ;;  %v3832_v36 = vor.u32 %v3831_v4, %v8204_v34 }
 0x100   : > { %6424 = vmatprep.subr.bf16.mxu1 %v8087_v7 }
 0x101   : > { %6361 = vmatmul.mubr.bf16.gmra.mrb[16].mxu1 %v5474_v0  ;;  %6585 = vmatmul.mubr.bf16.vlgmr.msra.gmra.mrb[0].mxu0 %v7109_v32  ;;  %v7128_v0 = vld [vmem:[#allocation5 + $0x1d8] sm:$0xff]   ;;  %v8184_v44 = vsel %vm7796_vm5, %v5493_v48, %v1342_v61  ;;  %v1366_v61 = vrot.slane %v7196_v58, 5  ;;  %v1269_v48 = vld [vmem:[%s7582_s11 + $0x60] sm:$0xe] }
 0x102   : > { %6364 = vmatprep.mubr.bf16.mxu1 %v5475_v23  ;;  %6617 = vmatpush3.bf16.msra.mxu0 %v7956_v26  ;;  %v5769_v26 = vld [vmem:[%s7582_s11 + $0x18] sm:$0xf]  ;;  %v8172_v23 = vld [vmem:[%s7582_s11 + $0x50] sm:$0x1]  ;;  %v1270_v58 = vld [vmem:[%s7582_s11 + $0x6c] sm:$0xe] }
 0x103   : > { %6588 = vmatprep.mubr.bf16.mxu0 %v7112_v43  ;;  %6618 = vmatprep.subr.bf16.mxu0 %v7116_v11  ;;  %v1359_v27 = vrot.slane %v8172_v23, 5  ;;  %v3816_v32 = vshrl.u32 %v5769_v26, 16  ;;  %v3819_v16 = vshll.u32 %v5769_v26, 16  ;;  %v7197_v26 = vld [vmem:[%s7582_s11 + $0x64] sm:$0xf]  ;;  %v1377_v43 = vrot.slane %v7198_v24, 5 }
 0x104   : > { %v1370_v30 = vrot.slane %v7197_v26, 5  ;;  %v3843_v26 = vshll.u32 %v5772_v21, 16  ;;  %v5497_v24 = vrot.slane %v1269_v48, 9  ;;  %v8218_v21 = vsel %vm7796_vm5, %v5495_v17, %v1356_v5  ;;  %v7136_v48 = vld [vmem:[#allocation5 + $0x1e8] sm:$0xff]  }
 0x105   : > { %v3818_v60 = vrot.slane %v3816_v32, 4  ;;  %v3821_v2 = vrot.slane %v3819_v16, 5  ;;  %v1373_v32 = vrot.slane %v7199_v51, 5  ;;  %v3849_v16 = vshll.u32 %v5773_v37, 16  ;;  %v5775_v51 = vld [vmem:[%s7582_s11 + $0x30] sm:$0xf] }
 0x106   : > { %6619 = vmatpush3.bf16.msra.mxu0 %v7116_v11  ;;  %v1358_v11 = vrot.slane %v1356_v5, 4  ;;  %v5498_v50 = vrot.slane %v1270_v58, 9  ;;  %v1379_v29 = vrot.slane %v1377_v43, 4  ;;  %v7124_v37 = vld [vmem:[%s7582_s11 + $0x60] sm:$0xff]   ;;  %v3845_v12 = vrot.slane %v3843_v26, 5  ;;  %v7127_v58 = vld [vmem:[%s7582_s11 + $0x6c] sm:$0xff]  }
 0x107   : > { %6620 = vmatprep.subr.bf16.mxu0 %v7122_v38  ;;  %v8231_v5 = vsel %vm7796_vm5, %v5496_v49, %v1363_v18  ;;  %v8233_v13 = vrot.slane %v3849_v16, 5  ;;  %v9289_v17 = vcombine.low %v7891_v46, %v7898_v52  ;;  %v3867_v49 = vshll.u32 %v5775_v51, 16  ;;  %v7129_v16 = vld [vmem:[%s7582_s11 + $0x78] sm:$0xff]  }
 0x108   : > { %v8227_v40 = vsel %vm7796_vm5, %v1358_v11, %v1359_v27  ;;  %v5774_v27 = vld [vmem:[%s7582_s11 + $0x2c] sm:$0x1]  ;;  %v5776_v11 = vld [vmem:[%s7582_s11 + $0x34] sm:$0xf]  ;;  %v9290_v46 = vcombine.low %v7915_v25, %v7920_v33  ;;  %v8253_v52 = vsel %vm7796_vm5, %v5497_v24, %v1370_v30  ;;  %v8267_v25 = vrot.slane %v3832_v36, 4 }
 0x109   : > { %6365 = vmatmul.mubr.bf16.gmra.mrb[20].mxu1 %v5476_v14  ;;  %6589 = vmatmul.mubr.bf16.gmra.mrb[4].mxu0 %v7115_v62  ;;  %v5771_v14 = vld [vmem:[%s7582_s11 + $0x20] sm:$0x1]  ;;  %v1365_v62 = vrot.slane %v1363_v18, 4  ;;  %v3864_v18 = vshrl.u32 %v5775_v51, 16  ;;  %v3846_v33 = vor.u32 %v3845_v12, %v3842_v47  ;;  %v3877_v26 = vshrl.u32 %v5776_v11, 16 }
 0x10a   : > { %6368 = vmatprep.mubr.bf16.mxu1 %v5477_v42  ;;  %6592 = vmatprep.mubr.bf16.mxu0 %v7118_v19  ;;  %v7132_v42 = vld [vmem:[#allocation5 + $0x1e0] sm:$0xff]   ;;  %v1372_v19 = vrot.slane %v1370_v30, 4 }
 0x10b   : > { %6621 = vmatpush3.bf16.msra.mxu0 %v7122_v38  ;;  %v3835_v38 = vshll.u32 %v5771_v14, 16  ;;  %v3822_v14 = vor.u32 %v3821_v2, %v3818_v60  ;;  %v8240_v28 = vsel %vm7796_vm5, %v1365_v62, %v1366_v61  ;;  %v8259_v61 = vsel %vm7796_vm5, %v5498_v50, %v1377_v43  ;;  %v1271_v30 = vld [vmem:[%s7582_s11 + $0x78] sm:$0xe]  ;;  %v7201_v2 = vld [vmem:[%s7582_s11 + $0x7c] sm:$0xf]  ;;  %v7140_v50 = vld [vmem:[#allocation5 + $0x1f0] sm:$0xff]  }
 0x10c   : > { %6622 = vmatprep.subr.bf16.mxu0 %v7128_v0  ;;  %v8244_v23 = vsel %vm7796_vm5, %v1372_v19, %v1373_v32  ;;  %v8263_v60 = vsel %vm7796_vm5, %v1379_v29, %v1380_v15  ;;  %v1384_v4 = vrot.slane %v7201_v2, 5  ;;  %v3859_v29 = vshll.u32 %v5774_v27, 16  ;;  %v5777_v36 = vld [vmem:[%s7582_s11 + $0x38] sm:$0x1]  ;;  %v8404_v62 = vld [vmem:[%s7582_s11 + $0x5c] sm:$0x1] }
 0x10d   : > { %v3873_v15 = vshll.u32 %v5776_v11, 16  ;;  %v3866_v47 = vrot.slane %v3864_v18, 4  ;;  %v3869_v32 = vrot.slane %v3867_v49, 5  ;;  %v5499_v51 = vrot.slane %v1271_v30, 9  ;;  %v5778_v11 = vld [vmem:[%s7582_s11 + $0x3c] sm:$0xf] }
 0x10e   : > { %v1386_v27 = vrot.slane %v1384_v4, 4  ;;  %v5779_v18 = vld [vmem:[%s7582_s11 + $0x40] sm:$0xf]  ;;  %v3879_v2 = vrot.slane %v3877_v26, 4  ;;  %v5781_v26 = vld [vmem:[%s7582_s11 + $0x48] sm:$0xf] }
 0x10f   : > { %6623 = vmatpush3.bf16.msra.mxu0 %v7128_v0  ;;  %v3855_v0 = vrot.slane %v3853_v41, 4  ;;  %v8255_v41 = vrot.slane %v3835_v38, 5  ;;  %v7144_v38 = vld [vmem:[#allocation5 + $0x1f8] sm:$0xff]   ;;  %v8290_v30 = vrot.slane %v3873_v15, 5  ;;  %v3897_v12 = vshll.u32 %v5779_v18, 16  ;;  %v7134_v19 = vld [vmem:[#allocation5 + $0xc8] sm:$0xff]  }
 0x110   : > { %6624 = vmatprep.subr.bf16.mxu0 %v7132_v42 }
 0x111   : > { %6369 = vmatmul.mubr.bf16.gmra.mrb[24].mxu1 %v9289_v17  ;;  %6593 = vmatmul.mubr.bf16.gmra.mrb[8].mxu0 %v7121_v20  ;;  %v8265_v20 = vrot.slane %v3822_v14, 4  ;;  %v3856_v43 = vor.u32 %v3855_v0, %v8233_v13  ;;  %v3847_v17 = vrot.slane %v3846_v33, 4  ;;  %v3838_v0 = vsel %vm7609_vm2, %v8267_v25, %v8255_v41  ;;  %v7131_v25 = vld [vmem:[%s7582_s11 + $0x84] sm:$0xff]  }
 0x112   : > { %6372 = vmatprep.mubr.bf16.mxu1 %v9290_v46  ;;  %6596 = vmatprep.mubr.bf16.mxu0 %v7124_v37  ;;  %v7202_v37 = vld [vmem:[%s7582_s11 + $0x80] sm:$0x1]  ;;  %v3861_v46 = vrot.slane %v3859_v29, 5  ;;  %v7203_v29 = vld [vmem:[%s7582_s11 + $0x88] sm:$0xf] }
 0x113   : > { %6625 = vmatpush3.bf16.msra.mxu0 %v7132_v42  ;;  %v1387_v14 = vrot.slane %v7202_v37, 5  ;;  %v3857_v49 = vrot.slane %v3856_v43, 4  ;;  %v1272_v37 = vld [vmem:[%s7582_s11 + $0x84] sm:$0xe]  ;;  %v3828_v33 = vsel %vm7609_vm2, %v8265_v20, %v8204_v34  ;;  %v3870_v43 = vor.u32 %v3869_v32, %v3866_v47  ;;  %v7204_v32 = vld [vmem:[%s7582_s11 + $0x8c] sm:$0x1] }
 0x114   : > { %6626 = vmatprep.subr.bf16.mxu0 %v7136_v48  ;;  %v1391_v15 = vrot.slane %v7203_v29, 5  ;;  %v3901_v34 = vshrl.u32 %v5779_v18, 16  ;;  %v3852_v41 = vsel %vm7609_vm2, %v3847_v17, %v8233_v13  ;;  %v8314_v20 = vsel %vm7796_vm5, %v5499_v51, %v1384_v4  ;;  %v8328_v4 = vld [vmem:[%s7582_s11 + $0x4c] sm:$0xf]  ;;  %v7133_v51 = vld [vmem:[%s7582_s11 + $0x90] sm:$0xff]  }
 0x115   : > { %v3880_v47 = vor.u32 %v3879_v2, %v8290_v30  ;;  %v5500_v13 = vrot.slane %v1272_v37, 9  ;;  %v8331_v17 = vrot.slane %v3870_v43, 4  ;;  %v8336_v2 = vcombine.low %v3828_v33, %v3838_v0  ;;  %v5784_v0 = vld [vmem:[%s7582_s11 + $0x54] sm:$0xf]  ;;  %v7207_v37 = vld [vmem:[%s7582_s11 + $0x98] sm:$0x1] }
 0x116   : > { %v3903_v29 = vrot.slane %v3901_v34, 4  ;;  %v3921_v43 = vshll.u32 %v8328_v4, 16  ;;  %v9293_v33 = vcombine.low %v8134_v22, %v8146_v55  ;;  %v7138_v22 = vld [vmem:[#allocation5 + $0xd0] sm:$0xff]   ;;  %v1401_v24 = vrot.slane %v7207_v37, 5 }
 0x117   : > { %6627 = vmatpush3.bf16.msra.mxu0 %v7136_v48  ;;  %v9291_v48 = vcombine.low %v7933_v31, %v7942_v9  ;;  %v9292_v31 = vcombine.low %v8113_v53, %v8117_v45  ;;  %v3888_v9 = vshrl.u32 %v5778_v11, 16  ;;  %v8318_v53 = vsel %vm7796_vm5, %v1386_v27, %v1387_v14 }
 0x118   : > { %6628 = vmatprep.subr.bf16.mxu0 %v7140_v50  ;;  %v3883_v45 = vshll.u32 %v5777_v36, 16  ;;  %v1393_v14 = vrot.slane %v1391_v15, 4  ;;  %v5780_v36 = vld [vmem:[%s7582_s11 + $0x44] sm:$0x1]  ;;  %v3912_v27 = vshrl.u32 %v5781_v26, 16  ;;  %v8360_v34 = vsel %vm7796_vm5, %v5500_v13, %v1391_v15 }
 0x119   : > { %6373 = vmatmul.mubr.bf16.gmra.mrb[28].mxu1 %v9291_v48  ;;  %6597 = vmatmul.mubr.bf16.gmra.mrb[12].mxu0 %v7127_v58  ;;  %v3891_v48 = vshll.u32 %v5778_v11, 16  ;;  %v3862_v58 = vsel %vm7609_vm2, %v3857_v49, %v3861_v46  ;;  %v3915_v11 = vshll.u32 %v5781_v26, 16  ;;  %v3890_v18 = vrot.slane %v3888_v9, 4 }
 0x11a   : > { %6392 = vmatprep.mubr.bf16.mxu1 %v9292_v31  ;;  %6600 = vmatprep.mubr.bf16.mxu0 %v7129_v16  ;;  %v1394_v16 = vrot.slane %v7204_v32, 5  ;;  %v8334_v46 = vrot.slane %v3897_v12, 5  ;;  %v1273_v31 = vld [vmem:[%s7582_s11 + $0x90] sm:$0xe]  ;;  %v3925_v32 = vshrl.u32 %v8328_v4, 16  ;;  %v8343_v26 = vcombine.low %v3852_v41, %v3862_v58 }
 0x11b   : > { %6629 = vmatpush3.bf16.msra.mxu0 %v7140_v50  ;;  %v8323_v50 = vld [vmem:[#allocation5 + $0x200] sm:$0xff]   ;;  %v3893_v49 = vrot.slane %v3891_v48, 5  ;;  %v8346_v12 = vrot.slane %v3880_v47, 4  ;;  %v8348_v9 = vrot.slane %v3883_v45, 5  ;;  %v3914_v41 = vrot.slane %v3912_v27, 4 }
 0x11c   : > { %6630 = vmatprep.subr.bf16.mxu0 %v7144_v38  ;;  %v3917_v58 = vrot.slane %v3915_v11, 5  ;;  %v8363_v45 = vld [vmem:[%s7582_s11 + $0x58] sm:$0xf]  ;;  %v9294_v47 = vor.u32 %v8091_v57, %v8089_v59  ;;  %v8373_v55 = vsel %vm7796_vm5, %v1393_v14, %v1394_v16  ;;  %v3904_v13 = vor.u32 %v3903_v29, %v8334_v46  ;;  %v8377_v27 = vld [vmem:[%s7582_s11 + $0x50] sm:$0x1] }
 0x11d   : > { %v3894_v15 = vor.u32 %v3893_v49, %v3890_v18  ;;  %v9296_v57 = vcombine.low %v8138_v6, %v8150_v56  ;;  %v3936_v11 = vshrl.u32 %v5784_v0, 16  ;;  %v3939_v16 = vshll.u32 %v5784_v0, 16  ;;  %v7205_v18 = vld [vmem:[%s7582_s11 + $0x94] sm:$0xf]  ;;  %v7135_v6 = vld [vmem:[%s7582_s11 + $0x9c] sm:$0xff]   ;;  %v7137_v56 = vld [vmem:[%s7582_s11 + $0xa8] sm:$0xff]  }
 0x11e   : > { %v5501_v14 = vrot.slane %v1273_v31, 9  ;;  %v1398_v49 = vrot.slane %v7205_v18, 5  ;;  %v3945_v29 = vshll.u32 %v8363_v45, 16  ;;  %v1274_v31 = vld [vmem:[%s7582_s11 + $0x9c] sm:$0xe]  ;;  %v8399_v18 = vrot.slane %v3904_v13, 4 }
 0x11f   : > { %6631 = vmatpush3.bf16.msra.mxu0 %v7144_v38  ;;  %v3907_v38 = vshll.u32 %v5780_v36, 16  ;;  %v8368_v36 = vrot.slane %v9294_v47, 4  ;;  %v7206_v0 = vld [vmem:[%s7582_s11 + $0xa0] sm:$0xf]  ;;  %v3931_v48 = vshll.u32 %v8377_v27, 16  ;;  %v9297_v59 = vcombine.low %v8159_v63, %v8163_v1 }
 0x120   : > { %6664 = vmatprep.subr.bf16.mxu0 %v8323_v50  ;;  %v1405_v47 = vrot.slane %v7206_v0, 5  ;;  %v7142_v0 = vld [vmem:[#allocation5 + $0xd8] sm:$0xff]   ;;  %v8412_v13 = vsel %vm7796_vm5, %v5501_v14, %v1398_v49  ;;  %v1400_v37 = vrot.slane %v1398_v49, 4  ;;  %v9299_v14 = vcombine.low %v8184_v44, %v8192_v3  ;;  %v7145_v49 = vld [vmem:[#allocation5 + $0xe0] sm:$0xff]  }
 0x121   : > { %6393 = vmatmul.mubr.bf16.vlgmr.msra.gmra.mrb[0].mxu1 %v9293_v33  ;;  %9295 = vst [vmem:[#allocation16_spill] sm:$0xff] %v8368_v36  ;;  %6601 = vmatmul.mubr.bf16.gmra.mrb[16].mxu0 %v7131_v25  ;;  %v8382_v25 = vrot.slane %v3921_v43, 5  ;;  %v3949_v33 = vshrl.u32 %v8363_v45, 16  ;;  %v8393_v43 = vrot.slane %v3907_v38, 5  ;;  %v3933_v63 = vrot.slane %v3931_v48, 5 }
 0x122   : > { %6425 = vmatpush3.bf16.msra.mxu1 %v8087_v7  ;;  %6396 = vmatprep.mubr.bf16.mxu1 %v9296_v57  ;;  %v3927_v7 = vrot.slane %v3925_v32, 4  ;;  %v3918_v32 = vor.u32 %v3917_v58, %v3914_v41  ;;  %v8397_v57 = vrot.slane %v3894_v15, 4  ;;  %v3938_v58 = vrot.slane %v3936_v11, 4  ;;  %v5787_v15 = vld [vmem:[%s7582_s11 + $0x60] sm:$0xf] }
 0x123   : > { %6604 = vmatprep.mubr.bf16.mxu0 %v7133_v51  ;;  %6426 = vmatprep.subr.bf16.mxu1 %v7134_v19  ;;  %v8414_v51 = vrot.slane %v3945_v29, 5  ;;  %v3951_v42 = vrot.slane %v3949_v33, 4  ;;  %v1407_v11 = vrot.slane %v1405_v47, 4  ;;  %v1275_v1 = vld [vmem:[%s7582_s11 + $0xa8] sm:$0xe]  ;;  %v3960_v29 = vshrl.u32 %v5787_v15, 16 }
 0x124   : > { %v3928_v41 = vor.u32 %v3927_v7, %v8382_v25  ;;  %v8419_v38 = vrot.slane %v3918_v32, 4  ;;  %v5502_v7 = vrot.slane %v1274_v31, 9  ;;  %v3963_v33 = vshll.u32 %v5787_v15, 16  ;;  %v5790_v31 = vld [vmem:[%s7582_s11 + $0x6c] sm:$0xf] }
 0x125   : > { %v3910_v44 = vsel %vm7609_vm2, %v8399_v18, %v8393_v43  ;;  %v3955_v32 = vshll.u32 %v8404_v62, 16  ;;  %v3952_v48 = vor.u32 %v3951_v42, %v8414_v51  ;;  %v8460_v42 = vld [vmem:[%s7582_s11 + $0x68] sm:$0x1] }
 0x126   : > { %6427 = vmatpush3.bf16.msra.mxu1 %v7134_v19  ;;  %v3941_v19 = vrot.slane %v3939_v16, 5  ;;  %v7208_v16 = vld [vmem:[%s7582_s11 + $0xa4] sm:$0x1]  ;;  %v3929_v3 = vrot.slane %v3928_v41, 4  ;;  %v3924_v43 = vsel %vm7609_vm2, %v8419_v38, %v8382_v25  ;;  %9300 = vst [vmem:[#allocation18_spill] sm:$0xff] %v8460_v42  ;;  %v3965_v15 = vrot.slane %v3963_v33, 5 }
 0x127   : > { %6428 = vmatprep.subr.bf16.mxu1 %v7138_v22  ;;  %v1408_v36 = vrot.slane %v7208_v16, 5  ;;  %v3987_v16 = vshll.u32 %v5790_v31, 16  ;;  %v7141_v25 = vld [vmem:[%s7582_s11 + $0xc0] sm:$0xff]  }
 0x128   : > { %v7147_v38 = vld [vmem:[#allocation5 + $0xe8] sm:$0xff]  }
 0x129   : > { %6397 = vmatmul.mubr.bf16.gmra.mrb[4].mxu1 %v9297_v59  ;;  %6605 = vmatmul.mubr.bf16.gmra.mrb[20].mxu0 %v7135_v6  ;;  %v3900_v59 = vsel %vm7609_vm2, %v8397_v57, %v8334_v46  ;;  %v3942_v6 = vor.u32 %v3941_v19, %v3938_v58  ;;  %v8441_v46 = vsel %vm7796_vm5, %v1400_v37, %v1401_v24  ;;  %v7209_v24 = vld [vmem:[%s7582_s11 + $0xac] sm:$0xf]  ;;  %v7139_v58 = vld [vmem:[%s7582_s11 + $0xb4] sm:$0xff]   ;;  %v3962_v19 = vrot.slane %v3960_v29, 4 }
 0x12a   : > { %6400 = vmatprep.mubr.bf16.mxu1 %v9299_v14  ;;  %6608 = vmatprep.mubr.bf16.mxu0 %v7137_v56  ;;  %v3973_v56 = vshrl.u32 %v8423_v35, 16  ;;  %v8452_v57 = vsel %vm7796_vm5, %v5502_v7, %v1405_v47  ;;  %v8456_v18 = vsel %vm7796_vm5, %v1407_v11, %v1408_v36  ;;  %v1412_v41 = vrot.slane %v7209_v24, 5  ;;  %v8479_v24 = vld [vmem:[%s7582_s11 + $0x70] sm:$0xf] }
 0x12b   : > { %6429 = vmatpush3.bf16.msra.mxu1 %v7138_v22  ;;  %v3969_v22 = vshll.u32 %v8423_v35, 16  ;;  %v3984_v37 = vshrl.u32 %v5790_v31, 16  ;;  %v3934_v47 = vsel %vm7609_vm2, %v3929_v3, %v3933_v63  ;;  %v8466_v36 = vrot.slane %v3942_v6, 4  ;;  %9301 = vst [vmem:[#allocation19_spill] sm:$0xff] %v8479_v24 }
 0x12c   : > { %6430 = vmatprep.subr.bf16.mxu1 %v7142_v0  ;;  %v8468_v7 = vrot.slane %v3955_v32, 5  ;;  %v5503_v11 = vrot.slane %v1275_v1, 9  ;;  %v8470_v14 = vrot.slane %v3952_v48, 4  ;;  %v3975_v33 = vrot.slane %v3973_v56, 4  ;;  %v8509_v56 = vld [vmem:[%s7582_s11 + $0x7c] sm:$0xf] }
 0x12d   : > { %v8472_v29 = vrot.slane %v3969_v22, 5  ;;  %v3979_v31 = vshll.u32 %v8460_v42, 16  ;;  %v9302_v63 = vcombine.low %v8196_v54, %v8212_v8  ;;  %v9303_v1 = vsel %vm7609_vm2, %v8346_v12, %v8348_v9  ;;  %v7210_v22 = vld [vmem:[%s7582_s11 + $0xb0] sm:$0x1]  ;;  %v8502_v8 = vld [vmem:[%s7582_s11 + $0x74] sm:$0x1] }
 0x12e   : > { %v9304_v3 = vsel %vm7609_vm2, %v8331_v17, %v8290_v30  ;;  %v8496_v32 = vcombine.low %v3900_v59, %v3910_v44  ;;  %v1415_v54 = vrot.slane %v7210_v22, 5  ;;  %9305 = vst [vmem:[#allocation20_spill] sm:$0xff] %v8502_v8  ;;  %v9306_v12 = vcombine.low %v8218_v21, %v8227_v40  ;;  %v5793_v44 = vld [vmem:[%s7582_s11 + $0x78] sm:$0xf]  ;;  %9307 = vst [vmem:[#allocation21_spill] sm:$0xff] %v8509_v56 }
 0x12f   : > { %6431 = vmatpush3.bf16.msra.mxu1 %v7142_v0  ;;  %v8476_v0 = vld [vmem:[%s7582_s11 + $0xb4] sm:$0xe]  ;;  %v8494_v6 = vcombine.low %v9304_v3, %v9303_v1  ;;  %v1414_v30 = vrot.slane %v1412_v41, 4  ;;  %v3966_v17 = vor.u32 %v3965_v15, %v3962_v19  ;;  %v3986_v9 = vrot.slane %v3984_v37, 4  ;;  %v8520_v40 = vld [vmem:[%s7582_s11 + $0xb8] sm:$0xf] }
 0x130   : > { %6432 = vmatprep.subr.bf16.mxu1 %v7145_v49  ;;  %v3989_v59 = vrot.slane %v3987_v16, 5  ;;  %v8517_v21 = vsel %vm7796_vm5, %v5503_v11, %v1412_v41  ;;  %v9264_v19 = vrot.slane %v8520_v40, 5  ;;  %v5796_v15 = vld [vmem:[%s7582_s11 + $0x84] sm:$0xf]  ;;  %v7143_v37 = vld [vmem:[%s7582_s11 + $0xcc] sm:$0xff]   ;;  %v3976_v41 = vor.u32 %v3975_v33, %v8472_v29 }
 0x131   : > { %6401 = vmatmul.mubr.bf16.gmra.mrb[8].mxu1 %v9302_v63  ;;  %6609 = vmatmul.mubr.bf16.gmra.mrb[24].mxu0 %v7139_v58  ;;  %v8511_v63 = vcombine.low %v3924_v43, %v3934_v47  ;;  %v7149_v16 = vld [vmem:[#allocation5 + $0xf0] sm:$0xff]   ;;  %v3958_v43 = vsel %vm7609_vm2, %v8470_v14, %v8468_v7  ;;  %v5504_v11 = vrot.slane %v8476_v0, 9  ;;  %v8541_v1 = vld [vmem:[%s7582_s11 + $0xbc] sm:$0x1]  ;;  %v8548_v7 = vsel %vm7796_vm5, %v1414_v30, %v1415_v54  ;;  %v7151_v33 = vld [vmem:[#allocation5 + $0xf8] sm:$0xff]  }
 0x132   : > { %6404 = vmatprep.mubr.bf16.mxu1 %v9306_v12  ;;  %6612 = vmatprep.mubr.bf16.mxu0 %v7141_v25  ;;  %v8534_v25 = vrot.slane %v3979_v31, 5  ;;  %v8537_v47 = vld [vmem:[%s7582_s11 + $0x88] sm:$0xf]  ;;  %v8550_v14 = vrot.slane %v3966_v17, 4  ;;  %v3990_v31 = vor.u32 %v3989_v59, %v3986_v9  ;;  %v4003_v22 = vshll.u32 %v8502_v8, 16 }
 0x133   : > { %6433 = vmatpush3.bf16.msra.mxu1 %v7145_v49  ;;  %v3948_v49 = vsel %vm7609_vm2, %v8466_v36, %v8414_v51  ;;  %9308 = vst [vmem:[#allocation22_spill] sm:$0xff] %v8537_v47  ;;  %v3993_v51 = vshll.u32 %v8479_v24, 16  ;;  %v3997_v36 = vshrl.u32 %v8479_v24, 16  ;;  %v5799_v0 = vld [vmem:[%s7582_s11 + $0x90] sm:$0xf]  ;;  %v1421_v12 = vrot.slane %v9264_v19, 4 }
 0x134   : > { %6434 = vmatprep.subr.bf16.mxu1 %v7147_v38  ;;  %v4008_v58 = vshrl.u32 %v5793_v44, 16  ;;  %v4011_v48 = vshll.u32 %v5793_v44, 16  ;;  %v4017_v3 = vshll.u32 %v8509_v56, 16  ;;  %v8558_v24 = vld [vmem:[%s7582_s11 + $0x94] sm:$0xf]  ;;  %v8560_v54 = vrot.slane %v3976_v41, 4 }
 0x135   : > { %9309 = vst [vmem:[#allocation23_spill] sm:$0xff] %v8558_v24  ;;  %v4021_v30 = vshrl.u32 %v8509_v56, 16  ;;  %v4032_v17 = vshrl.u32 %v5796_v15, 16  ;;  %v4035_v9 = vshll.u32 %v5796_v15, 16  ;;  %v8566_v59 = vrot.slane %v3993_v51, 5 }
 0x136   : > { %v3999_v19 = vrot.slane %v3997_v36, 4  ;;  %v4041_v44 = vshll.u32 %v8537_v47, 16  ;;  %v4045_v8 = vshrl.u32 %v8537_v47, 16  ;;  %v9311_v41 = vcombine.low %v8253_v52, %v8244_v23  ;;  %v5802_v52 = vld [vmem:[%s7582_s11 + $0x9c] sm:$0xf] }
 0x137   : > { %6435 = vmatpush3.bf16.msra.mxu1 %v7147_v38  ;;  %v9310_v38 = vcombine.low %v8231_v5, %v8240_v28  ;;  %v8573_v56 = vrot.slane %v3990_v31, 4  ;;  %v8575_v15 = vrot.slane %v4003_v22, 5  ;;  %v8578_v5 = vld [vmem:[%s7582_s11 + $0x80] sm:$0x1]  ;;  %v4056_v28 = vshrl.u32 %v5799_v0, 16 }
 0x138   : > { %6436 = vmatprep.subr.bf16.mxu1 %v7149_v16  ;;  %v4059_v51 = vshll.u32 %v5799_v0, 16  ;;  %v4010_v36 = vrot.slane %v4008_v58, 4  ;;  %v4065_v23 = vshll.u32 %v8558_v24, 16  ;;  %v4023_v31 = vrot.slane %v4021_v30, 4  ;;  %v8590_v0 = vld [vmem:[%s7582_s11 + $0xa0] sm:$0xf] }
 0x139   : > { %6405 = vmatmul.mubr.bf16.gmra.mrb[12].mxu1 %v9310_v38  ;;  %6613 = vmatmul.mubr.bf16.gmra.mrb[28].mxu0 %v7143_v37  ;;  %v4013_v38 = vrot.slane %v4011_v48, 5  ;;  %v8581_v37 = vrot.slane %v4017_v3, 5  ;;  %v4034_v22 = vrot.slane %v4032_v17, 4  ;;  %v4037_v47 = vrot.slane %v4035_v9, 5  ;;  %9312 = vst [vmem:[#allocation24_spill] sm:$0xff] %v8590_v0  ;;  %v8613_v3 = vld [vmem:[#allocation5 + $0x100] sm:$0xff]  }
 0x13a   : > { %6408 = vmatprep.mubr.bf16.mxu1 %v9311_v41  ;;  %6632 = vmatprep.mubr.bf16.mxu0 %v8336_v2  ;;  %v8586_v41 = vld [vmem:[%s7582_s11 + $0x8c] sm:$0x1]  ;;  %v4069_v42 = vshrl.u32 %v8558_v24, 16  ;;  %v8592_v2 = vcombine.low %v3948_v49, %v3958_v43  ;;  %v4000_v48 = vor.u32 %v3999_v19, %v8566_v59  ;;  %v8595_v58 = vrot.slane %v4041_v44, 5  ;;  %v7148_v49 = vld [vmem:[#allocation5 + $0x208] sm:$0xff]  }
 0x13b   : > { %6437 = vmatpush3.bf16.msra.mxu1 %v7149_v16  ;;  %v4047_v16 = vrot.slane %v4045_v8, 4  ;;  %v9313_v30 = vrot.slane %v8520_v40, 5  ;;  %v4058_v9 = vrot.slane %v4056_v28, 4  ;;  %v4061_v24 = vrot.slane %v4059_v51, 5  ;;  %v8609_v8 = vld [vmem:[%s7582_s11 + $0x98] sm:$0x1] }
 0x13c   : > { %6438 = vmatprep.subr.bf16.mxu1 %v7151_v33  ;;  %v4014_v43 = vor.u32 %v4013_v38, %v4010_v36  ;;  %v4027_v19 = vshll.u32 %v8578_v5, 16  ;;  %v8611_v44 = vrot.slane %v4065_v23, 5  ;;  %v4080_v35 = vshrl.u32 %v5802_v52, 16 }
 0x13d   : > { %v8605_v17 = vsel %vm7796_vm5, %v5504_v11, %v9313_v30  ;;  %v4071_v40 = vrot.slane %v4069_v42, 4  ;;  %v4083_v11 = vshll.u32 %v5802_v52, 16  ;;  %v4089_v28 = vshll.u32 %v8590_v0, 16  ;;  %v8632_v30 = vld [vmem:[%s7582_s11 + $0xa4] sm:$0x1] }
 0x13e   : > { %v9314_v51 = vcombine.low %v8259_v61, %v8263_v60  ;;  %v9315_v36 = vrot.slane %v8541_v1, 5  ;;  %v8627_v23 = vrot.slane %v4000_v48, 4  ;;  %v4024_v42 = vor.u32 %v4023_v31, %v8581_v37 }
 0x13f   : > { %6439 = vmatpush3.bf16.msra.mxu1 %v7151_v33  ;;  %v4093_v33 = vshrl.u32 %v8590_v0, 16  ;;  %v4051_v52 = vshll.u32 %v8586_v41, 16  ;;  %v9316_v61 = vcombine.low %v8314_v20, %v8318_v53  ;;  %v4038_v60 = vor.u32 %v4037_v47, %v4034_v22  ;;  %v8648_v0 = vld [vmem:[%s7582_s11 + $0xac] sm:$0xf] }
 0x140   : > { %6712 = vmatprep.subr.bf16.mxu1 %v8613_v3  ;;  %v8625_v38 = vsel %vm7796_vm5, %v1421_v12, %v9315_v36  ;;  %v4048_v1 = vor.u32 %v4047_v16, %v8595_v58  ;;  %v4062_v12 = vor.u32 %v4061_v24, %v4058_v9  ;;  %v8642_v31 = vrot.slane %v4014_v43, 4  ;;  %v7150_v20 = vld [vmem:[#allocation5 + $0x210] sm:$0xff]  }
 0x141   : > { %6409 = vmatmul.mubr.bf16.gmra.mrb[16].mxu1 %v9314_v51  ;;  %6633 = vmatmul.mubr.bf16.vlgmr.msra.gmra.mrb[0].mxu0 %v8343_v26  ;;  %v5805_v51 = vld [vmem:[%s7582_s11 + $0xa8] sm:$0xf]  ;;  %v8644_v48 = vrot.slane %v4027_v19, 5  ;;  %v4075_v36 = vshll.u32 %v8609_v8, 16  ;;  %v4082_v26 = vrot.slane %v4080_v35, 4  ;;  %v4072_v53 = vor.u32 %v4071_v40, %v8611_v44 }
 0x142   : > { %6412 = vmatprep.mubr.bf16.mxu1 %v9316_v61  ;;  %6665 = vmatpush3.bf16.msra.mxu0 %v8323_v50  ;;  %v4085_v47 = vrot.slane %v4083_v11, 5  ;;  %v8651_v24 = vrot.slane %v4089_v28, 5  ;;  %v4095_v22 = vrot.slane %v4093_v33, 4  ;;  %v4025_v50 = vrot.slane %v4024_v42, 4  ;;  %v7152_v42 = vld [vmem:[#allocation5 + $0x218] sm:$0xff]  }
 0x143   : > { %6636 = vmatprep.mubr.bf16.mxu0 %v8494_v6  ;;  %6666 = vmatprep.subr.bf16.mxu0 %v7148_v49  ;;  %v4053_v16 = vrot.slane %v4051_v52, 5  ;;  %v4104_v6 = vshrl.u32 %v5805_v51, 16  ;;  %v4107_v9 = vshll.u32 %v5805_v51, 16  ;;  %v4039_v43 = vrot.slane %v4038_v60, 4 }
 0x144   : > { %v4049_v19 = vrot.slane %v4048_v1, 4  ;;  %v4063_v61 = vrot.slane %v4062_v12, 4  ;;  %v4099_v35 = vshll.u32 %v8632_v30, 16  ;;  %v3982_v40 = vsel %vm7609_vm2, %v8560_v54, %v8534_v25 }
 0x145   : > { %v3996_v11 = vsel %vm7609_vm2, %v8573_v56, %v8566_v59  ;;  %v4113_v28 = vshll.u32 %v8648_v0, 16  ;;  %v4117_v33 = vshrl.u32 %v8648_v0, 16  ;;  %v4073_v52 = vrot.slane %v4072_v53, 4  ;;  %v8677_v59 = vld [vmem:[%s7582_s11 + $0xb0] sm:$0x1] }
 0x146   : > { %6667 = vmatpush3.bf16.msra.mxu0 %v7148_v49  ;;  %v4077_v49 = vrot.slane %v4075_v36, 5  ;;  %v4086_v60 = vor.u32 %v4085_v47, %v4082_v26  ;;  %v4096_v1 = vor.u32 %v4095_v22, %v8651_v24  ;;  %v9317_v25 = vcombine.low %v8360_v34, %v8373_v55 }
 0x147   : > { %6668 = vmatprep.subr.bf16.mxu0 %v7150_v20  ;;  %v4006_v56 = vsel %vm7609_vm2, %v8627_v23, %v8575_v15  ;;  %v4020_v54 = vsel %vm7609_vm2, %v8642_v31, %v8581_v37  ;;  %v4106_v12 = vrot.slane %v4104_v6, 4  ;;  %v4109_v51 = vrot.slane %v4107_v9, 5  ;;  %v5808_v23 = vld [vmem:[%s7582_s11 + $0xb4] sm:$0xf]  ;;  %v8693_v31 = vld [vmem:[%s7582_s11 + $0xb8] sm:$0xf] }
 0x148   : > { %v9318_v34 = vcombine.low %v8412_v13, %v8441_v46  ;;  %v4030_v55 = vsel %vm7609_vm2, %v4025_v50, %v8644_v48  ;;  %v4044_v15 = vsel %vm7609_vm2, %v4039_v43, %v8595_v58  ;;  %v4054_v37 = vsel %vm7609_vm2, %v4049_v19, %v4053_v16  ;;  %v7155_v58 = vld [vmem:[#allocation5 + $0x220] sm:$0xff]   ;;  %v5845_v19 = vld [vmem:[%s7582_s11 + $0x48] sm:$0xe] }
 0x149   : > { %6413 = vmatmul.mubr.bf16.gmra.mrb[20].mxu1 %v9317_v25  ;;  %6637 = vmatmul.mubr.bf16.gmra.mrb[4].mxu0 %v8496_v32  ;;  %v4068_v13 = vsel %vm7609_vm2, %v4063_v61, %v8611_v44  ;;  %v8699_v46 = vrot.slane %v4099_v35, 5  ;;  %v8701_v32 = vrot.slane %v4113_v28, 5  ;;  %v4119_v48 = vrot.slane %v4117_v33, 4  ;;  %v8742_v33 = vld [vmem:[%s7582_s11 + $0xbc] sm:$0x1] }
 0x14a   : > { %6416 = vmatprep.mubr.bf16.mxu1 %v9318_v34  ;;  %6640 = vmatprep.mubr.bf16.mxu0 %v8511_v63  ;;  %v4078_v36 = vsel %vm7609_vm2, %v4073_v52, %v4077_v49  ;;  %v8705_v26 = vrot.slane %v4086_v60, 4  ;;  %v8707_v53 = vrot.slane %v4096_v1, 4  ;;  %v4123_v63 = vshll.u32 %v8677_v59, 16  ;;  %v5847_v25 = vld [vmem:[%s7582_s11 + $0x60] sm:$0xe] }
 0x14b   : > { %6669 = vmatpush3.bf16.msra.mxu0 %v7150_v20  ;;  %v5519_v44 = vcombine.low %v8517_v21, %v8548_v7  ;;  %v4110_v20 = vor.u32 %v4109_v51, %v4106_v12  ;;  %v4128_v47 = vshrl.u32 %v5808_v23, 16  ;;  %v4131_v22 = vshll.u32 %v5808_v23, 16 }
 0x14c   : > { %6670 = vmatprep.subr.bf16.mxu0 %v7152_v42  ;;  %v9319_v50 = vsel %vm7609_vm2, %v8550_v14, %v8472_v29  ;;  %v5520_v6 = vcombine.low %v8605_v17, %v8625_v38  ;;  %v8719_v9 = vcombine.low %v3996_v11, %v4006_v56  ;;  %v4137_v43 = vshll.u32 %v8693_v31, 16  ;;  %v5846_v14 = vld [vmem:[%s7582_s11 + $0x54] sm:$0xe]  ;;  %v7158_v11 = vld [vmem:[#allocation5 + $0x228] sm:$0xff]  }
 0x14d   : > { %v5823_v16 = vcombine.low %v9319_v50, %v3982_v40  ;;  %v8723_v21 = vcombine.low %v4020_v54, %v4030_v55  ;;  %v8725_v7 = vcombine.low %v4044_v15, %v4054_v37  ;;  %v8727_v61 = vcombine.low %v4068_v13, %v4078_v36  ;;  %v5848_v55 = vld [vmem:[%s7582_s11 + $0x6c] sm:$0xe] }
 0x14e   : > { %v4120_v29 = vor.u32 %v4119_v48, %v8701_v32  ;;  %v4092_v35 = vsel %vm7609_vm2, %v8705_v26, %v8651_v24  ;;  %v4102_v40 = vsel %vm7609_vm2, %v8707_v53, %v8699_v46  ;;  %v8739_v28 = vrot.slane %v4123_v63, 5  ;;  %v9321_v48 = vld [vmem:[#allocation17_spill] sm:$0xff]  ;;  %v5811_v26 = vld [vmem:[%s7582_s11 + $0xc0] sm:$0xf] }
 0x14f   : > { %6671 = vmatpush3.bf16.msra.mxu0 %v7152_v42  ;;  %v4141_v42 = vshrl.u32 %v8693_v31, 16  ;;  %v9320_v52 = vcombine.low %v8452_v57, %v8456_v18  ;;  %v8748_v49 = vrot.slane %v4110_v20, 4  ;;  %v8750_v60 = vrot.slane %v4128_v47, 4  ;;  %v7153_v36 = vld [vmem:[%s7582_s11 + $0xc] sm:$0xff]  }
 0x150   : > { %6672 = vmatprep.subr.bf16.mxu0 %v7155_v58  ;;  %v8752_v24 = vrot.slane %v4131_v22, 5  ;;  %v5861_v1 = vrot.slane %v5845_v19, 9  ;;  %v8756_v56 = vrot.slane %v4137_v43, 5  ;;  %v4614_v54 = vrot.slane %v8328_v4, 5  ;;  %v7161_v4 = vld [vmem:[#allocation5 + $0x230] sm:$0xff]  }
 0x151   : > { %6417 = vmatmul.mubr.bf16.gmra.mrb[24].mxu1 %v9320_v52  ;;  %6641 = vmatmul.mubr.bf16.gmra.mrb[8].mxu0 %v8592_v2  ;;  %v4617_v12 = vrot.slane %v8377_v27, 5  ;;  %v5862_v57 = vrot.slane %v5846_v14, 9  ;;  %v8760_v18 = vrot.slane %v4120_v29, 4  ;;  %v4147_v51 = vshll.u32 %v8742_v33, 16  ;;  %v9324_v47 = vld [vmem:[#allocation20_spill] sm:$0xff] }
 0x152   : > { %6420 = vmatprep.mubr.bf16.mxu1 %v5519_v44  ;;  %6644 = vmatprep.mubr.bf16.mxu0 %v5823_v16  ;;  %v4621_v34 = vrot.slane %v8363_v45, 5  ;;  %v4624_v2 = vrot.slane %v8404_v62, 5  ;;  %v8766_v15 = vrot.slane %v4141_v42, 4  ;;  %v8770_v27 = vsel %vm7796_vm5, %v5861_v1, %v4614_v54  ;;  %v9322_v62 = vld [vmem:[#allocation18_spill] sm:$0xff]  ;;  %v9323_v44 = vld [vmem:[#allocation19_spill] sm:$0xff]  ;;  %v7164_v42 = vld [vmem:[#allocation5 + $0x238] sm:$0xff]  }
 0x153   : > { %6673 = vmatpush3.bf16.msra.mxu0 %v7155_v58  ;;  %v4616_v37 = vrot.slane %v4614_v54, 4  ;;  %v5863_v23 = vrot.slane %v5847_v25, 9  ;;  %v4628_v45 = vrot.slane %v9321_v48, 5  ;;  %v4631_v58 = vrot.slane %v9322_v62, 5  ;;  %v8799_v14 = vld [vmem:[%s7582_s11 + $0xc4] sm:$0xf] }
 0x154   : > { %6674 = vmatprep.subr.bf16.mxu0 %v7158_v11  ;;  %v8774_v13 = vsel %vm7796_vm5, %v5862_v57, %v4621_v34  ;;  %v4623_v46 = vrot.slane %v4621_v34, 4  ;;  %v5864_v63 = vrot.slane %v5848_v55, 9  ;;  %v4635_v20 = vrot.slane %v9323_v44, 5  ;;  %v9326_v62 = vld [vmem:[#allocation15_spill] sm:$0xff] }
 0x155   : > { %v8782_v53 = vsel %vm7796_vm5, %v4616_v37, %v4617_v12  ;;  %v4638_v22 = vrot.slane %v9324_v47, 5  ;;  %v8794_v43 = vsel %vm7796_vm5, %v5863_v23, %v4628_v45  ;;  %v4630_v19 = vrot.slane %v4628_v45, 4  ;;  %v5849_v12 = vld [vmem:[%s7582_s11 + $0x78] sm:$0xe] }
 0x156   : > { %v5877_v50 = vcombine.low %v8770_v27, %v8782_v53  ;;  %v8790_v16 = vsel %vm7796_vm5, %v4623_v46, %v4624_v2  ;;  %v8796_v29 = vcombine.low %v4092_v35, %v4102_v40  ;;  %v8805_v52 = vsel %vm7796_vm5, %v5864_v63, %v4635_v20  ;;  %v9325_v2 = vld [vmem:[#allocation21_spill] sm:$0xff]  ;;  %v7156_v63 = vld [vmem:[%s7582_s11 + $0x24] sm:$0xff]  }
 0x157   : > { %6675 = vmatpush3.bf16.msra.mxu0 %v7158_v11  ;;  %v5878_v11 = vcombine.low %v8774_v13, %v8790_v16  ;;  %v4637_v1 = vrot.slane %v4635_v20, 4  ;;  %v4116_v35 = vsel %vm7609_vm2, %v8748_v49, %v8701_v32  ;;  %v4152_v40 = vshrl.u32 %v5811_v26, 16  ;;  %v5612_v49 = vld [vmem:[%s7582_s11 + $0x78] sm:$0xf]  ;;  %v5814_v46 = vld [vmem:[%s7582_s11 + $0xcc] sm:$0xf] }
 0x158   : > { %6676 = vmatprep.subr.bf16.mxu0 %v7161_v4  ;;  %v4155_v25 = vshll.u32 %v5811_v26, 16  ;;  %v8816_v54 = vsel %vm7796_vm5, %v4630_v19, %v4631_v58  ;;  %v4134_v17 = vor.u32 %v8752_v24, %v8750_v60  ;;  %v8822_v38 = vrot.slane %v4147_v51, 5  ;;  %v5850_v51 = vld [vmem:[%s7582_s11 + $0x84] sm:$0xe]  ;;  %v8861_v20 = vld [vmem:[%s7582_s11 + $0xd0] sm:$0xf] }
 0x159   : > { %6421 = vmatmul.mubr.bf16.gmra.mrb[28].mxu1 %v5520_v6  ;;  %6645 = vmatmul.mubr.bf16.gmra.mrb[12].mxu0 %v8719_v9  ;;  %v5879_v32 = vcombine.low %v8794_v43, %v8816_v54  ;;  %v8828_v6 = vsel %vm7796_vm5, %v4637_v1, %v4638_v22  ;;  %v4126_v9 = vsel %vm7609_vm2, %v8760_v18, %v8739_v28  ;;  %v4161_v24 = vshll.u32 %v8799_v14, 16  ;;  %v7154_v18 = vld [vmem:[%s7582_s11 + $0x18] sm:$0xff]   ;;  %v9327_v58 = vld [vmem:[#allocation16_spill] sm:$0xff] }
 0x15a   : > { %6440 = vmatprep.mubr.bf16.mxu1 %v7153_v36  ;;  %6648 = vmatprep.mubr.bf16.mxu0 %v8723_v21  ;;  %v4144_v60 = vor.u32 %v8766_v15, %v8756_v56  ;;  %v5880_v57 = vcombine.low %v8805_v52, %v8828_v6  ;;  %v4165_v34 = vshrl.u32 %v8799_v14, 16  ;;  %v5865_v21 = vrot.slane %v5849_v12, 9  ;;  %v8864_v19 = vld [vmem:[%s7582_s11 + $0xc8] sm:$0x1]  ;;  %v7235_v43 = vld [vmem:[%s7582_s11 + $0x98] sm:$0x1] }
 0x15b   : > { %6677 = vmatpush3.bf16.msra.mxu0 %v7161_v4  ;;  %v4642_v55 = vrot.slane %v9325_v2, 5  ;;  %v4645_v28 = vrot.slane %v8578_v5, 5  ;;  %v4154_v37 = vrot.slane %v4152_v40, 4  ;;  %v4157_v15 = vrot.slane %v4155_v25, 5  ;;  %v9328_v25 = vld [vmem:[#allocation22_spill] sm:$0xff] }
 0x15c   : > { %6678 = vmatprep.subr.bf16.mxu0 %v7164_v42  ;;  %v2396_v4 = vshrl.u32 %v5612_v49, 16  ;;  %v2399_v23 = vshll.u32 %v5612_v49, 16  ;;  %v2418_v36 = vsel %vm7609_vm2, %v9327_v58, %v9326_v62  ;;  %v5866_v26 = vrot.slane %v5850_v51, 9  ;;  %v5851_v51 = vld [vmem:[%s7582_s11 + $0x90] sm:$0xe]  ;;  %v9330_v62 = vld [vmem:[#allocation14_spill] sm:$0xff] }
 0x15d   : > { %v8849_v48 = vsel %vm7796_vm5, %v5865_v21, %v4642_v55  ;;  %v4644_v45 = vrot.slane %v4642_v55, 4  ;;  %v8856_v5 = vcombine.low %v4116_v35, %v4126_v9  ;;  %v8858_v44 = vrot.slane %v4161_v24, 5 }
 0x15e   : > { %v2398_v47 = vrot.slane %v2396_v4, 4  ;;  %v2401_v22 = vrot.slane %v2399_v23, 5  ;;  %v4167_v1 = vrot.slane %v4165_v34, 4  ;;  %v4649_v12 = vrot.slane %v9328_v25, 5  ;;  %v9329_v23 = vld [vmem:[#allocation23_spill] sm:$0xff] }
 0x15f   : > { %6679 = vmatpush3.bf16.msra.mxu0 %v7164_v42  ;;  %v8868_v40 = vsel %vm7796_vm5, %v4644_v45, %v4645_v28  ;;  %v4652_v35 = vrot.slane %v8586_v41, 5  ;;  %v4158_v49 = vor.u32 %v4157_v15, %v4154_v37  ;;  %v4176_v9 = vshrl.u32 %v5814_v46, 16  ;;  %v7157_v45 = vld [vmem:[%s7582_s11 + $0x30] sm:$0xff]  }
 0x160   : > { %v5881_v24 = vcombine.low %v8849_v48, %v8868_v40  ;;  %v2402_v42 = vor.u32 %v2401_v22, %v2398_v47  ;;  %v4179_v34 = vshll.u32 %v5814_v46, 16  ;;  %v4185_v21 = vshll.u32 %v8861_v20, 16 }
 0x161   : > { %6441 = vmatmul.mubr.bf16.vlgmr.msra.gmra.mrb[0].mxu1 %v7154_v18  ;;  %6649 = vmatmul.mubr.bf16.gmra.mrb[16].mxu0 %v8725_v7  ;;  %v8880_v2 = vsel %vm7796_vm5, %v5866_v26, %v4649_v12  ;;  %v4651_v41 = vrot.slane %v4649_v12, 4  ;;  %v4135_v55 = vrot.slane %v4134_v17, 4  ;;  %v4171_v28 = vshll.u32 %v8864_v19, 16  ;;  %v7215_v12 = vld [vmem:[#allocation5 + $0x110] sm:$0xff]  }
 0x162   : > { %6720 = vmatpush3.bf16.msra.mxu1 %v8613_v3  ;;  %6444 = vmatprep.mubr.bf16.mxu1 %v7156_v63  ;;  %v4189_v7 = vshrl.u32 %v8861_v20, 16  ;;  %v2403_v18 = vrot.slane %v2402_v42, 4  ;;  %v7214_v3 = vld [vmem:[#allocation5 + $0x108] sm:$0xff]   ;;  %v4168_v37 = vor.u32 %v4167_v1, %v8858_v44  ;;  %v5867_v4 = vrot.slane %v5851_v51, 9 }
 0x163   : > { %6652 = vmatprep.mubr.bf16.mxu0 %v8727_v61  ;;  %6713 = vmatprep.subr.bf16.mxu1 %v7214_v3  ;;  %v8888_v15 = vsel %vm7796_vm5, %v4651_v41, %v4652_v35  ;;  %v4656_v46 = vrot.slane %v9329_v23, 5  ;;  %v4145_v61 = vrot.slane %v4144_v60, 4  ;;  %v4159_v17 = vrot.slane %v4158_v49, 4  ;;  %v7159_v63 = vld [vmem:[%s7582_s11 + $0x3c] sm:$0xff]   ;;  %v9331_v23 = vld [vmem:[#allocation24_spill] sm:$0xff] }
 0x164   : > { %v2408_v58 = vsel %vm7609_vm2, %v2403_v18, %v9330_v62  ;;  %v5882_v26 = vcombine.low %v8880_v2, %v8888_v15  ;;  %v4178_v47 = vrot.slane %v4176_v9, 4  ;;  %v4181_v22 = vrot.slane %v4179_v34, 5  ;;  %v8908_v18 = vld [vmem:[%s7582_s11 + $0xd4] sm:$0x1]  ;;  %v5852_v9 = vld [vmem:[%s7582_s11 + $0x9c] sm:$0xe] }
 0x165   : > { %v8898_v1 = vrot.slane %v4185_v21, 5  ;;  %v8900_v25 = vcombine.low %v2408_v58, %v2418_v36  ;;  %v4191_v60 = vrot.slane %v4189_v7, 4  ;;  %v8904_v35 = vsel %vm7796_vm5, %v5867_v4, %v4656_v46  ;;  %v5841_v7 = vld [vmem:[%s7582_s11 + $0x18] sm:$0xe] }
 0x166   : > { %6721 = vmatpush3.bf16.msra.mxu1 %v7214_v3  ;;  %v4658_v49 = vrot.slane %v4656_v46, 4  ;;  %v4659_v42 = vrot.slane %v8609_v8, 5  ;;  %v4169_v51 = vrot.slane %v4168_v37, 4  ;;  %v4173_v41 = vrot.slane %v4171_v28, 5  ;;  %v7216_v37 = vld [vmem:[#allocation5 + $0x118] sm:$0xff]  }
 0x167   : > { %6714 = vmatprep.subr.bf16.mxu1 %v7215_v12  ;;  %v4140_v36 = vsel %vm7609_vm2, %v4135_v55, %v8756_v56  ;;  %v4150_v8 = vsel %vm7609_vm2, %v4145_v61, %v8822_v38  ;;  %v4164_v21 = vsel %vm7609_vm2, %v4159_v17, %v8858_v44  ;;  %v4182_v55 = vor.u32 %v4181_v22, %v4178_v47  ;;  %v7217_v44 = vld [vmem:[%s7582_s11 + $0x1c] sm:$0xf]  ;;  %v7162_v17 = vld [vmem:[%s7582_s11 + $0x54] sm:$0xff]  }
 0x168   : > { %v8916_v34 = vsel %vm7796_vm5, %v4658_v49, %v4659_v42  ;;  %v4195_v28 = vshll.u32 %v8908_v18, 16  ;;  %v5868_v3 = vrot.slane %v5852_v9, 9  ;;  %v4174_v38 = vsel %vm7609_vm2, %v4169_v51, %v4173_v41  ;;  %v5853_v49 = vld [vmem:[%s7582_s11 + $0xa8] sm:$0xe]  ;;  %v7218_v51 = vld [vmem:[%s7582_s11 + $0x20] sm:$0x1] }
 0x169   : > { %6445 = vmatmul.mubr.bf16.gmra.mrb[4].mxu1 %v7157_v45  ;;  %6653 = vmatmul.mubr.bf16.gmra.mrb[20].mxu0 %v8796_v29  ;;  %v5883_v56 = vcombine.low %v8904_v35, %v8916_v34  ;;  %v4192_v29 = vor.u32 %v4191_v60, %v8898_v1  ;;  %v4586_v4 = vrot.slane %v7217_v44, 5  ;;  %v4666_v46 = vrot.slane %v8632_v30, 5  ;;  %v7160_v45 = vld [vmem:[%s7582_s11 + $0x48] sm:$0xff]   ;;  %v7219_v30 = vld [vmem:[#allocation5 + $0x120] sm:$0xff]  }
 0x16a   : > { %6448 = vmatprep.mubr.bf16.mxu1 %v7159_v63  ;;  %6656 = vmatprep.mubr.bf16.mxu0 %v8856_v5  ;;  %v4663_v5 = vrot.slane %v9331_v23, 5  ;;  %v5830_v61 = vcombine.low %v4140_v36, %v4150_v8  ;;  %v5857_v62 = vrot.slane %v5841_v7, 9  ;;  %v5831_v47 = vcombine.low %v4164_v21, %v4174_v38  ;;  %v7220_v8 = vld [vmem:[%s7582_s11 + $0x28] sm:$0xf]  ;;  %v5842_v38 = vld [vmem:[%s7582_s11 + $0x24] sm:$0xe] }
 0x16b   : > { %6722 = vmatpush3.bf16.msra.mxu1 %v7215_v12  ;;  %v4183_v22 = vrot.slane %v4182_v55, 4  ;;  %v4193_v12 = vrot.slane %v4192_v29, 4  ;;  %v4197_v60 = vrot.slane %v4195_v28, 5  ;;  %v4588_v42 = vrot.slane %v4586_v4, 4  ;;  %v7221_v44 = vld [vmem:[%s7582_s11 + $0x34] sm:$0xf] }
 0x16c   : > { %6715 = vmatprep.subr.bf16.mxu1 %v7216_v37  ;;  %v8940_v58 = vsel %vm7796_vm5, %v5868_v3, %v4663_v5  ;;  %v4665_v63 = vrot.slane %v4663_v5, 4  ;;  %v4589_v41 = vrot.slane %v7218_v51, 5  ;;  %v4593_v21 = vrot.slane %v7220_v8, 5  ;;  %v7222_v5 = vld [vmem:[#allocation5 + $0x128] sm:$0xff]  }
 0x16d   : > { %v5869_v55 = vrot.slane %v5853_v49, 9  ;;  %v4670_v29 = vrot.slane %v8648_v0, 5  ;;  %v4188_v28 = vsel %vm7609_vm2, %v4183_v22, %v8898_v1  ;;  %v4198_v7 = vsel %vm7609_vm2, %v4193_v12, %v4197_v60  ;;  %v7223_v12 = vld [vmem:[%s7582_s11 + $0x2c] sm:$0x1] }
 0x16e   : > { %v8946_v9 = vsel %vm7796_vm5, %v4665_v63, %v4666_v46  ;;  %v4587_v3 = vsel %vm7796_vm5, %v5857_v62, %v4586_v4  ;;  %v4590_v0 = vsel %vm7796_vm5, %v4588_v42, %v4589_v41  ;;  %v4600_v23 = vrot.slane %v7221_v44, 5  ;;  %v7163_v4 = vld [vmem:[%s7582_s11 + $0x60] sm:$0xff]   ;;  %v7165_v62 = vld [vmem:[%s7582_s11 + $0x6c] sm:$0xff]  }
 0x16f   : > { %6723 = vmatpush3.bf16.msra.mxu1 %v7216_v37  ;;  %v5884_v36 = vcombine.low %v8940_v58, %v8946_v9  ;;  %v4673_v37 = vrot.slane %v8677_v59, 5  ;;  %v8966_v1 = vsel %vm7796_vm5, %v5869_v55, %v4670_v29  ;;  %v4672_v46 = vrot.slane %v4670_v29, 4  ;;  %v7225_v55 = vld [vmem:[#allocation5 + $0x130] sm:$0xff]  }
 0x170   : > { %6716 = vmatprep.subr.bf16.mxu1 %v7219_v30  ;;  %v5858_v59 = vrot.slane %v5842_v38, 9  ;;  %v4595_v63 = vrot.slane %v4593_v21, 4  ;;  %v5873_v22 = vcombine.low %v4587_v3, %v4590_v0  ;;  %v4596_v60 = vrot.slane %v7223_v12, 5  ;;  %v7226_v0 = vld [vmem:[%s7582_s11 + $0x40] sm:$0xf] }
 0x171   : > { %6449 = vmatmul.mubr.bf16.gmra.mrb[8].mxu1 %v7160_v45  ;;  %6657 = vmatmul.mubr.bf16.gmra.mrb[24].mxu0 %v5830_v61  ;;  %v5854_v45 = vld [vmem:[%s7582_s11 + $0xb4] sm:$0xe]  ;;  %v5843_v61 = vld [vmem:[%s7582_s11 + $0x30] sm:$0xe]  ;;  %v4602_v41 = vrot.slane %v4600_v23, 4  ;;  %v4677_v29 = vrot.slane %v8693_v31, 5 }
 0x172   : > { %6452 = vmatprep.mubr.bf16.mxu1 %v7162_v17  ;;  %6660 = vmatprep.mubr.bf16.mxu0 %v5831_v47  ;;  %v5832_v17 = vcombine.low %v4188_v28, %v4198_v7  ;;  %v8974_v47 = vsel %vm7796_vm5, %v4672_v46, %v4673_v37  ;;  %v5870_v42 = vrot.slane %v5854_v45, 9  ;;  %v5859_v51 = vrot.slane %v5843_v61, 9  ;;  %v5844_v37 = vld [vmem:[%s7582_s11 + $0x3c] sm:$0xe]  ;;  %v5855_v44 = vld [vmem:[%s7582_s11 + $0xc0] sm:$0xe] }
 0x173   : > { %6724 = vmatpush3.bf16.msra.mxu1 %v7219_v30  ;;  %v5885_v49 = vcombine.low %v8966_v1, %v8974_v47  ;;  %v7224_v30 = vld [vmem:[%s7582_s11 + $0x38] sm:$0x1]  ;;  %v4680_v28 = vrot.slane %v8742_v33, 5  ;;  %v4679_v3 = vrot.slane %v4677_v29, 4  ;;  %v4594_v38 = vsel %vm7796_vm5, %v5858_v59, %v4593_v21  ;;  %v7227_v45 = vld [vmem:[#allocation5 + $0x138] sm:$0xff]  }
 0x174   : > { %6717 = vmatprep.subr.bf16.mxu1 %v7222_v5  ;;  %v4603_v8 = vrot.slane %v7224_v30, 5  ;;  %v8984_v7 = vsel %vm7796_vm5, %v5870_v42, %v4677_v29  ;;  %v4597_v31 = vsel %vm7796_vm5, %v4595_v63, %v4596_v60  ;;  %v4607_v33 = vrot.slane %v7226_v0, 5  ;;  %v5609_v61 = vld [vmem:[%s7582_s11 + $0x6c] sm:$0xf]  ;;  %v7167_v59 = vld [vmem:[%s7582_s11 + $0x84] sm:$0xff]  }
 0x175   : > { %v8999_v21 = vsel %vm7796_vm5, %v4679_v3, %v4680_v28  ;;  %v5860_v63 = vrot.slane %v5844_v37, 9  ;;  %v7228_v42 = vld [vmem:[%s7582_s11 + $0x44] sm:$0x1]  ;;  %v2372_v30 = vshrl.u32 %v5609_v61, 16  ;;  %v5856_v28 = vld [vmem:[%s7582_s11 + $0xcc] sm:$0xe] }
 0x176   : > { %v4604_v46 = vsel %vm7796_vm5, %v4602_v41, %v4603_v8  ;;  %v4609_v60 = vrot.slane %v4607_v33, 4  ;;  %v4687_v41 = vrot.slane %v8864_v19, 5  ;;  %v2375_v8 = vshll.u32 %v5609_v61, 16  ;;  %v7229_v3 = vld [vmem:[%s7582_s11 + $0x70] sm:$0xf] }
 0x177   : > { %6725 = vmatpush3.bf16.msra.mxu1 %v7222_v5  ;;  %v4601_v5 = vsel %vm7796_vm5, %v5859_v51, %v4600_v23  ;;  %v5871_v23 = vrot.slane %v5855_v44, 9  ;;  %v4610_v51 = vrot.slane %v7228_v42, 5  ;;  %v5872_v44 = vrot.slane %v5856_v28, 9  ;;  %v7230_v42 = vld [vmem:[%s7582_s11 + $0x74] sm:$0x1] }
 0x178   : > { %6718 = vmatprep.subr.bf16.mxu1 %v7225_v55  ;;  %v5875_v12 = vcombine.low %v4601_v5, %v4604_v46  ;;  %v2374_v5 = vrot.slane %v2372_v30, 4  ;;  %v2377_v46 = vrot.slane %v2375_v8, 5  ;;  %v2463_v54 = vshll.u32 %v7235_v43, 16 }
 0x179   : > { %6453 = vmatmul.mubr.bf16.gmra.mrb[12].mxu1 %v7163_v4  ;;  %6661 = vmatmul.mubr.bf16.gmra.mrb[28].mxu0 %v5832_v17  ;;  %v7166_v4 = vld [vmem:[%s7582_s11 + $0x78] sm:$0xff]   ;;  %v5886_v17 = vcombine.low %v8984_v7, %v8999_v21  ;;  %v4611_v37 = vsel %vm7796_vm5, %v4609_v60, %v4610_v51 }
 0x17a   : > { %6456 = vmatprep.mubr.bf16.mxu1 %v7165_v62  ;;  %6680 = vmatprep.mubr.bf16.mxu0 %v5873_v22  ;;  %v5874_v62 = vcombine.low %v4594_v38, %v4597_v31  ;;  %v4684_v22 = vrot.slane %v8799_v14, 5  ;;  %v2381_v38 = vshll.u32 %v7229_v3, 16  ;;  %v2385_v14 = vshrl.u32 %v7229_v3, 16 }
 0x17b   : > { %6726 = vmatpush3.bf16.msra.mxu1 %v7225_v55  ;;  %v4608_v31 = vsel %vm7796_vm5, %v5860_v63, %v4607_v33  ;;  %v7169_v33 = vld [vmem:[%s7582_s11 + $0x9c] sm:$0xff]   ;;  %v5615_v63 = vld [vmem:[%s7582_s11 + $0x84] sm:$0xf]  ;;  %v2378_v60 = vor.u32 %v2377_v46, %v2374_v5 }
 0x17c   : > { %6719 = vmatprep.subr.bf16.mxu1 %v7227_v45  ;;  %v9011_v55 = vsel %vm7796_vm5, %v5871_v23, %v4684_v22  ;;  %v4686_v29 = vrot.slane %v4684_v22, 4  ;;  %v9027_v61 = vrot.slane %v2381_v38, 5  ;;  %v5876_v23 = vcombine.low %v4608_v31, %v4611_v37  ;;  %v7170_v38 = vld [vmem:[%s7582_s11 + $0xa8] sm:$0xff]   ;;  %v5621_v46 = vld [vmem:[%s7582_s11 + $0x9c] sm:$0xf] }
 0x17d   : > { %v2423_v30 = vshll.u32 %v5615_v63, 16  ;;  %v2379_v31 = vrot.slane %v2378_v60, 4  ;;  %v2468_v53 = vshrl.u32 %v5621_v46, 16 }
 0x17e   : > { %v9017_v19 = vsel %vm7796_vm5, %v4686_v29, %v4687_v41  ;;  %v2420_v41 = vshrl.u32 %v5615_v63, 16  ;;  %v7231_v29 = vld [vmem:[%s7582_s11 + $0x88] sm:$0xf] }
 0x17f   : > { %6727 = vmatpush3.bf16.msra.mxu1 %v7227_v45  ;;  %v5887_v0 = vcombine.low %v9011_v55, %v9017_v19  ;;  %v4691_v45 = vrot.slane %v8861_v20, 5  ;;  %v2391_v20 = vshll.u32 %v7230_v42, 16  ;;  %v2429_v28 = vshll.u32 %v7231_v29, 16 }
 0x180   : > { %v2433_v3 = vshrl.u32 %v7231_v29, 16  ;;  %v2425_v5 = vrot.slane %v2423_v30, 5  ;;  %v2384_v60 = vsel %vm7609_vm2, %v2379_v31, %v9027_v61 }
 0x181   : > { %6457 = vmatmul.mubr.bf16.gmra.mrb[16].mxu1 %v7166_v4  ;;  %6681 = vmatmul.mubr.bf16.vlgmr.msra.gmra.mrb[0].mxu0 %v5874_v62  ;;  %v7168_v4 = vld [vmem:[%s7582_s11 + $0x90] sm:$0xff]   ;;  %v2387_v62 = vrot.slane %v2385_v14, 4  ;;  %v9034_v22 = vsel %vm7796_vm5, %v5872_v44, %v4691_v45  ;;  %v2393_v14 = vrot.slane %v2391_v20, 5  ;;  %v2422_v44 = vrot.slane %v2420_v41, 4  ;;  %v7234_v41 = vld [vmem:[%s7582_s11 + $0x8c] sm:$0x1] }
 0x182   : > { %6460 = vmatprep.mubr.bf16.mxu1 %v7167_v59  ;;  %6684 = vmatprep.mubr.bf16.mxu0 %v5875_v12  ;;  %v4694_v59 = vrot.slane %v8908_v18, 5  ;;  %v4693_v12 = vrot.slane %v4691_v45, 4  ;;  %v7171_v45 = vld [vmem:[%s7582_s11 + $0xb4] sm:$0xff]   ;;  %v2439_v30 = vshll.u32 %v7234_v41, 16 }
 0x183   : > { %v2388_v18 = vor.u32 %v2387_v62, %v9027_v61  ;;  %v2435_v62 = vrot.slane %v2433_v3, 4  ;;  %v2426_v29 = vor.u32 %v2425_v5, %v2422_v44 }
 0x184   : > { %v9039_v51 = vsel %vm7796_vm5, %v4693_v12, %v4694_v59  ;;  %v2444_v59 = vshrl.u32 %v5618_v10, 16  ;;  %v7233_v12 = vld [vmem:[%s7582_s11 + $0xa0] sm:$0xf]  ;;  %v2441_v44 = vrot.slane %v2439_v30, 5  ;;  %v2465_v30 = vrot.slane %v2463_v54, 5 }
 0x185   : > { %v5888_v8 = vcombine.low %v9034_v22, %v9039_v51  ;;  %v2389_v37 = vrot.slane %v2388_v18, 4  ;;  %v2477_v42 = vshll.u32 %v7233_v12, 16  ;;  %v2481_v20 = vshrl.u32 %v7233_v12, 16  ;;  %v7237_v12 = vld [vmem:[%s7582_s11 + $0xac] sm:$0xf] }
 0x186   : > { %v2446_v3 = vrot.slane %v2444_v59, 4  ;;  %v2427_v5 = vrot.slane %v2426_v29, 4 }
 0x187   : > { %v2394_v18 = vsel %vm7609_vm2, %v2389_v37, %v2393_v14  ;;  %v2470_v14 = vrot.slane %v2468_v53, 4  ;;  %v9071_v13 = vrot.slane %v2477_v42, 5  ;;  %v2483_v16 = vrot.slane %v2481_v20, 4 }
 0x188   : > { %v5641_v37 = vcombine.low %v2384_v60, %v2394_v18  ;;  %v2501_v42 = vshll.u32 %v7237_v12, 16  ;;  %v2505_v20 = vshrl.u32 %v7237_v12, 16 }
 0x189   : > { %6461 = vmatmul.mubr.bf16.gmra.mrb[20].mxu1 %v7168_v4  ;;  %6685 = vmatmul.mubr.bf16.gmra.mrb[4].mxu0 %v5876_v23  ;;  %v9052_v4 = vrot.slane %v2429_v28, 5  ;;  %v2447_v23 = vshll.u32 %v5618_v10, 16 }
 0x18a   : > { %6464 = vmatprep.mubr.bf16.mxu1 %v7169_v33  ;;  %6688 = vmatprep.mubr.bf16.mxu0 %v5877_v50  ;;  %v7232_v33 = vld [vmem:[%s7582_s11 + $0x94] sm:$0xf]  ;;  %v2471_v50 = vshll.u32 %v5621_v46, 16 }
 0x18b   : > { %v2453_v63 = vshll.u32 %v7232_v33, 16  ;;  %v2457_v27 = vshrl.u32 %v7232_v33, 16  ;;  %v2436_v28 = vor.u32 %v2435_v62, %v9052_v4  ;;  %v2449_v10 = vrot.slane %v2447_v23, 5  ;;  %v7236_v33 = vld [vmem:[%s7582_s11 + $0xa4] sm:$0x1] }
 0x18c   : > { %v2473_v31 = vrot.slane %v2471_v50, 5  ;;  %v2484_v23 = vor.u32 %v2483_v16, %v9071_v13  ;;  %v2432_v60 = vsel %vm7609_vm2, %v2427_v5, %v9052_v4  ;;  %v2503_v16 = vrot.slane %v2501_v42, 5 }
 0x18d   : > { %v9069_v61 = vrot.slane %v2453_v63, 5  ;;  %v2437_v46 = vrot.slane %v2436_v28, 4  ;;  %v2487_v63 = vshll.u32 %v7236_v33, 16 }
 0x18e   : > { %v2474_v59 = vor.u32 %v2473_v31, %v2470_v14 }
 0x18f   : > { %v2442_v18 = vsel %vm7609_vm2, %v2437_v46, %v2441_v44  ;;  %v2489_v14 = vrot.slane %v2487_v63, 5  ;;  %v7240_v63 = vld [vmem:[%s7582_s11 + $0xc4] sm:$0xf] }
 0x191   : > { %6465 = vmatmul.mubr.bf16.gmra.mrb[24].mxu1 %v7170_v38  ;;  %6689 = vmatmul.mubr.bf16.gmra.mrb[8].mxu0 %v5878_v11  ;;  %v2459_v38 = vrot.slane %v2457_v27, 4  ;;  %v7172_v11 = vld [vmem:[%s7582_s11 + $0xc0] sm:$0xff]   ;;  %v5627_v27 = vld [vmem:[%s7582_s11 + $0xb4] sm:$0xf] }
 0x192   : > { %6468 = vmatprep.mubr.bf16.mxu1 %v7171_v45  ;;  %6692 = vmatprep.mubr.bf16.mxu0 %v5879_v32  ;;  %v2450_v45 = vor.u32 %v2449_v10, %v2446_v3  ;;  %v5624_v32 = vld [vmem:[%s7582_s11 + $0xa8] sm:$0xf]  ;;  %v2516_v29 = vshrl.u32 %v5627_v27, 16  ;;  %v2519_v28 = vshll.u32 %v5627_v27, 16  ;;  %v7238_v3 = vld [vmem:[%s7582_s11 + $0xb8] sm:$0xf] }
 0x193   : > { %v2460_v62 = vor.u32 %v2459_v38, %v9069_v61  ;;  %v2492_v53 = vshrl.u32 %v5624_v32, 16  ;;  %v2495_v50 = vshll.u32 %v5624_v32, 16  ;;  %v2525_v52 = vshll.u32 %v7238_v3, 16 }
 0x194   : > { %v2451_v41 = vrot.slane %v2450_v45, 4  ;;  %v2529_v6 = vshrl.u32 %v7238_v3, 16  ;;  %v2475_v10 = vrot.slane %v2474_v59, 4  ;;  %v2485_v38 = vrot.slane %v2484_v23, 4  ;;  %v7239_v59 = vld [vmem:[%s7582_s11 + $0xb0] sm:$0x1] }
 0x195   : > { %v2494_v4 = vrot.slane %v2492_v53, 4  ;;  %v2497_v31 = vrot.slane %v2495_v50, 5  ;;  %v2518_v44 = vrot.slane %v2516_v29, 4  ;;  %v2521_v5 = vrot.slane %v2519_v28, 5  ;;  %v7241_v50 = vld [vmem:[%s7582_s11 + $0xbc] sm:$0x1] }
 0x196   : > { %v2527_v48 = vrot.slane %v2525_v52, 5  ;;  %v2531_v40 = vrot.slane %v2529_v6, 4  ;;  %v2456_v46 = vsel %vm7609_vm2, %v2451_v41, %v9069_v61  ;;  %v2480_v43 = vsel %vm7609_vm2, %v2475_v10, %v9071_v13  ;;  %v7242_v6 = vld [vmem:[%s7582_s11 + $0xc8] sm:$0x1] }
 0x197   : > { %v2490_v54 = vsel %vm7609_vm2, %v2485_v38, %v2489_v14  ;;  %v2498_v32 = vor.u32 %v2497_v31, %v2494_v4  ;;  %v2511_v23 = vshll.u32 %v7239_v59, 16  ;;  %v2549_v27 = vshll.u32 %v7240_v63, 16 }
 0x198   : > { %v2553_v13 = vshrl.u32 %v7240_v63, 16  ;;  %v2532_v53 = vor.u32 %v2531_v40, %v2527_v48  ;;  %v2535_v12 = vshll.u32 %v7241_v50, 16 }
 0x199   : > { %6469 = vmatmul.mubr.bf16.gmra.mrb[28].mxu1 %v7172_v11  ;;  %6693 = vmatmul.mubr.bf16.gmra.mrb[12].mxu0 %v5880_v57  ;;  %v2461_v57 = vrot.slane %v2460_v62, 4  ;;  %v2507_v11 = vrot.slane %v2505_v20, 4  ;;  %v5645_v20 = vcombine.low %v2480_v43, %v2490_v54  ;;  %v2513_v2 = vrot.slane %v2511_v23, 5 }
 0x19a   : > { %6504 = vmatprep.mubr.bf16.mxu1 %v5641_v37  ;;  %6696 = vmatprep.mubr.bf16.mxu0 %v5881_v24  ;;  %v5643_v37 = vcombine.low %v2432_v60, %v2442_v18  ;;  %v5630_v24 = vld [vmem:[%s7582_s11 + $0xc0] sm:$0xf]  ;;  %v2499_v60 = vrot.slane %v2498_v32, 4  ;;  %v2551_v41 = vrot.slane %v2549_v27, 5  ;;  %v2533_v28 = vrot.slane %v2532_v53, 4 }
 0x19b   : > { %v2466_v45 = vsel %vm7609_vm2, %v2461_v57, %v2465_v30  ;;  %v2508_v62 = vor.u32 %v2507_v11, %v2503_v16  ;;  %v2540_v61 = vshrl.u32 %v5630_v24, 16  ;;  %v2543_v33 = vshll.u32 %v5630_v24, 16 }
 0x19c   : > { %v5644_v42 = vcombine.low %v2456_v46, %v2466_v45  ;;  %v2555_v30 = vrot.slane %v2553_v13, 4  ;;  %v2537_v3 = vrot.slane %v2535_v12, 5  ;;  %v2504_v35 = vsel %vm7609_vm2, %v2499_v60, %v2503_v16 }
 0x19d   : > { %v2509_v18 = vrot.slane %v2508_v62, 4  ;;  %v2542_v15 = vrot.slane %v2540_v61, 4  ;;  %v2559_v57 = vshll.u32 %v7242_v6, 16 }
 0x19e   : > { %v2556_v52 = vor.u32 %v2555_v30, %v2551_v41  ;;  %v2538_v38 = vsel %vm7609_vm2, %v2533_v28, %v2537_v3 }
 0x19f   : > { %v2514_v34 = vsel %vm7609_vm2, %v2509_v18, %v2513_v2  ;;  %v2561_v4 = vrot.slane %v2559_v57, 5 }
 0x1a0   : > { %v5646_v58 = vcombine.low %v2504_v35, %v2514_v34  ;;  %v2557_v14 = vrot.slane %v2556_v52, 4 }
 0x1a1   : > { %6505 = vmatmul.mubr.bf16.vlgmr.msra.gmra.mrb[16].mxu1 %v8900_v25  ;;  %6697 = vmatmul.mubr.bf16.gmra.mrb[16].mxu0 %v5882_v26  ;;  %v2522_v25 = vor.u32 %v2521_v5, %v2518_v44  ;;  %v2545_v26 = vrot.slane %v2543_v33, 5 }
 0x1a2   : > { %6508 = vmatprep.mubr.bf16.mxu1 %v5643_v37  ;;  %6700 = vmatprep.mubr.bf16.mxu0 %v5883_v56  ;;  %v2562_v47 = vsel %vm7609_vm2, %v2557_v14, %v2561_v4 }
 0x1a3   : > { %v2523_v29 = vrot.slane %v2522_v25, 4  ;;  %v2546_v56 = vor.u32 %v2545_v26, %v2542_v15 }
 0x1a5   : > { %v2528_v10 = vsel %vm7609_vm2, %v2523_v29, %v2527_v48 }
 0x1a6   : > { %v5647_v9 = vcombine.low %v2528_v10, %v2538_v38 }
 0x1a9   : > { %6509 = vmatmul.mubr.bf16.gmra.mrb[20].mxu1 %v5644_v42  ;;  %6701 = vmatmul.mubr.bf16.gmra.mrb[20].mxu0 %v5884_v36  ;;  %v2547_v36 = vrot.slane %v2546_v56, 4 }
 0x1aa   : > { %6512 = vmatprep.mubr.bf16.mxu1 %v5645_v20  ;;  %6704 = vmatprep.mubr.bf16.mxu0 %v5885_v49 }
 0x1ab   : > { %v2552_v1 = vsel %vm7609_vm2, %v2547_v36, %v2551_v41 }
 0x1ac   : > { %v5648_v49 = vcombine.low %v2552_v1, %v2562_v47 }
 0x1b1   : > { %6513 = vmatmul.mubr.bf16.gmra.mrb[24].mxu1 %v5646_v58  ;;  %6705 = vmatmul.mubr.bf16.gmra.mrb[24].mxu0 %v5886_v17 }
 0x1b2   : > { %6516 = vmatprep.mubr.bf16.mxu1 %v5647_v9  ;;  %6708 = vmatprep.mubr.bf16.mxu0 %v5887_v0 }
 0x1b9   : > { %6517 = vmatmul.mubr.bf16.gmra.mrb[28].mxu1 %v5648_v49  ;;  %6709 = vmatmul.mubr.bf16.gmra.mrb[28].mxu0 %v5888_v8 }
 0x234   : > { %v6442_v31 = vpop.f32.mrb[0].mxu1 }
 0x235   : > { %v1972_v7 = vpop.f32.mrb[1].mxu1 }
 0x236   : > { %v6443_v21 = vpop.f32.mrb[2].mxu1 }
 0x237   : > { %v1975_v17 = vpop.f32.mrb[3].mxu1 }
 0x23c   : > { %v6446_v16 = vpop.f32.mrb[4].mxu1 }
 0x23d   : > { %v1988_v11 = vpop.f32.mrb[5].mxu1 }
 0x23e   : > { %v6447_v37 = vpop.f32.mrb[6].mxu1 }
 0x23f   : > { %v1991_v39 = vpop.f32.mrb[7].mxu1 }
 0x244   : > { %v6450_v44 = vpop.f32.mrb[8].mxu1 }
 0x245   : > { %v2004_v5 = vpop.f32.mrb[9].mxu1 }
 0x246   : > { %v6451_v48 = vpop.f32.mrb[10].mxu1 }
 0x247   : > { %v2007_v55 = vpop.f32.mrb[11].mxu1 }
 0x24c   : > { %v9142_v19 = vpop.f32.mrb[12].mxu1 }
 0x24d   : > { %v9144_v0 = vpop.f32.mrb[13].mxu1 }
 0x24e   : > { %v9146_v40 = vpop.f32.mrb[14].mxu1 }
 0x24f   : > { %v9148_v22 = vpop.f32.mrb[15].mxu1 }
 0x254   : > { %v6682_v51 = vpop.f32.mrb[0].mxu0 }
 0x255   : > { %v6728_v8 = vadd.f32 %v6682_v51, %v6442_v31  ;;  %v4858_v24 = vpop.f32.mrb[1].mxu0 }
 0x256   : > { %v6729_v46 = vadd.f32 %v4858_v24, %v1972_v7  ;;  %v6683_v45 = vpop.f32.mrb[2].mxu0 }
 0x257   : > { %v6730_v43 = vadd.f32 %v6683_v45, %v6443_v21  ;;  %v4861_v54 = vpop.f32.mrb[3].mxu0  ;;  %v5057_v63 = vmul.f32 %v6728_v8, %v6728_v8 }
 0x258   : > { %v6731_v32 = vadd.f32 %v4861_v54, %v1975_v17  ;;  %v5055_v59 = vmul.f32 %v6729_v46, %v6729_v46 }
 0x259   : > { %v5977_v62 = vpack.c.bf16 %v6730_v43, %v6728_v8  ;;  %v5058_v12 = vmul.f32 %v6730_v43, %v6730_v43 }
 0x25a   : > { %v5017_v23 = vadd.f32 %v6731_v32, %v6729_v46  ;;  %v5056_v61 = vmul.f32 %v6731_v32, %v6731_v32  ;;  %v5972_v33 = vpack.c.bf16 %v6731_v32, %v6729_v46 }
 0x25b   : > { %6049 = vst [vmem:[%s9151_s20 + $0x8] sm:$0xff] %v5977_v62  }
 0x25c   : > { %v5018_v27 = vadd.f32 %v6728_v8, %v5017_v23  ;;  %v5087_v13 = vadd.f32 %v5056_v61, %v5055_v59  ;;  %5973 = vst [vmem:[%s9151_s20] sm:$0xff] %v5972_v33   ;;  %v6686_v25 = vpop.f32.mrb[4].mxu0 }
 0x25d   : > { %v6732_v53 = vadd.f32 %v6686_v25, %v6446_v16  ;;  %v4874_v50 = vpop.f32.mrb[5].mxu0 }
 0x25e   : > { %v5088_v42 = vadd.f32 %v5087_v13, %v5057_v63  ;;  %v6733_v20 = vadd.f32 %v4874_v50, %v1988_v11  ;;  %v5019_v60 = vadd.f32 %v6730_v43, %v5018_v27  ;;  %v6687_v18 = vpop.f32.mrb[6].mxu0 }
 0x25f   : > { %v6734_v2 = vadd.f32 %v6687_v18, %v6447_v37  ;;  %v4877_v15 = vpop.f32.mrb[7].mxu0  ;;  %v5061_v52 = vmul.f32 %v6732_v53, %v6732_v53 }
 0x260   : > { %v5020_v26 = vadd.f32 %v6733_v20, %v5019_v60  ;;  %v5059_v41 = vmul.f32 %v6733_v20, %v6733_v20  ;;  %v5089_v30 = vadd.f32 %v5088_v42, %v5058_v12  ;;  %v6735_v29 = vadd.f32 %v4877_v15, %v1991_v39 }
 0x261   : > { %v5987_v28 = vpack.c.bf16 %v6734_v2, %v6732_v53  ;;  %v5062_v9 = vmul.f32 %v6734_v2, %v6734_v2 }
 0x262   : > { %v5090_v3 = vadd.f32 %v5089_v30, %v5059_v41  ;;  %v5021_v35 = vadd.f32 %v6735_v29, %v5020_v26  ;;  %v5060_v34 = vmul.f32 %v6735_v29, %v6735_v29  ;;  %v5982_v56 = vpack.c.bf16 %v6735_v29, %v6733_v20 }
 0x263   : > { %6051 = vst [vmem:[%s9151_s20 + $0x18] sm:$0xff] %v5987_v28  }
 0x264   : > { %v5022_v6 = vadd.f32 %v6732_v53, %v5021_v35  ;;  %v5091_v57 = vadd.f32 %v5090_v3, %v5060_v34  ;;  %6050 = vst [vmem:[%s9151_s20 + $0x10] sm:$0xff] %v5982_v56   ;;  %v6690_v10 = vpop.f32.mrb[8].mxu0 }
 0x265   : > { %v6736_v38 = vadd.f32 %v6690_v10, %v6450_v44  ;;  %v4890_v58 = vpop.f32.mrb[9].mxu0 }
 0x266   : > { %v5092_v36 = vadd.f32 %v5091_v57, %v5061_v52  ;;  %v6737_v14 = vadd.f32 %v4890_v58, %v2004_v5  ;;  %v5023_v4 = vadd.f32 %v6734_v2, %v5022_v6  ;;  %v6691_v1 = vpop.f32.mrb[10].mxu0 }
 0x267   : > { %v6738_v47 = vadd.f32 %v6691_v1, %v6451_v48  ;;  %v4893_v49 = vpop.f32.mrb[11].mxu0  ;;  %v5065_v44 = vmul.f32 %v6736_v38, %v6736_v38 }
 0x268   : > { %v5024_v31 = vadd.f32 %v6737_v14, %v5023_v4  ;;  %v5063_v7 = vmul.f32 %v6737_v14, %v6737_v14  ;;  %v5093_v21 = vadd.f32 %v5092_v36, %v5062_v9  ;;  %v6739_v17 = vadd.f32 %v4893_v49, %v2007_v55 }
 0x269   : > { %v5997_v16 = vpack.c.bf16 %v6738_v47, %v6736_v38  ;;  %v5066_v48 = vmul.f32 %v6738_v47, %v6738_v47 }
 0x26a   : > { %v5094_v11 = vadd.f32 %v5093_v21, %v5063_v7  ;;  %v5025_v37 = vadd.f32 %v6739_v17, %v5024_v31  ;;  %v5064_v39 = vmul.f32 %v6739_v17, %v6739_v17  ;;  %v5992_v51 = vpack.c.bf16 %v6739_v17, %v6737_v14 }
 0x26b   : > { %6053 = vst [vmem:[%s9151_s20 + $0x28] sm:$0xff] %v5997_v16  }
 0x26c   : > { %v5026_v8 = vadd.f32 %v6736_v38, %v5025_v37  ;;  %v5095_v24 = vadd.f32 %v5094_v11, %v5064_v39  ;;  %6052 = vst [vmem:[%s9151_s20 + $0x20] sm:$0xff] %v5992_v51   ;;  %v6694_v5 = vpop.f32.mrb[12].mxu0 }
 0x26d   : > { %v6740_v46 = vadd.f32 %v6694_v5, %v9142_v19  ;;  %v4906_v45 = vpop.f32.mrb[13].mxu0 }
 0x26e   : > { %v5096_v43 = vadd.f32 %v5095_v24, %v5065_v44  ;;  %v6741_v54 = vadd.f32 %v4906_v45, %v9144_v0  ;;  %v5027_v55 = vadd.f32 %v6738_v47, %v5026_v8  ;;  %v6695_v32 = vpop.f32.mrb[14].mxu0 }
 0x26f   : > { %v6742_v62 = vadd.f32 %v6695_v32, %v9146_v40  ;;  %v4909_v59 = vpop.f32.mrb[15].mxu0  ;;  %v5069_v12 = vmul.f32 %v6740_v46, %v6740_v46 }
 0x270   : > { %v5028_v23 = vadd.f32 %v6741_v54, %v5027_v55  ;;  %v5067_v61 = vmul.f32 %v6741_v54, %v6741_v54  ;;  %v5097_v33 = vadd.f32 %v5096_v43, %v5066_v48  ;;  %v6743_v63 = vadd.f32 %v4909_v59, %v9148_v22 }
 0x271   : > { %v6007_v27 = vpack.c.bf16 %v6742_v62, %v6740_v46  ;;  %v5070_v15 = vmul.f32 %v6742_v62, %v6742_v62 }
 0x272   : > { %v5098_v13 = vadd.f32 %v5097_v33, %v5067_v61  ;;  %v5029_v19 = vadd.f32 %v6743_v63, %v5028_v23  ;;  %v5068_v25 = vmul.f32 %v6743_v63, %v6743_v63  ;;  %v6002_v53 = vpack.c.bf16 %v6743_v63, %v6741_v54 }
 0x273   : > { %6055 = vst [vmem:[%s9151_s20 + $0x38] sm:$0xff] %v6007_v27  }
 0x274   : > { %v6506_v50 = vpop.f32.mrb[16].mxu1  ;;  %v5030_v0 = vadd.f32 %v6740_v46, %v5029_v19  ;;  %v5099_v42 = vadd.f32 %v5098_v13, %v5068_v25  ;;  %6054 = vst [vmem:[%s9151_s20 + $0x30] sm:$0xff] %v6002_v53   ;;  %v6698_v20 = vpop.f32.mrb[16].mxu0 }
 0x275   : > { %v2789_v40 = vpop.f32.mrb[17].mxu1  ;;  %v6744_v60 = vadd.f32 %v6698_v20, %v6506_v50  ;;  %v4922_v18 = vpop.f32.mrb[17].mxu0 }
 0x276   : > { %v6507_v2 = vpop.f32.mrb[18].mxu1  ;;  %v5100_v26 = vadd.f32 %v5099_v42, %v5069_v12  ;;  %v6745_v22 = vadd.f32 %v4922_v18, %v2789_v40  ;;  %v5031_v41 = vadd.f32 %v6742_v62, %v5030_v0  ;;  %v6699_v30 = vpop.f32.mrb[18].mxu0 }
 0x277   : > { %v2792_v29 = vpop.f32.mrb[19].mxu1  ;;  %v6746_v28 = vadd.f32 %v6699_v30, %v6507_v2  ;;  %v4925_v3 = vpop.f32.mrb[19].mxu0  ;;  %v5073_v36 = vmul.f32 %v6744_v60, %v6744_v60 }
 0x278   : > { %v5032_v35 = vadd.f32 %v6745_v22, %v5031_v41  ;;  %v5071_v34 = vmul.f32 %v6745_v22, %v6745_v22  ;;  %v5101_v56 = vadd.f32 %v5100_v26, %v5070_v15  ;;  %v6747_v52 = vadd.f32 %v4925_v3, %v2792_v29 }
 0x279   : > { %v6017_v6 = vpack.c.bf16 %v6746_v28, %v6744_v60  ;;  %v5074_v21 = vmul.f32 %v6746_v28, %v6746_v28 }
 0x27a   : > { %v5102_v57 = vadd.f32 %v5101_v56, %v5071_v34  ;;  %v5033_v10 = vadd.f32 %v6747_v52, %v5032_v35  ;;  %v5072_v38 = vmul.f32 %v6747_v52, %v6747_v52  ;;  %v6012_v58 = vpack.c.bf16 %v6747_v52, %v6745_v22 }
 0x27b   : > { %6057 = vst [vmem:[%s9151_s20 + $0x48] sm:$0xff] %v6017_v6  }
 0x27c   : > { %v6510_v9 = vpop.f32.mrb[20].mxu1  ;;  %v5034_v14 = vadd.f32 %v6744_v60, %v5033_v10  ;;  %v5103_v4 = vadd.f32 %v5102_v57, %v5072_v38  ;;  %6056 = vst [vmem:[%s9151_s20 + $0x40] sm:$0xff] %v6012_v58   ;;  %v6702_v1 = vpop.f32.mrb[20].mxu0 }
 0x27d   : > { %v2805_v47 = vpop.f32.mrb[21].mxu1  ;;  %v6748_v49 = vadd.f32 %v6702_v1, %v6510_v9  ;;  %v4938_v31 = vpop.f32.mrb[21].mxu0 }
 0x27e   : > { %v6511_v7 = vpop.f32.mrb[22].mxu1  ;;  %v5104_v17 = vadd.f32 %v5103_v4, %v5073_v36  ;;  %v6749_v16 = vadd.f32 %v4938_v31, %v2805_v47  ;;  %v5035_v11 = vadd.f32 %v6746_v28, %v5034_v14  ;;  %v6703_v37 = vpop.f32.mrb[22].mxu0 }
 0x27f   : > { %v2808_v39 = vpop.f32.mrb[23].mxu1  ;;  %v6750_v51 = vadd.f32 %v6703_v37, %v6511_v7  ;;  %v4941_v44 = vpop.f32.mrb[23].mxu0  ;;  %v5077_v62 = vmul.f32 %v6748_v49, %v6748_v49 }
 0x280   : > { %v5036_v8 = vadd.f32 %v6749_v16, %v5035_v11  ;;  %v5075_v24 = vmul.f32 %v6749_v16, %v6749_v16  ;;  %v5105_v5 = vadd.f32 %v5104_v17, %v5074_v21  ;;  %v6751_v46 = vadd.f32 %v4941_v44, %v2808_v39 }
 0x281   : > { %v6027_v45 = vpack.c.bf16 %v6750_v51, %v6748_v49  ;;  %v5078_v19 = vmul.f32 %v6750_v51, %v6750_v51 }
 0x282   : > { %v5106_v48 = vadd.f32 %v5105_v5, %v5075_v24  ;;  %v5037_v43 = vadd.f32 %v6751_v46, %v5036_v8  ;;  %v5076_v54 = vmul.f32 %v6751_v46, %v6751_v46  ;;  %v6022_v55 = vpack.c.bf16 %v6751_v46, %v6749_v16 }
 0x283   : > { %6059 = vst [vmem:[%s9151_s20 + $0x58] sm:$0xff] %v6027_v45  }
 0x284   : > { %v6514_v32 = vpop.f32.mrb[24].mxu1  ;;  %v5038_v59 = vadd.f32 %v6748_v49, %v5037_v43  ;;  %v5107_v23 = vadd.f32 %v5106_v48, %v5076_v54  ;;  %6058 = vst [vmem:[%s9151_s20 + $0x50] sm:$0xff] %v6022_v55   ;;  %v6706_v61 = vpop.f32.mrb[24].mxu0 }
 0x285   : > { %v2821_v33 = vpop.f32.mrb[25].mxu1  ;;  %v6752_v63 = vadd.f32 %v6706_v61, %v6514_v32  ;;  %v4954_v27 = vpop.f32.mrb[25].mxu0 }
 0x286   : > { %v6515_v13 = vpop.f32.mrb[26].mxu1  ;;  %v5108_v25 = vadd.f32 %v5107_v23, %v5077_v62  ;;  %v6753_v53 = vadd.f32 %v4954_v27, %v2821_v33  ;;  %v5039_v50 = vadd.f32 %v6750_v51, %v5038_v59  ;;  %v6707_v12 = vpop.f32.mrb[26].mxu0 }
 0x287   : > { %v2824_v0 = vpop.f32.mrb[27].mxu1  ;;  %v6754_v42 = vadd.f32 %v6707_v12, %v6515_v13  ;;  %v4957_v20 = vpop.f32.mrb[27].mxu0  ;;  %v5081_v28 = vmul.f32 %v6752_v63, %v6752_v63 }
 0x288   : > { %v5040_v40 = vadd.f32 %v6753_v53, %v5039_v50  ;;  %v5079_v60 = vmul.f32 %v6753_v53, %v6753_v53  ;;  %v5109_v18 = vadd.f32 %v5108_v25, %v5078_v19  ;;  %v6755_v2 = vadd.f32 %v4957_v20, %v2824_v0 }
 0x289   : > { %v6037_v15 = vpack.c.bf16 %v6754_v42, %v6752_v63  ;;  %v5082_v10 = vmul.f32 %v6754_v42, %v6754_v42 }
 0x28a   : > { %v5110_v26 = vadd.f32 %v5109_v18, %v5079_v60  ;;  %v5041_v22 = vadd.f32 %v6755_v2, %v5040_v40  ;;  %v5080_v41 = vmul.f32 %v6755_v2, %v6755_v2  ;;  %v6032_v30 = vpack.c.bf16 %v6755_v2, %v6753_v53 }
 0x28b   : > { %6061 = vst [vmem:[%s9151_s20 + $0x68] sm:$0xff] %v6037_v15  }
 0x28c   : > { %v6518_v29 = vpop.f32.mrb[28].mxu1  ;;  %v5042_v3 = vadd.f32 %v6752_v63, %v5041_v22  ;;  %v5111_v35 = vadd.f32 %v5110_v26, %v5080_v41  ;;  %6060 = vst [vmem:[%s9151_s20 + $0x60] sm:$0xff] %v6032_v30   ;;  %v6710_v34 = vpop.f32.mrb[28].mxu0 }
 0x28d   : > { %v2837_v56 = vpop.f32.mrb[29].mxu1  ;;  %v6756_v52 = vadd.f32 %v6710_v34, %v6518_v29  ;;  %v4970_v6 = vpop.f32.mrb[29].mxu0 }
 0x28e   : > { %v6519_v57 = vpop.f32.mrb[30].mxu1  ;;  %v5112_v38 = vadd.f32 %v5111_v35, %v5081_v28  ;;  %v6757_v58 = vadd.f32 %v4970_v6, %v2837_v56  ;;  %v5043_v9 = vadd.f32 %v6754_v42, %v5042_v3  ;;  %v6711_v36 = vpop.f32.mrb[30].mxu0 }
 0x28f   : > { %v2840_v14 = vpop.f32.mrb[31].mxu1  ;;  %v6758_v4 = vadd.f32 %v6711_v36, %v6519_v57  ;;  %v4973_v1 = vpop.f32.mrb[31].mxu0  ;;  %v5085_v39 = vmul.f32 %v6756_v52, %v6756_v52 }
 0x290   : > { %v5044_v47 = vadd.f32 %v6757_v58, %v5043_v9  ;;  %v5083_v49 = vmul.f32 %v6757_v58, %v6757_v58  ;;  %v5113_v31 = vadd.f32 %v5112_v38, %v5082_v10  ;;  %v6759_v7 = vadd.f32 %v4973_v1, %v2840_v14 }
 0x291   : > { %v6047_v21 = vpack.c.bf16 %v6758_v4, %v6756_v52 }
 0x292   : > { %v5114_v17 = vadd.f32 %v5113_v31, %v5083_v49  ;;  %v5045_v16 = vadd.f32 %v6759_v7, %v5044_v47  ;;  %v5084_v11 = vmul.f32 %v6759_v7, %v6759_v7  ;;  %v6042_v37 = vpack.c.bf16 %v6759_v7, %v6757_v58 }
 0x293   : > { %6063 = vst [vmem:[%s9151_s20 + $0x78] sm:$0xff] %v6047_v21  }
 0x294   : > { %v5046_v51 = vadd.f32 %v6756_v52, %v5045_v16  ;;  %v5115_v44 = vadd.f32 %v5114_v17, %v5084_v11  ;;  %6062 = vst [vmem:[%s9151_s20 + $0x70] sm:$0xff] %v6042_v37  }
 0x295   : > { %7314 = shalt.err (!%p7311_p7)
}
 0x296   : > { %s7315_s26 = scalar_lea.hbm %s9176_s4, 2048  ;;  %s7319_s10 = scalar_lea.hbm %s9257_s2, 4096 }
 0x297   : > { %p7316_p9 = scmp.ne.s32.totalorder %s9176_s4, %s7315_s26  ;;  %p7320_p5 = scmp.lt.u32.totalorder %s9176_s4, %s9257_s2 }
 0x298   : > { %p7321_p13 = scmp.lt.u32.totalorder %s7319_s10, %s7315_s26  ;;  %p7323_p4 = scmp.lt.u32.totalorder %s7315_s26, %s9176_s4 }
 0x299   : > { %p7317_p1 = pnand %p7316_p9, %p7527_p12 }
 0x29a   : > { %p7322_p2 = por %p7321_p13, %p7320_p5 }
 0x29b   : > { %p7318_p0 = pneg %p7317_p1 }
 0x29c   : > { %p7324_p6 = por %p7323_p4, %p7322_p2 }
 0x29e   : > { %p7325_p8 = pnand %p7324_p6, %p7318_p0 }
 0x2a0   : > { %7328 = shalt.err (!%p7325_p8)
}
 0x2a1   : > { %s7410_s20 = smov 64   ;;  %s7411_s8 = smov 4   ;;  %v5086_v8 = vmul.f32 %v6758_v4, %v6758_v4  ;;  %v5047_v24 = vadd.f32 %v6758_v4, %v5046_v51  ;;  %v5116_v5 = vadd.f32 %v5115_v44, %v5085_v39 }
 0x2a2   : > { %6993 = dma.vmem_to_hbm [thread:$0]  (%p7527_p12), %s9178_s9, 2048, %s9176_s4, %s5286_s5, %s7410_s20, %s7410_s20, %s7411_s8  }
 0x2a3   : > { %v5048_v46 = vrot.slane %v5047_v24, 4  ;;  %v5117_v45 = vadd.f32 %v5116_v5, %v5086_v8  ;;  %s5440_s29 = sshll.u32 %s7578_s6, 1  ;;  %s5933_s25 = sshll.u32 %s7454_s16, 5 }
 0x2a4   : > { %s214_s27 = scalar_lea.vmem [#allocation8], %s5440_s29  ;;  %s9211_s5 = scalar_lea.hbm %s9258_s3, %s5933_s25 }
 0x2a5   : > { %v5049_v48 = vadd.f32 %v5048_v46, %v5047_v24  ;;  %v5118_v43 = vrot.slane %v5117_v45, 4  ;;  %s5320_s22 = sshll.u32 %s214_s27, 4  ;;  %s5291_s23 = scalar_lea.sflag [#allocation9], %s7578_s6  ;;  %s9213_s22 = int_to_ptr.vmem [resolvable:$true] %s5320_s22 }
 0x2a6   : > { %s7329_s28 = scalar_lea.vmem %s9213_s22, 32  ;;  %s7412_s16 = smov [#allocation8]  }
 0x2a7   : > { %v5050_v54 = vrot.slane %v5049_v48, 2  ;;  %v5119_v55 = vadd.f32 %v5118_v43, %v5117_v45  ;;  %p7330_p10 = scmp.ne.s32.totalorder %s9213_s22, %s7329_s28  ;;  %s7333_s26 = sshll.u32 %s7412_s16, 4  ;;  %s7334_s26 = int_to_ptr.vmem [resolvable:$false] %s7333_s26 }
 0x2a8   : > { %s7335_s30 = scalar_lea.vmem %s7334_s26, 64  ;;  %p7336_p7 = scmp.lt.s32.totalorder %s9213_s22, %s7334_s26 }
 0x2a9   : > { %v5051_v32 = vadd.f32 %v5050_v54, %v5049_v48  ;;  %v5120_v62 = vrot.slane %v5119_v55, 2  ;;  %p7331_p11 = pnand %p7330_p10, %p7527_p12  ;;  %p7337_p9 = scmp.lt.s32.totalorder %s7335_s30, %s7329_s28 }
 0x2ab   : > { %v5052_v59 = vrot.slane %v5051_v32, 1  ;;  %v5121_v23 = vadd.f32 %v5120_v62, %v5119_v55  ;;  %p7332_p3 = pneg %p7331_p11  ;;  %p7338_p1 = por %p7337_p9, %p7336_p7 }
 0x2ad   : > { %v5053_v61 = vadd.f32 %v5052_v59, %v5051_v32  ;;  %v5122_v33 = vrot.slane %v5121_v23, 1  ;;  %p7339_p0 = pnand %p7338_p1, %p7332_p3 }
 0x2af   : > { %5054 = vst [vmem:[%s214_s27] sm:$0x1] %v5053_v61  ;;  %v5123_v63 = vadd.f32 %v5122_v33, %v5121_v23 }
 0x2b1   : > { %5124 = vst [vmem:[%s214_s27 + $0x1] sm:$0x1] %v5123_v63 }
 0x2b2   : > { %7342 = shalt.err (!%p7339_p0)
}
 0x2b3   : > { %s7343_s6 = scalar_lea.hbm %s9211_s5, 32  ;;  %s7347_s11 = scalar_lea.hbm %s9258_s3, 64 }
 0x2b4   : > { %p7344_p5 = scmp.ne.s32.totalorder %s9211_s5, %s7343_s6  ;;  %p7348_p4 = scmp.lt.u32.totalorder %s9211_s5, %s9258_s3 }
 0x2b5   : > { %p7349_p6 = scmp.lt.u32.totalorder %s7347_s11, %s7343_s6  ;;  %p7351_p10 = scmp.lt.u32.totalorder %s7343_s6, %s9211_s5 }
 0x2b6   : > { %p7345_p13 = pnand %p7344_p5, %p7527_p12 }
 0x2b7   : > { %p7350_p8 = por %p7349_p6, %p7348_p4 }
 0x2b8   : > { %p7346_p2 = pneg %p7345_p13 }
 0x2b9   : > { %p7352_p11 = por %p7351_p10, %p7350_p8 }
 0x2bb   : > { %p7353_p3 = pnand %p7352_p11, %p7346_p2 }
 0x2bd   : > { %7356 = shalt.err (!%p7353_p3)
}
 0x2be   : > { %6994 = dma.vmem_to_hbm [thread:$0]  (%p7527_p12), %s9213_s22, 32, %s9211_s5, %s5291_s23  }
 0x2bf PF: > { %s5332_s8 = sand.u32 1, %s7391_s12   ;;  %p9332_p7 = scmp.ne.s32.totalorder %s9273_s19, 0 }
 0x2c0   : > { %p9333_p9 = scmp.ge.s32.totalorder %s7403_s15, 2  ;;  %s5333_s29 = scalar_lea.sflag [#allocation4], %s5332_s8 }
 0x2c2   : > { %p7006_p1 = pnand %p9333_p9, %p9332_p7 }
 0x2c4   : > { %7382 = dma.done.wait (!%p7006_p1), %s5333_s29, 2048  }
 0x2c5   : > { %7384 = vsyncadd (!%p7006_p1), %s5333_s29, 4294965248  ;;  %s5342_s25 = scalar_lea.sflag [#allocation9], %s5332_s8 }
 0x2c6   : > { %7386 = dma.done.wait (!%p7006_p1), %s5342_s25, 32  }
 0x2c7   : > { %7388 = vsyncadd (!%p7006_p1), %s5342_s25, 4294967264  ;;  %p21_p12 = scmp.ge.s32.totalorder %s7489_s24, 4   ;;  %s9334_s12 = smov %s7395_s13 }
 0x2c8   : > { %s9335_s13 = smov %s7399_s14  ;;  %s9336_s14 = smov %s7523_s17 }
 0x2c9   : > { %s9337_s15 = smov %s7489_s24  ;;  %23 = sbr.rel (!%p21_p12) target bundleno = 8 (0x8), region = 96 }
 0x2d0   :  { %5347 = vsyncpa [#allocation3], 1 }
 0x2d1   :  { %5349 = vsyncpa [#allocation3 + $0x1], 1 }
 0x2d2   :  { %5350 = vsyncpa [#allocation6], 1 }
 0x2d3   :  { %5351 = vsyncpa [#allocation4], 1 }
 0x2d4   :  { %5353 = vsyncpa [#allocation4 + $0x1], 1 }
 0x2d5   :  { %5354 = vsyncpa [#allocation9], 1 }
 0x2d6   :  { %5356 = vsyncpa [#allocation9 + $0x1], 1 }

</bundles_post_ra>
